<compile_context>
chip_gen: v7x
topology: tpu7x:2x2x1
jax: 0.10.0
libtpu: 0.0.40
codegen_flags: <defaults>
</compile_context>

<pallas_src>
from functools import partial

import jax
import jax.numpy as jnp
from jax.experimental import pallas as pl
from jax.experimental.pallas import tpu as pltpu

# ---- hyperparameters from the PyTorch module ----
N_EMBD = 24
BLOCK_SIZE = 3
N_HEAD = 3
N_LAYER = 4
HEAD_SIZE = N_EMBD // N_HEAD          # 8
FF = 4 * N_EMBD                       # 96
LN_EPS = 1e-5
LANE = 128
NEG_INF = -1e30

QKV_W = 2 * N_HEAD * LANE             # 768  : [A_0|A_1|A_2|V_0|V_1|V_2]
IN_W = QKV_W + LANE                   # 896  : + lane-padded W1
OUT_H = N_HEAD * LANE + LANE          # 512  : [wproj rows | lane-padded W2 rows]
NVEC = 7                              # per-layer packed vectors


def gpt_kernel(x_ref, w_in_ref, w_out_ref, vecs_ref, lmw_ref, lmb_ref,
               bias_ref, tgt_ref, logits_ref, loss_ref, *, n_valid):
    R, C = x_ref.shape                 # R = row-padded B*T (multiple of 8)
    bf = jnp.bfloat16
    x2 = x_ref[...]                    # (R, C) f32, stays 2D all the way
    bias = bias_ref[...]               # (N_HEAD*R, R) additive mask (hoisted load)

    # TODO(synk): the source Head.forward contains typos (`k.shape(-1)` would
    # raise, `tril[:T:T]` is a degenerate slice); the intended nanoGPT
    # semantics (1/sqrt(head_size) scale, causal tril[:T,:T] mask) are
    # implemented here.  Dropout layers are identity (eval / inference mode).

    def ln(x, idx):                    # vecs[idx] = weight, vecs[idx+1] = bias
        w = vecs_ref[idx, :, :C]
        b = vecs_ref[idx + 1, :, :C]
        mu = jnp.mean(x, axis=-1, keepdims=True)
        xc = x - mu
        var = jnp.mean(xc * xc, axis=-1, keepdims=True)
        return xc * jax.lax.rsqrt(var + LN_EPS) * w + b

    for l in range(N_LAYER):
        base = NVEC * l
        x_bf = x2.astype(bf)
        xT_bf = jnp.transpose(x2).astype(bf)       # (C, R): ONE transpose / layer

        # fused projection: [x @ (scale*Wq_h@Wk_h^T) | x @ Wv_h], head blocks
        # lane-aligned at multiples of 128
        yv = jnp.dot(x_bf, w_in_ref[l, :, :QKV_W],
                     preferred_element_type=jnp.float32)        # (R, 768)
        v_bf = yv[:, N_HEAD * LANE:QKV_W].astype(bf)            # (R, 384)

        # per-head scores S_h = (x A_h) x^T, stacked along sublanes -> 1 softmax
        s_blocks = [
            jnp.dot(yv[:, h * LANE:h * LANE + C].astype(bf), xT_bf,
                    preferred_element_type=jnp.float32)         # (R, R)
            for h in range(N_HEAD)]
        s = jnp.concatenate(s_blocks, axis=0) + bias            # (3R, R)
        m = jnp.max(s, axis=-1, keepdims=True)
        e = jnp.exp(s - m)
        p = e * pl.reciprocal(jnp.sum(e, axis=-1, keepdims=True), approx=True)

        # per-head PV; heads stay in their own 128-lane blocks so the lane
        # concat is pure tile assembly and the padded wproj folds the head
        # concatenation into one matmul.
        outs = [
            jnp.dot(p[h * R:(h + 1) * R, :].astype(bf),
                    v_bf[:, h * LANE:(h + 1) * LANE],
                    preferred_element_type=jnp.float32)         # (R, 128)
            for h in range(N_HEAD)]
        oh = jnp.concatenate(outs, axis=-1).astype(bf)          # (R, 384)
        sa = jnp.dot(oh, w_out_ref[l, :N_HEAD * LANE, :],
                     preferred_element_type=jnp.float32) + vecs_ref[base + 4, :, :C]

        # post-norm residual (matches Block.forward)
        x2 = ln(x2 + sa, base + 0)

        # ------- feed-forward (hidden lane-padded to 128) -------------------
        h1 = jnp.maximum(
            jnp.dot(x2.astype(bf), w_in_ref[l, :, QKV_W:],
                    preferred_element_type=jnp.float32) + vecs_ref[base + 5], 0.0)
        ff = jnp.dot(h1.astype(bf), w_out_ref[l, N_HEAD * LANE:, :],
                     preferred_element_type=jnp.float32) + vecs_ref[base + 6, :, :C]
        x2 = ln(x2 + ff, base + 2)

    # ------- final LN + lm head (lane dim padded to 128) --------------------
    xf = ln(x2, NVEC * N_LAYER)
    logits = jnp.dot(xf.astype(bf), lmw_ref[...],
                     preferred_element_type=jnp.float32) + lmb_ref[...]
    logits_ref[...] = logits            # lane-dense (R, VPAD) store

    # ------- cross entropy (mean over the n_valid real tokens) --------------
    # padded lanes carry logit ~ -1e30 (zero weight + -inf bias) so they never
    # win the max and contribute exp(...)=0 to the lse; padded rows are masked.
    m = jnp.max(logits, axis=-1, keepdims=True)
    lse = jnp.log(jnp.sum(jnp.exp(logits - m), axis=-1, keepdims=True)) + m
    col = jax.lax.broadcasted_iota(jnp.int32, logits.shape, 1)
    picked = jnp.sum(jnp.where(col == tgt_ref[...], logits, 0.0),
                     axis=-1, keepdims=True)
    per_tok = lse - picked                                       # (R, 1)
    row = jax.lax.broadcasted_iota(jnp.int32, per_tok.shape, 0)
    loss_ref[0, 0] = jnp.sum(jnp.where(row < n_valid, per_tok, 0.0)) / n_valid


def make_params(key, vocab_size):
    """Raw f32 model parameters (linear weights stored as (in, out))."""
    C, L, H = N_EMBD, N_LAYER, FF
    ks = jax.random.split(key, 9)
    nrm = lambda k, s: 0.02 * jax.random.normal(k, s, jnp.float32)
    return dict(
        tok_emb=nrm(ks[0], (vocab_size, C)),
        pos_emb=nrm(ks[1], (BLOCK_SIZE, C)),
        wq=nrm(ks[2], (L, C, C)), wk=nrm(ks[3], (L, C, C)), wv=nrm(ks[4], (L, C, C)),
        wproj=nrm(ks[5], (L, C, C)), bproj=jnp.zeros((L, C), jnp.float32),
        w1=nrm(ks[6], (L, C, H)), b1=jnp.zeros((L, H), jnp.float32),
        w2=nrm(ks[7], (L, H, C)), b2=jnp.zeros((L, C), jnp.float32),
        ln1w=jnp.ones((L, C), jnp.float32), ln1b=jnp.zeros((L, C), jnp.float32),
        ln2w=jnp.ones((L, C), jnp.float32), ln2b=jnp.zeros((L, C), jnp.float32),
        lnfw=jnp.ones((C,), jnp.float32), lnfb=jnp.zeros((C,), jnp.float32),
        lmw=nrm(ks[8], (C, vocab_size)), lmb=jnp.zeros((vocab_size,), jnp.float32),
    )


def prepare_kernel_params(params, batch_size):
    """One-time packing into the kernel's padded, lane-aligned layout.
    Kept OUT of the per-call hot path (review item 1)."""
    C, L, HS, T = N_EMBD, N_LAYER, HEAD_SIZE, BLOCK_SIZE
    V = params['lmw'].shape[-1]
    VPAD = ((V + LANE - 1) // LANE) * LANE
    BT = batch_size * T
    R = ((BT + 7) // 8) * 8           # row-pad to one sublane tile
    scale = HS ** -0.5

    # --- w_in: [A_0|A_1|A_2 | V_0|V_1|V_2 | W1], one 128-lane block each ------
    w_in = jnp.zeros((L, C, IN_W), jnp.float32)
    for h in range(N_HEAD):
        sl = slice(h * HS, (h + 1) * HS)
        a_h = scale * jnp.einsum('lck,ldk->lcd',
                                 params['wq'][:, :, sl], params['wk'][:, :, sl])
        w_in = w_in.at[:, :, h * LANE:h * LANE + C].set(a_h)
        w_in = w_in.at[:, :, (N_HEAD + h) * LANE:(N_HEAD + h) * LANE + HS].set(
            params['wv'][:, :, sl])
    w_in = w_in.at[:, :, QKV_W:QKV_W + FF].set(params['w1']).astype(jnp.bfloat16)

    # --- w_out: [wproj rows (head-blocked, zero padding rows) ; W2 rows] ------
    w_out = jnp.zeros((L, OUT_H, C), jnp.float32)
    for h in range(N_HEAD):
        w_out = w_out.at[:, h * LANE:h * LANE + HS, :].set(
            params['wproj'][:, h * HS:(h + 1) * HS, :])
    w_out = w_out.at[:, N_HEAD * LANE:N_HEAD * LANE + FF, :].set(
        params['w2']).astype(jnp.bfloat16)

    # --- small vectors: packed, pre-broadcast to R rows, one lane-block each --
    pad_lane = lambda v: jnp.pad(v, ((0, 0), (0, LANE - v.shape[-1])))
    per_layer = jnp.stack(
        [pad_lane(params['ln1w']), pad_lane(params['ln1b']),
         pad_lane(params['ln2w']), pad_lane(params['ln2b']),
         pad_lane(params['bproj']), pad_lane(params['b1']),
         pad_lane(params['b2'])], axis=1)                       # (L, 7, 128)
    final = jnp.stack([jnp.pad(params['lnfw'], (0, LANE - C)),
                       jnp.pad(params['lnfb'], (0, LANE - C))])  # (2, 128)
    vecs = jnp.concatenate([per_layer.reshape(L * NVEC, LANE), final], axis=0)
    vecs = jnp.broadcast_to(vecs[:, None, :], (L * NVEC + 2, R, LANE))

    # --- lane-padded lm head: zero weight cols + -inf bias on padding lanes ---
    lmw_pad = jnp.zeros((C, VPAD), jnp.float32).at[:, :V].set(
        params['lmw']).astype(jnp.bfloat16)
    lmb_pad = jnp.full((VPAD,), NEG_INF, jnp.float32).at[:V].set(params['lmb'])
    lmb_pad = jnp.broadcast_to(lmb_pad[None, :], (R, VPAD))

    # --- block-diagonal + causal additive bias, replicated per head (sublane
    #     stacked) over the row-padded flattened tokens --------------------------
    idx = jnp.arange(R)
    valid = idx < BT
    same_batch = (idx[:, None] // T) == (idx[None, :] // T)
    causal = (idx[None, :] % T) <= (idx[:, None] % T)
    ok = valid[:, None] & valid[None, :] & same_batch & causal
    bias = jnp.where(ok, 0.0, NEG_INF).astype(jnp.float32)      # (R, R)
    bias = jnp.tile(bias, (N_HEAD, 1))                          # (3R, R)

    return dict(tok_emb=params['tok_emb'], pos_emb=params['pos_emb'],
                w_in=w_in, w_out=w_out, vecs=vecs,
                lmw=lmw_pad, lmb=lmb_pad, bias=bias)


@partial(jax.jit, static_argnames=('vocab_size',))
def gpt_forward(prep, input_index, targets, vocab_size):
    B, T = input_index.shape
    C = N_EMBD
    BT = B * T
    R = prep['bias'].shape[-1]
    VPAD = prep['lmw'].shape[-1]

    # token / position embedding gathers in plain JAX, flatten + row-pad to R
    tok = prep['tok_emb'][input_index]                    # (B, T, C)
    pos = prep['pos_emb'][jnp.arange(T)]                  # (T, C)
    x2 = (tok + pos[None]).reshape(BT, C)
    x2 = jnp.pad(x2, ((0, R - BT), (0, 0)))

    tgt = jnp.pad(targets.reshape(BT), (0, R - BT)).reshape(R, 1).astype(jnp.int32)

    args = [x2, prep['w_in'], prep['w_out'], prep['vecs'],
            prep['lmw'], prep['lmb'], prep['bias'], tgt]

    vmem = pltpu.MemorySpace.VMEM
    smem = pltpu.MemorySpace.SMEM
    logits_pad, loss = pl.pallas_call(
        partial(gpt_kernel, n_valid=BT),
        out_shape=(jax.ShapeDtypeStruct((R, VPAD), jnp.float32),
                   jax.ShapeDtypeStruct((1, 1), jnp.float32)),
        in_specs=[pl.BlockSpec(memory_space=vmem)] * len(args),
        out_specs=(pl.BlockSpec(memory_space=vmem),
                   pl.BlockSpec(memory_space=smem)),
    )(*args)
    # padded logit columns hold ~-1e30: keep this slice co-located with the call
    return logits_pad[:BT, :vocab_size], loss[0, 0]


def reference_forward(params, input_index, targets):
    """Pure-JAX f32 reference of the same math."""
    B, T = input_index.shape
    V = params['lmw'].shape[-1]
    x = params['tok_emb'][input_index] + params['pos_emb'][jnp.arange(T)][None]
    causal = jnp.arange(T)[None, :] <= jnp.arange(T)[:, None]
    scale = HEAD_SIZE ** -0.5

    def ln(x, w, b):
        mu = x.mean(-1, keepdims=True)
        var = ((x - mu) ** 2).mean(-1, keepdims=True)
        return (x - mu) / jnp.sqrt(var + LN_EPS) * w + b

    for l in range(N_LAYER):
        q = x @ params['wq'][l]
        k = x @ params['wk'][l]
        v = x @ params['wv'][l]
        heads = []
        for h in range(N_HEAD):
            sl = slice(h * HEAD_SIZE, (h + 1) * HEAD_SIZE)
            wei = jnp.einsum('btd,bsd->bts', q[..., sl], k[..., sl]) * scale
            wei = jnp.where(causal, wei, -jnp.inf)
            wei = jax.nn.softmax(wei, axis=-1)
            heads.append(jnp.einsum('bts,bsd->btd', wei, v[..., sl]))
        sa = jnp.concatenate(heads, -1) @ params['wproj'][l] + params['bproj'][l]
        x = ln(x + sa, params['ln1w'][l], params['ln1b'][l])
        hdn = jax.nn.relu(x @ params['w1'][l] + params['b1'][l])
        ff = hdn @ params['w2'][l] + params['b2'][l]
        x = ln(x + ff, params['ln2w'][l], params['ln2b'][l])
    x = ln(x, params['lnfw'], params['lnfb'])
    logits = (x @ params['lmw'] + params['lmb']).reshape(B * T, V)
    tg = targets.reshape(B * T)
    lse = jax.nn.logsumexp(logits, axis=-1)
    loss = jnp.mean(lse - logits[jnp.arange(B * T), tg])
    return logits, loss


if __name__ == "__main__":
    vocab_size = 32
    B, T = 2, BLOCK_SIZE

    key = jax.random.PRNGKey(0)
    pkey, ikey, tkey = jax.random.split(key, 3)
    params = make_params(pkey, vocab_size)
    prep = prepare_kernel_params(params, batch_size=B)   # one-time, off hot path
    input_index = jax.random.randint(ikey, (B, T), 0, vocab_size)
    targets = jax.random.randint(tkey, (B, T), 0, vocab_size)

    logits, loss = gpt_forward(prep, input_index, targets, vocab_size)
    jax.block_until_ready((logits, loss))

    ref_logits, ref_loss = reference_forward(params, input_index, targets)
    # bf16 matmul inputs + folded Wq@Wk^T reassociation -> slightly looser tol
    assert jnp.allclose(logits, ref_logits, atol=2e-2, rtol=2e-2), "logits mismatch"
    assert jnp.allclose(loss, ref_loss, atol=2e-2, rtol=2e-2), "loss mismatch"

    print("KERNEL_OK")
</pallas_src>

<mosaic_0001>
module attributes {stable_mosaic.version = 11 : i64} {
  func.func @gpt_kernel(%arg0: memref<8x24xf32, #tpu.memory_space<vmem>>, %arg1: memref<4x24x896xbf16, #tpu.memory_space<vmem>>, %arg2: memref<4x512x24xbf16, #tpu.memory_space<vmem>>, %arg3: memref<30x8x128xf32, #tpu.memory_space<vmem>>, %arg4: memref<24x128xbf16, #tpu.memory_space<vmem>>, %arg5: memref<8x128xf32, #tpu.memory_space<vmem>>, %arg6: memref<24x8xf32, #tpu.memory_space<vmem>>, %arg7: memref<8x1xi32, #tpu.memory_space<vmem>>, %arg8: memref<8x128xf32, #tpu.memory_space<vmem>>, %arg9: memref<1x1xf32, #tpu.memory_space<smem>>) attributes {dimension_semantics = [], scalar_prefetch = 0 : i64, scratch_operands = 0 : i64, tpu.core_type = #tpu.core_type<tc>} {
    %c0 = arith.constant 0 : index
    %c0_0 = arith.constant 0 : index
    %0 = vector.load %arg0[%c0, %c0_0] : memref<8x24xf32, #tpu.memory_space<vmem>>, vector<8x24xf32>
    %c0_1 = arith.constant 0 : index
    %c0_2 = arith.constant 0 : index
    %1 = vector.load %arg6[%c0_1, %c0_2] : memref<24x8xf32, #tpu.memory_space<vmem>>, vector<24x8xf32>
    %2 = arith.truncf %0 : vector<8x24xf32> to vector<8x24xbf16>
    %3 = tpu.transpose %0, [1, 0] : vector<8x24xf32> -> vector<24x8xf32>
    %4 = arith.truncf %3 : vector<24x8xf32> to vector<24x8xbf16>
    %c0_3 = arith.constant 0 : index
    %c0_4 = arith.constant 0 : index
    %c0_5 = arith.constant 0 : index
    %5 = vector.load %arg1[%c0_3, %c0_4, %c0_5] : memref<4x24x896xbf16, #tpu.memory_space<vmem>>, vector<1x24x768xbf16>
    %6 = vector.shape_cast %5 : vector<1x24x768xbf16> to vector<24x768xbf16>
    %cst = arith.constant dense<0.000000e+00> : vector<8x768xf32>
    %7 = tpu.matmul %2, %6, %cst {dimension_numbers = #tpu.dot_dimension_numbers<[1], [0], [0], [1], [0, 0, 1, 1], [], []>} : vector<8x24xbf16>, vector<24x768xbf16>, vector<8x768xf32> -> vector<8x768xf32>
    %8 = vector.extract_strided_slice %7 {offsets = [0, 384], sizes = [8, 384], strides = [1, 1]} : vector<8x768xf32> to vector<8x384xf32>
    %9 = arith.truncf %8 : vector<8x384xf32> to vector<8x384xbf16>
    %10 = vector.extract_strided_slice %7 {offsets = [0, 0], sizes = [8, 24], strides = [1, 1]} : vector<8x768xf32> to vector<8x24xf32>
    %11 = arith.truncf %10 : vector<8x24xf32> to vector<8x24xbf16>
    %cst_6 = arith.constant dense<0.000000e+00> : vector<8x8xf32>
    %12 = tpu.matmul %11, %4, %cst_6 {dimension_numbers = #tpu.dot_dimension_numbers<[1], [0], [0], [1], [0, 0, 1, 1], [], []>} : vector<8x24xbf16>, vector<24x8xbf16>, vector<8x8xf32> -> vector<8x8xf32>
    %13 = vector.extract_strided_slice %7 {offsets = [0, 128], sizes = [8, 24], strides = [1, 1]} : vector<8x768xf32> to vector<8x24xf32>
    %14 = arith.truncf %13 : vector<8x24xf32> to vector<8x24xbf16>
    %cst_7 = arith.constant dense<0.000000e+00> : vector<8x8xf32>
    %15 = tpu.matmul %14, %4, %cst_7 {dimension_numbers = #tpu.dot_dimension_numbers<[1], [0], [0], [1], [0, 0, 1, 1], [], []>} : vector<8x24xbf16>, vector<24x8xbf16>, vector<8x8xf32> -> vector<8x8xf32>
    %16 = vector.extract_strided_slice %7 {offsets = [0, 256], sizes = [8, 24], strides = [1, 1]} : vector<8x768xf32> to vector<8x24xf32>
    %17 = arith.truncf %16 : vector<8x24xf32> to vector<8x24xbf16>
    %cst_8 = arith.constant dense<0.000000e+00> : vector<8x8xf32>
    %18 = tpu.matmul %17, %4, %cst_8 {dimension_numbers = #tpu.dot_dimension_numbers<[1], [0], [0], [1], [0, 0, 1, 1], [], []>} : vector<8x24xbf16>, vector<24x8xbf16>, vector<8x8xf32> -> vector<8x8xf32>
    %19 = tpu.concatenate %12, %15, %18 in 0 : vector<8x8xf32>, vector<8x8xf32>, vector<8x8xf32> -> vector<24x8xf32>
    %20 = arith.addf %19, %1 : vector<24x8xf32>
    %cst_9 = arith.constant dense<0xFF800000> : vector<24xf32>
    %21 = vector.multi_reduction <maximumf>, %20, %cst_9 [1] : vector<24x8xf32> to vector<24xf32>
    %22 = vector.shape_cast %21 : vector<24xf32> to vector<24x1xf32>
    %23 = vector.broadcast %22 : vector<24x1xf32> to vector<24x8xf32>
    %24 = arith.subf %20, %23 : vector<24x8xf32>
    %25 = math.exp %24 : vector<24x8xf32>
    %cst_10 = arith.constant dense<0.000000e+00> : vector<24xf32>
    %26 = vector.multi_reduction <add>, %25, %cst_10 [1] : vector<24x8xf32> to vector<24xf32>
    %27 = vector.shape_cast %26 : vector<24xf32> to vector<24x1xf32>
    %28 = tpu.reciprocal %27 {approx = true} : vector<24x1xf32> -> vector<24x1xf32>
    %29 = vector.broadcast %28 : vector<24x1xf32> to vector<24x8xf32>
    %30 = arith.mulf %25, %29 : vector<24x8xf32>
    %31 = vector.extract_strided_slice %30 {offsets = [0, 0], sizes = [8, 8], strides = [1, 1]} : vector<24x8xf32> to vector<8x8xf32>
    %32 = arith.truncf %31 : vector<8x8xf32> to vector<8x8xbf16>
    %33 = vector.extract_strided_slice %9 {offsets = [0, 0], sizes = [8, 128], strides = [1, 1]} : vector<8x384xbf16> to vector<8x128xbf16>
    %cst_11 = arith.constant dense<0.000000e+00> : vector<8x128xf32>
    %34 = tpu.matmul %32, %33, %cst_11 {dimension_numbers = #tpu.dot_dimension_numbers<[1], [0], [0], [1], [0, 0, 1, 1], [], []>} : vector<8x8xbf16>, vector<8x128xbf16>, vector<8x128xf32> -> vector<8x128xf32>
    %35 = vector.extract_strided_slice %30 {offsets = [8, 0], sizes = [8, 8], strides = [1, 1]} : vector<24x8xf32> to vector<8x8xf32>
    %36 = arith.truncf %35 : vector<8x8xf32> to vector<8x8xbf16>
    %37 = vector.extract_strided_slice %9 {offsets = [0, 128], sizes = [8, 128], strides = [1, 1]} : vector<8x384xbf16> to vector<8x128xbf16>
    %cst_12 = arith.constant dense<0.000000e+00> : vector<8x128xf32>
    %38 = tpu.matmul %36, %37, %cst_12 {dimension_numbers = #tpu.dot_dimension_numbers<[1], [0], [0], [1], [0, 0, 1, 1], [], []>} : vector<8x8xbf16>, vector<8x128xbf16>, vector<8x128xf32> -> vector<8x128xf32>
    %39 = vector.extract_strided_slice %30 {offsets = [16, 0], sizes = [8, 8], strides = [1, 1]} : vector<24x8xf32> to vector<8x8xf32>
    %40 = arith.truncf %39 : vector<8x8xf32> to vector<8x8xbf16>
    %41 = vector.extract_strided_slice %9 {offsets = [0, 256], sizes = [8, 128], strides = [1, 1]} : vector<8x384xbf16> to vector<8x128xbf16>
    %cst_13 = arith.constant dense<0.000000e+00> : vector<8x128xf32>
    %42 = tpu.matmul %40, %41, %cst_13 {dimension_numbers = #tpu.dot_dimension_numbers<[1], [0], [0], [1], [0, 0, 1, 1], [], []>} : vector<8x8xbf16>, vector<8x128xbf16>, vector<8x128xf32> -> vector<8x128xf32>
    %43 = tpu.concatenate %34, %38, %42 in 1 : vector<8x128xf32>, vector<8x128xf32>, vector<8x128xf32> -> vector<8x384xf32>
    %44 = arith.truncf %43 : vector<8x384xf32> to vector<8x384xbf16>
    %c0_14 = arith.constant 0 : index
    %c0_15 = arith.constant 0 : index
    %c0_16 = arith.constant 0 : index
    %45 = vector.load %arg2[%c0_14, %c0_15, %c0_16] : memref<4x512x24xbf16, #tpu.memory_space<vmem>>, vector<1x384x24xbf16>
    %46 = vector.shape_cast %45 : vector<1x384x24xbf16> to vector<384x24xbf16>
    %cst_17 = arith.constant dense<0.000000e+00> : vector<8x24xf32>
    %47 = tpu.matmul %44, %46, %cst_17 {dimension_numbers = #tpu.dot_dimension_numbers<[1], [0], [0], [1], [0, 0, 1, 1], [], []>} : vector<8x384xbf16>, vector<384x24xbf16>, vector<8x24xf32> -> vector<8x24xf32>
    %c4 = arith.constant 4 : index
    %c0_18 = arith.constant 0 : index
    %c0_19 = arith.constant 0 : index
    %48 = vector.load %arg3[%c4, %c0_18, %c0_19] : memref<30x8x128xf32, #tpu.memory_space<vmem>>, vector<1x8x24xf32>
    %49 = vector.shape_cast %48 : vector<1x8x24xf32> to vector<8x24xf32>
    %50 = arith.addf %47, %49 : vector<8x24xf32>
    %51 = arith.addf %0, %50 : vector<8x24xf32>
    %c0_20 = arith.constant 0 : index
    %c0_21 = arith.constant 0 : index
    %c0_22 = arith.constant 0 : index
    %52 = vector.load %arg3[%c0_20, %c0_21, %c0_22] : memref<30x8x128xf32, #tpu.memory_space<vmem>>, vector<1x8x24xf32>
    %53 = vector.shape_cast %52 : vector<1x8x24xf32> to vector<8x24xf32>
    %c1 = arith.constant 1 : index
    %c0_23 = arith.constant 0 : index
    %c0_24 = arith.constant 0 : index
    %54 = vector.load %arg3[%c1, %c0_23, %c0_24] : memref<30x8x128xf32, #tpu.memory_space<vmem>>, vector<1x8x24xf32>
    %55 = vector.shape_cast %54 : vector<1x8x24xf32> to vector<8x24xf32>
    %cst_25 = arith.constant dense<0.000000e+00> : vector<8xf32>
    %56 = vector.multi_reduction <add>, %51, %cst_25 [1] : vector<8x24xf32> to vector<8xf32>
    %57 = vector.shape_cast %56 : vector<8xf32> to vector<8x1xf32>
    %cst_26 = arith.constant 2.400000e+01 : f32
    %58 = vector.broadcast %cst_26 : f32 to vector<8x1xf32>
    %59 = arith.divf %57, %58 : vector<8x1xf32>
    %60 = vector.broadcast %59 : vector<8x1xf32> to vector<8x24xf32>
    %61 = arith.subf %51, %60 : vector<8x24xf32>
    %62 = arith.mulf %61, %61 : vector<8x24xf32>
    %cst_27 = arith.constant dense<0.000000e+00> : vector<8xf32>
    %63 = vector.multi_reduction <add>, %62, %cst_27 [1] : vector<8x24xf32> to vector<8xf32>
    %64 = vector.shape_cast %63 : vector<8xf32> to vector<8x1xf32>
    %cst_28 = arith.constant 2.400000e+01 : f32
    %65 = vector.broadcast %cst_28 : f32 to vector<8x1xf32>
    %66 = arith.divf %64, %65 : vector<8x1xf32>
    %cst_29 = arith.constant 9.99999974E-6 : f32
    %67 = vector.broadcast %cst_29 : f32 to vector<8x1xf32>
    %68 = arith.addf %66, %67 : vector<8x1xf32>
    %69 = math.rsqrt %68 : vector<8x1xf32>
    %70 = vector.broadcast %69 : vector<8x1xf32> to vector<8x24xf32>
    %71 = arith.mulf %61, %70 : vector<8x24xf32>
    %72 = arith.mulf %71, %53 : vector<8x24xf32>
    %73 = arith.addf %72, %55 : vector<8x24xf32>
    %74 = arith.truncf %73 : vector<8x24xf32> to vector<8x24xbf16>
    %c0_30 = arith.constant 0 : index
    %c0_31 = arith.constant 0 : index
    %c768 = arith.constant 768 : index
    %75 = vector.load %arg1[%c0_30, %c0_31, %c768] : memref<4x24x896xbf16, #tpu.memory_space<vmem>>, vector<1x24x128xbf16>
    %76 = vector.shape_cast %75 : vector<1x24x128xbf16> to vector<24x128xbf16>
    %cst_32 = arith.constant dense<0.000000e+00> : vector<8x128xf32>
    %77 = tpu.matmul %74, %76, %cst_32 {dimension_numbers = #tpu.dot_dimension_numbers<[1], [0], [0], [1], [0, 0, 1, 1], [], []>} : vector<8x24xbf16>, vector<24x128xbf16>, vector<8x128xf32> -> vector<8x128xf32>
    %c5 = arith.constant 5 : index
    %c0_33 = arith.constant 0 : index
    %c0_34 = arith.constant 0 : index
    %78 = vector.load %arg3[%c5, %c0_33, %c0_34] : memref<30x8x128xf32, #tpu.memory_space<vmem>>, vector<1x8x128xf32>
    %79 = vector.shape_cast %78 : vector<1x8x128xf32> to vector<8x128xf32>
    %80 = arith.addf %77, %79 : vector<8x128xf32>
    %cst_35 = arith.constant 0.000000e+00 : f32
    %81 = vector.broadcast %cst_35 : f32 to vector<8x128xf32>
    %82 = arith.maximumf %80, %81 : vector<8x128xf32>
    %83 = arith.truncf %82 : vector<8x128xf32> to vector<8x128xbf16>
    %c0_36 = arith.constant 0 : index
    %c384 = arith.constant 384 : index
    %c0_37 = arith.constant 0 : index
    %84 = vector.load %arg2[%c0_36, %c384, %c0_37] : memref<4x512x24xbf16, #tpu.memory_space<vmem>>, vector<1x128x24xbf16>
    %85 = vector.shape_cast %84 : vector<1x128x24xbf16> to vector<128x24xbf16>
    %cst_38 = arith.constant dense<0.000000e+00> : vector<8x24xf32>
    %86 = tpu.matmul %83, %85, %cst_38 {dimension_numbers = #tpu.dot_dimension_numbers<[1], [0], [0], [1], [0, 0, 1, 1], [], []>} : vector<8x128xbf16>, vector<128x24xbf16>, vector<8x24xf32> -> vector<8x24xf32>
    %c6 = arith.constant 6 : index
    %c0_39 = arith.constant 0 : index
    %c0_40 = arith.constant 0 : index
    %87 = vector.load %arg3[%c6, %c0_39, %c0_40] : memref<30x8x128xf32, #tpu.memory_space<vmem>>, vector<1x8x24xf32>
    %88 = vector.shape_cast %87 : vector<1x8x24xf32> to vector<8x24xf32>
    %89 = arith.addf %86, %88 : vector<8x24xf32>
    %90 = arith.addf %73, %89 : vector<8x24xf32>
    %c2 = arith.constant 2 : index
    %c0_41 = arith.constant 0 : index
    %c0_42 = arith.constant 0 : index
    %91 = vector.load %arg3[%c2, %c0_41, %c0_42] : memref<30x8x128xf32, #tpu.memory_space<vmem>>, vector<1x8x24xf32>
    %92 = vector.shape_cast %91 : vector<1x8x24xf32> to vector<8x24xf32>
    %c3 = arith.constant 3 : index
    %c0_43 = arith.constant 0 : index
    %c0_44 = arith.constant 0 : index
    %93 = vector.load %arg3[%c3, %c0_43, %c0_44] : memref<30x8x128xf32, #tpu.memory_space<vmem>>, vector<1x8x24xf32>
    %94 = vector.shape_cast %93 : vector<1x8x24xf32> to vector<8x24xf32>
    %cst_45 = arith.constant dense<0.000000e+00> : vector<8xf32>
    %95 = vector.multi_reduction <add>, %90, %cst_45 [1] : vector<8x24xf32> to vector<8xf32>
    %96 = vector.shape_cast %95 : vector<8xf32> to vector<8x1xf32>
    %cst_46 = arith.constant 2.400000e+01 : f32
    %97 = vector.broadcast %cst_46 : f32 to vector<8x1xf32>
    %98 = arith.divf %96, %97 : vector<8x1xf32>
    %99 = vector.broadcast %98 : vector<8x1xf32> to vector<8x24xf32>
    %100 = arith.subf %90, %99 : vector<8x24xf32>
    %101 = arith.mulf %100, %100 : vector<8x24xf32>
    %cst_47 = arith.constant dense<0.000000e+00> : vector<8xf32>
    %102 = vector.multi_reduction <add>, %101, %cst_47 [1] : vector<8x24xf32> to vector<8xf32>
    %103 = vector.shape_cast %102 : vector<8xf32> to vector<8x1xf32>
    %cst_48 = arith.constant 2.400000e+01 : f32
    %104 = vector.broadcast %cst_48 : f32 to vector<8x1xf32>
    %105 = arith.divf %103, %104 : vector<8x1xf32>
    %cst_49 = arith.constant 9.99999974E-6 : f32
    %106 = vector.broadcast %cst_49 : f32 to vector<8x1xf32>
    %107 = arith.addf %105, %106 : vector<8x1xf32>
    %108 = math.rsqrt %107 : vector<8x1xf32>
    %109 = vector.broadcast %108 : vector<8x1xf32> to vector<8x24xf32>
    %110 = arith.mulf %100, %109 : vector<8x24xf32>
    %111 = arith.mulf %110, %92 : vector<8x24xf32>
    %112 = arith.addf %111, %94 : vector<8x24xf32>
    %113 = arith.truncf %112 : vector<8x24xf32> to vector<8x24xbf16>
    %114 = tpu.transpose %112, [1, 0] : vector<8x24xf32> -> vector<24x8xf32>
    %115 = arith.truncf %114 : vector<24x8xf32> to vector<24x8xbf16>
    %c1_50 = arith.constant 1 : index
    %c0_51 = arith.constant 0 : index
    %c0_52 = arith.constant 0 : index
    %116 = vector.load %arg1[%c1_50, %c0_51, %c0_52] : memref<4x24x896xbf16, #tpu.memory_space<vmem>>, vector<1x24x768xbf16>
    %117 = vector.shape_cast %116 : vector<1x24x768xbf16> to vector<24x768xbf16>
    %cst_53 = arith.constant dense<0.000000e+00> : vector<8x768xf32>
    %118 = tpu.matmul %113, %117, %cst_53 {dimension_numbers = #tpu.dot_dimension_numbers<[1], [0], [0], [1], [0, 0, 1, 1], [], []>} : vector<8x24xbf16>, vector<24x768xbf16>, vector<8x768xf32> -> vector<8x768xf32>
    %119 = vector.extract_strided_slice %118 {offsets = [0, 384], sizes = [8, 384], strides = [1, 1]} : vector<8x768xf32> to vector<8x384xf32>
    %120 = arith.truncf %119 : vector<8x384xf32> to vector<8x384xbf16>
    %121 = vector.extract_strided_slice %118 {offsets = [0, 0], sizes = [8, 24], strides = [1, 1]} : vector<8x768xf32> to vector<8x24xf32>
    %122 = arith.truncf %121 : vector<8x24xf32> to vector<8x24xbf16>
    %cst_54 = arith.constant dense<0.000000e+00> : vector<8x8xf32>
    %123 = tpu.matmul %122, %115, %cst_54 {dimension_numbers = #tpu.dot_dimension_numbers<[1], [0], [0], [1], [0, 0, 1, 1], [], []>} : vector<8x24xbf16>, vector<24x8xbf16>, vector<8x8xf32> -> vector<8x8xf32>
    %124 = vector.extract_strided_slice %118 {offsets = [0, 128], sizes = [8, 24], strides = [1, 1]} : vector<8x768xf32> to vector<8x24xf32>
    %125 = arith.truncf %124 : vector<8x24xf32> to vector<8x24xbf16>
    %cst_55 = arith.constant dense<0.000000e+00> : vector<8x8xf32>
    %126 = tpu.matmul %125, %115, %cst_55 {dimension_numbers = #tpu.dot_dimension_numbers<[1], [0], [0], [1], [0, 0, 1, 1], [], []>} : vector<8x24xbf16>, vector<24x8xbf16>, vector<8x8xf32> -> vector<8x8xf32>
    %127 = vector.extract_strided_slice %118 {offsets = [0, 256], sizes = [8, 24], strides = [1, 1]} : vector<8x768xf32> to vector<8x24xf32>
    %128 = arith.truncf %127 : vector<8x24xf32> to vector<8x24xbf16>
    %cst_56 = arith.constant dense<0.000000e+00> : vector<8x8xf32>
    %129 = tpu.matmul %128, %115, %cst_56 {dimension_numbers = #tpu.dot_dimension_numbers<[1], [0], [0], [1], [0, 0, 1, 1], [], []>} : vector<8x24xbf16>, vector<24x8xbf16>, vector<8x8xf32> -> vector<8x8xf32>
    %130 = tpu.concatenate %123, %126, %129 in 0 : vector<8x8xf32>, vector<8x8xf32>, vector<8x8xf32> -> vector<24x8xf32>
    %131 = arith.addf %130, %1 : vector<24x8xf32>
    %cst_57 = arith.constant dense<0xFF800000> : vector<24xf32>
    %132 = vector.multi_reduction <maximumf>, %131, %cst_57 [1] : vector<24x8xf32> to vector<24xf32>
    %133 = vector.shape_cast %132 : vector<24xf32> to vector<24x1xf32>
    %134 = vector.broadcast %133 : vector<24x1xf32> to vector<24x8xf32>
    %135 = arith.subf %131, %134 : vector<24x8xf32>
    %136 = math.exp %135 : vector<24x8xf32>
    %cst_58 = arith.constant dense<0.000000e+00> : vector<24xf32>
    %137 = vector.multi_reduction <add>, %136, %cst_58 [1] : vector<24x8xf32> to vector<24xf32>
    %138 = vector.shape_cast %137 : vector<24xf32> to vector<24x1xf32>
    %139 = tpu.reciprocal %138 {approx = true} : vector<24x1xf32> -> vector<24x1xf32>
    %140 = vector.broadcast %139 : vector<24x1xf32> to vector<24x8xf32>
    %141 = arith.mulf %136, %140 : vector<24x8xf32>
    %142 = vector.extract_strided_slice %141 {offsets = [0, 0], sizes = [8, 8], strides = [1, 1]} : vector<24x8xf32> to vector<8x8xf32>
    %143 = arith.truncf %142 : vector<8x8xf32> to vector<8x8xbf16>
    %144 = vector.extract_strided_slice %120 {offsets = [0, 0], sizes = [8, 128], strides = [1, 1]} : vector<8x384xbf16> to vector<8x128xbf16>
    %cst_59 = arith.constant dense<0.000000e+00> : vector<8x128xf32>
    %145 = tpu.matmul %143, %144, %cst_59 {dimension_numbers = #tpu.dot_dimension_numbers<[1], [0], [0], [1], [0, 0, 1, 1], [], []>} : vector<8x8xbf16>, vector<8x128xbf16>, vector<8x128xf32> -> vector<8x128xf32>
    %146 = vector.extract_strided_slice %141 {offsets = [8, 0], sizes = [8, 8], strides = [1, 1]} : vector<24x8xf32> to vector<8x8xf32>
    %147 = arith.truncf %146 : vector<8x8xf32> to vector<8x8xbf16>
    %148 = vector.extract_strided_slice %120 {offsets = [0, 128], sizes = [8, 128], strides = [1, 1]} : vector<8x384xbf16> to vector<8x128xbf16>
    %cst_60 = arith.constant dense<0.000000e+00> : vector<8x128xf32>
    %149 = tpu.matmul %147, %148, %cst_60 {dimension_numbers = #tpu.dot_dimension_numbers<[1], [0], [0], [1], [0, 0, 1, 1], [], []>} : vector<8x8xbf16>, vector<8x128xbf16>, vector<8x128xf32> -> vector<8x128xf32>
    %150 = vector.extract_strided_slice %141 {offsets = [16, 0], sizes = [8, 8], strides = [1, 1]} : vector<24x8xf32> to vector<8x8xf32>
    %151 = arith.truncf %150 : vector<8x8xf32> to vector<8x8xbf16>
    %152 = vector.extract_strided_slice %120 {offsets = [0, 256], sizes = [8, 128], strides = [1, 1]} : vector<8x384xbf16> to vector<8x128xbf16>
    %cst_61 = arith.constant dense<0.000000e+00> : vector<8x128xf32>
    %153 = tpu.matmul %151, %152, %cst_61 {dimension_numbers = #tpu.dot_dimension_numbers<[1], [0], [0], [1], [0, 0, 1, 1], [], []>} : vector<8x8xbf16>, vector<8x128xbf16>, vector<8x128xf32> -> vector<8x128xf32>
    %154 = tpu.concatenate %145, %149, %153 in 1 : vector<8x128xf32>, vector<8x128xf32>, vector<8x128xf32> -> vector<8x384xf32>
    %155 = arith.truncf %154 : vector<8x384xf32> to vector<8x384xbf16>
    %c1_62 = arith.constant 1 : index
    %c0_63 = arith.constant 0 : index
    %c0_64 = arith.constant 0 : index
    %156 = vector.load %arg2[%c1_62, %c0_63, %c0_64] : memref<4x512x24xbf16, #tpu.memory_space<vmem>>, vector<1x384x24xbf16>
    %157 = vector.shape_cast %156 : vector<1x384x24xbf16> to vector<384x24xbf16>
    %cst_65 = arith.constant dense<0.000000e+00> : vector<8x24xf32>
    %158 = tpu.matmul %155, %157, %cst_65 {dimension_numbers = #tpu.dot_dimension_numbers<[1], [0], [0], [1], [0, 0, 1, 1], [], []>} : vector<8x384xbf16>, vector<384x24xbf16>, vector<8x24xf32> -> vector<8x24xf32>
    %c11 = arith.constant 11 : index
    %c0_66 = arith.constant 0 : index
    %c0_67 = arith.constant 0 : index
    %159 = vector.load %arg3[%c11, %c0_66, %c0_67] : memref<30x8x128xf32, #tpu.memory_space<vmem>>, vector<1x8x24xf32>
    %160 = vector.shape_cast %159 : vector<1x8x24xf32> to vector<8x24xf32>
    %161 = arith.addf %158, %160 : vector<8x24xf32>
    %162 = arith.addf %112, %161 : vector<8x24xf32>
    %c7 = arith.constant 7 : index
    %c0_68 = arith.constant 0 : index
    %c0_69 = arith.constant 0 : index
    %163 = vector.load %arg3[%c7, %c0_68, %c0_69] : memref<30x8x128xf32, #tpu.memory_space<vmem>>, vector<1x8x24xf32>
    %164 = vector.shape_cast %163 : vector<1x8x24xf32> to vector<8x24xf32>
    %c8 = arith.constant 8 : index
    %c0_70 = arith.constant 0 : index
    %c0_71 = arith.constant 0 : index
    %165 = vector.load %arg3[%c8, %c0_70, %c0_71] : memref<30x8x128xf32, #tpu.memory_space<vmem>>, vector<1x8x24xf32>
    %166 = vector.shape_cast %165 : vector<1x8x24xf32> to vector<8x24xf32>
    %cst_72 = arith.constant dense<0.000000e+00> : vector<8xf32>
    %167 = vector.multi_reduction <add>, %162, %cst_72 [1] : vector<8x24xf32> to vector<8xf32>
    %168 = vector.shape_cast %167 : vector<8xf32> to vector<8x1xf32>
    %cst_73 = arith.constant 2.400000e+01 : f32
    %169 = vector.broadcast %cst_73 : f32 to vector<8x1xf32>
    %170 = arith.divf %168, %169 : vector<8x1xf32>
    %171 = vector.broadcast %170 : vector<8x1xf32> to vector<8x24xf32>
    %172 = arith.subf %162, %171 : vector<8x24xf32>
    %173 = arith.mulf %172, %172 : vector<8x24xf32>
    %cst_74 = arith.constant dense<0.000000e+00> : vector<8xf32>
    %174 = vector.multi_reduction <add>, %173, %cst_74 [1] : vector<8x24xf32> to vector<8xf32>
    %175 = vector.shape_cast %174 : vector<8xf32> to vector<8x1xf32>
    %cst_75 = arith.constant 2.400000e+01 : f32
    %176 = vector.broadcast %cst_75 : f32 to vector<8x1xf32>
    %177 = arith.divf %175, %176 : vector<8x1xf32>
    %cst_76 = arith.constant 9.99999974E-6 : f32
    %178 = vector.broadcast %cst_76 : f32 to vector<8x1xf32>
    %179 = arith.addf %177, %178 : vector<8x1xf32>
    %180 = math.rsqrt %179 : vector<8x1xf32>
    %181 = vector.broadcast %180 : vector<8x1xf32> to vector<8x24xf32>
    %182 = arith.mulf %172, %181 : vector<8x24xf32>
    %183 = arith.mulf %182, %164 : vector<8x24xf32>
    %184 = arith.addf %183, %166 : vector<8x24xf32>
    %185 = arith.truncf %184 : vector<8x24xf32> to vector<8x24xbf16>
    %c1_77 = arith.constant 1 : index
    %c0_78 = arith.constant 0 : index
    %c768_79 = arith.constant 768 : index
    %186 = vector.load %arg1[%c1_77, %c0_78, %c768_79] : memref<4x24x896xbf16, #tpu.memory_space<vmem>>, vector<1x24x128xbf16>
    %187 = vector.shape_cast %186 : vector<1x24x128xbf16> to vector<24x128xbf16>
    %cst_80 = arith.constant dense<0.000000e+00> : vector<8x128xf32>
    %188 = tpu.matmul %185, %187, %cst_80 {dimension_numbers = #tpu.dot_dimension_numbers<[1], [0], [0], [1], [0, 0, 1, 1], [], []>} : vector<8x24xbf16>, vector<24x128xbf16>, vector<8x128xf32> -> vector<8x128xf32>
    %c12 = arith.constant 12 : index
    %c0_81 = arith.constant 0 : index
    %c0_82 = arith.constant 0 : index
    %189 = vector.load %arg3[%c12, %c0_81, %c0_82] : memref<30x8x128xf32, #tpu.memory_space<vmem>>, vector<1x8x128xf32>
    %190 = vector.shape_cast %189 : vector<1x8x128xf32> to vector<8x128xf32>
    %191 = arith.addf %188, %190 : vector<8x128xf32>
    %cst_83 = arith.constant 0.000000e+00 : f32
    %192 = vector.broadcast %cst_83 : f32 to vector<8x128xf32>
    %193 = arith.maximumf %191, %192 : vector<8x128xf32>
    %194 = arith.truncf %193 : vector<8x128xf32> to vector<8x128xbf16>
    %c1_84 = arith.constant 1 : index
    %c384_85 = arith.constant 384 : index
    %c0_86 = arith.constant 0 : index
    %195 = vector.load %arg2[%c1_84, %c384_85, %c0_86] : memref<4x512x24xbf16, #tpu.memory_space<vmem>>, vector<1x128x24xbf16>
    %196 = vector.shape_cast %195 : vector<1x128x24xbf16> to vector<128x24xbf16>
    %cst_87 = arith.constant dense<0.000000e+00> : vector<8x24xf32>
    %197 = tpu.matmul %194, %196, %cst_87 {dimension_numbers = #tpu.dot_dimension_numbers<[1], [0], [0], [1], [0, 0, 1, 1], [], []>} : vector<8x128xbf16>, vector<128x24xbf16>, vector<8x24xf32> -> vector<8x24xf32>
    %c13 = arith.constant 13 : index
    %c0_88 = arith.constant 0 : index
    %c0_89 = arith.constant 0 : index
    %198 = vector.load %arg3[%c13, %c0_88, %c0_89] : memref<30x8x128xf32, #tpu.memory_space<vmem>>, vector<1x8x24xf32>
    %199 = vector.shape_cast %198 : vector<1x8x24xf32> to vector<8x24xf32>
    %200 = arith.addf %197, %199 : vector<8x24xf32>
    %201 = arith.addf %184, %200 : vector<8x24xf32>
    %c9 = arith.constant 9 : index
    %c0_90 = arith.constant 0 : index
    %c0_91 = arith.constant 0 : index
    %202 = vector.load %arg3[%c9, %c0_90, %c0_91] : memref<30x8x128xf32, #tpu.memory_space<vmem>>, vector<1x8x24xf32>
    %203 = vector.shape_cast %202 : vector<1x8x24xf32> to vector<8x24xf32>
    %c10 = arith.constant 10 : index
    %c0_92 = arith.constant 0 : index
    %c0_93 = arith.constant 0 : index
    %204 = vector.load %arg3[%c10, %c0_92, %c0_93] : memref<30x8x128xf32, #tpu.memory_space<vmem>>, vector<1x8x24xf32>
    %205 = vector.shape_cast %204 : vector<1x8x24xf32> to vector<8x24xf32>
    %cst_94 = arith.constant dense<0.000000e+00> : vector<8xf32>
    %206 = vector.multi_reduction <add>, %201, %cst_94 [1] : vector<8x24xf32> to vector<8xf32>
    %207 = vector.shape_cast %206 : vector<8xf32> to vector<8x1xf32>
    %cst_95 = arith.constant 2.400000e+01 : f32
    %208 = vector.broadcast %cst_95 : f32 to vector<8x1xf32>
    %209 = arith.divf %207, %208 : vector<8x1xf32>
    %210 = vector.broadcast %209 : vector<8x1xf32> to vector<8x24xf32>
    %211 = arith.subf %201, %210 : vector<8x24xf32>
    %212 = arith.mulf %211, %211 : vector<8x24xf32>
    %cst_96 = arith.constant dense<0.000000e+00> : vector<8xf32>
    %213 = vector.multi_reduction <add>, %212, %cst_96 [1] : vector<8x24xf32> to vector<8xf32>
    %214 = vector.shape_cast %213 : vector<8xf32> to vector<8x1xf32>
    %cst_97 = arith.constant 2.400000e+01 : f32
    %215 = vector.broadcast %cst_97 : f32 to vector<8x1xf32>
    %216 = arith.divf %214, %215 : vector<8x1xf32>
    %cst_98 = arith.constant 9.99999974E-6 : f32
    %217 = vector.broadcast %cst_98 : f32 to vector<8x1xf32>
    %218 = arith.addf %216, %217 : vector<8x1xf32>
    %219 = math.rsqrt %218 : vector<8x1xf32>
    %220 = vector.broadcast %219 : vector<8x1xf32> to vector<8x24xf32>
    %221 = arith.mulf %211, %220 : vector<8x24xf32>
    %222 = arith.mulf %221, %203 : vector<8x24xf32>
    %223 = arith.addf %222, %205 : vector<8x24xf32>
    %224 = arith.truncf %223 : vector<8x24xf32> to vector<8x24xbf16>
    %225 = tpu.transpose %223, [1, 0] : vector<8x24xf32> -> vector<24x8xf32>
    %226 = arith.truncf %225 : vector<24x8xf32> to vector<24x8xbf16>
    %c2_99 = arith.constant 2 : index
    %c0_100 = arith.constant 0 : index
    %c0_101 = arith.constant 0 : index
    %227 = vector.load %arg1[%c2_99, %c0_100, %c0_101] : memref<4x24x896xbf16, #tpu.memory_space<vmem>>, vector<1x24x768xbf16>
    %228 = vector.shape_cast %227 : vector<1x24x768xbf16> to vector<24x768xbf16>
    %cst_102 = arith.constant dense<0.000000e+00> : vector<8x768xf32>
    %229 = tpu.matmul %224, %228, %cst_102 {dimension_numbers = #tpu.dot_dimension_numbers<[1], [0], [0], [1], [0, 0, 1, 1], [], []>} : vector<8x24xbf16>, vector<24x768xbf16>, vector<8x768xf32> -> vector<8x768xf32>
    %230 = vector.extract_strided_slice %229 {offsets = [0, 384], sizes = [8, 384], strides = [1, 1]} : vector<8x768xf32> to vector<8x384xf32>
    %231 = arith.truncf %230 : vector<8x384xf32> to vector<8x384xbf16>
    %232 = vector.extract_strided_slice %229 {offsets = [0, 0], sizes = [8, 24], strides = [1, 1]} : vector<8x768xf32> to vector<8x24xf32>
    %233 = arith.truncf %232 : vector<8x24xf32> to vector<8x24xbf16>
    %cst_103 = arith.constant dense<0.000000e+00> : vector<8x8xf32>
    %234 = tpu.matmul %233, %226, %cst_103 {dimension_numbers = #tpu.dot_dimension_numbers<[1], [0], [0], [1], [0, 0, 1, 1], [], []>} : vector<8x24xbf16>, vector<24x8xbf16>, vector<8x8xf32> -> vector<8x8xf32>
    %235 = vector.extract_strided_slice %229 {offsets = [0, 128], sizes = [8, 24], strides = [1, 1]} : vector<8x768xf32> to vector<8x24xf32>
    %236 = arith.truncf %235 : vector<8x24xf32> to vector<8x24xbf16>
    %cst_104 = arith.constant dense<0.000000e+00> : vector<8x8xf32>
    %237 = tpu.matmul %236, %226, %cst_104 {dimension_numbers = #tpu.dot_dimension_numbers<[1], [0], [0], [1], [0, 0, 1, 1], [], []>} : vector<8x24xbf16>, vector<24x8xbf16>, vector<8x8xf32> -> vector<8x8xf32>
    %238 = vector.extract_strided_slice %229 {offsets = [0, 256], sizes = [8, 24], strides = [1, 1]} : vector<8x768xf32> to vector<8x24xf32>
    %239 = arith.truncf %238 : vector<8x24xf32> to vector<8x24xbf16>
    %cst_105 = arith.constant dense<0.000000e+00> : vector<8x8xf32>
    %240 = tpu.matmul %239, %226, %cst_105 {dimension_numbers = #tpu.dot_dimension_numbers<[1], [0], [0], [1], [0, 0, 1, 1], [], []>} : vector<8x24xbf16>, vector<24x8xbf16>, vector<8x8xf32> -> vector<8x8xf32>
    %241 = tpu.concatenate %234, %237, %240 in 0 : vector<8x8xf32>, vector<8x8xf32>, vector<8x8xf32> -> vector<24x8xf32>
    %242 = arith.addf %241, %1 : vector<24x8xf32>
    %cst_106 = arith.constant dense<0xFF800000> : vector<24xf32>
    %243 = vector.multi_reduction <maximumf>, %242, %cst_106 [1] : vector<24x8xf32> to vector<24xf32>
    %244 = vector.shape_cast %243 : vector<24xf32> to vector<24x1xf32>
    %245 = vector.broadcast %244 : vector<24x1xf32> to vector<24x8xf32>
    %246 = arith.subf %242, %245 : vector<24x8xf32>
    %247 = math.exp %246 : vector<24x8xf32>
    %cst_107 = arith.constant dense<0.000000e+00> : vector<24xf32>
    %248 = vector.multi_reduction <add>, %247, %cst_107 [1] : vector<24x8xf32> to vector<24xf32>
    %249 = vector.shape_cast %248 : vector<24xf32> to vector<24x1xf32>
    %250 = tpu.reciprocal %249 {approx = true} : vector<24x1xf32> -> vector<24x1xf32>
    %251 = vector.broadcast %250 : vector<24x1xf32> to vector<24x8xf32>
    %252 = arith.mulf %247, %251 : vector<24x8xf32>
    %253 = vector.extract_strided_slice %252 {offsets = [0, 0], sizes = [8, 8], strides = [1, 1]} : vector<24x8xf32> to vector<8x8xf32>
    %254 = arith.truncf %253 : vector<8x8xf32> to vector<8x8xbf16>
    %255 = vector.extract_strided_slice %231 {offsets = [0, 0], sizes = [8, 128], strides = [1, 1]} : vector<8x384xbf16> to vector<8x128xbf16>
    %cst_108 = arith.constant dense<0.000000e+00> : vector<8x128xf32>
    %256 = tpu.matmul %254, %255, %cst_108 {dimension_numbers = #tpu.dot_dimension_numbers<[1], [0], [0], [1], [0, 0, 1, 1], [], []>} : vector<8x8xbf16>, vector<8x128xbf16>, vector<8x128xf32> -> vector<8x128xf32>
    %257 = vector.extract_strided_slice %252 {offsets = [8, 0], sizes = [8, 8], strides = [1, 1]} : vector<24x8xf32> to vector<8x8xf32>
    %258 = arith.truncf %257 : vector<8x8xf32> to vector<8x8xbf16>
    %259 = vector.extract_strided_slice %231 {offsets = [0, 128], sizes = [8, 128], strides = [1, 1]} : vector<8x384xbf16> to vector<8x128xbf16>
    %cst_109 = arith.constant dense<0.000000e+00> : vector<8x128xf32>
    %260 = tpu.matmul %258, %259, %cst_109 {dimension_numbers = #tpu.dot_dimension_numbers<[1], [0], [0], [1], [0, 0, 1, 1], [], []>} : vector<8x8xbf16>, vector<8x128xbf16>, vector<8x128xf32> -> vector<8x128xf32>
    %261 = vector.extract_strided_slice %252 {offsets = [16, 0], sizes = [8, 8], strides = [1, 1]} : vector<24x8xf32> to vector<8x8xf32>
    %262 = arith.truncf %261 : vector<8x8xf32> to vector<8x8xbf16>
    %263 = vector.extract_strided_slice %231 {offsets = [0, 256], sizes = [8, 128], strides = [1, 1]} : vector<8x384xbf16> to vector<8x128xbf16>
    %cst_110 = arith.constant dense<0.000000e+00> : vector<8x128xf32>
    %264 = tpu.matmul %262, %263, %cst_110 {dimension_numbers = #tpu.dot_dimension_numbers<[1], [0], [0], [1], [0, 0, 1, 1], [], []>} : vector<8x8xbf16>, vector<8x128xbf16>, vector<8x128xf32> -> vector<8x128xf32>
    %265 = tpu.concatenate %256, %260, %264 in 1 : vector<8x128xf32>, vector<8x128xf32>, vector<8x128xf32> -> vector<8x384xf32>
    %266 = arith.truncf %265 : vector<8x384xf32> to vector<8x384xbf16>
    %c2_111 = arith.constant 2 : index
    %c0_112 = arith.constant 0 : index
    %c0_113 = arith.constant 0 : index
    %267 = vector.load %arg2[%c2_111, %c0_112, %c0_113] : memref<4x512x24xbf16, #tpu.memory_space<vmem>>, vector<1x384x24xbf16>
    %268 = vector.shape_cast %267 : vector<1x384x24xbf16> to vector<384x24xbf16>
    %cst_114 = arith.constant dense<0.000000e+00> : vector<8x24xf32>
    %269 = tpu.matmul %266, %268, %cst_114 {dimension_numbers = #tpu.dot_dimension_numbers<[1], [0], [0], [1], [0, 0, 1, 1], [], []>} : vector<8x384xbf16>, vector<384x24xbf16>, vector<8x24xf32> -> vector<8x24xf32>
    %c18 = arith.constant 18 : index
    %c0_115 = arith.constant 0 : index
    %c0_116 = arith.constant 0 : index
    %270 = vector.load %arg3[%c18, %c0_115, %c0_116] : memref<30x8x128xf32, #tpu.memory_space<vmem>>, vector<1x8x24xf32>
    %271 = vector.shape_cast %270 : vector<1x8x24xf32> to vector<8x24xf32>
    %272 = arith.addf %269, %271 : vector<8x24xf32>
    %273 = arith.addf %223, %272 : vector<8x24xf32>
    %c14 = arith.constant 14 : index
    %c0_117 = arith.constant 0 : index
    %c0_118 = arith.constant 0 : index
    %274 = vector.load %arg3[%c14, %c0_117, %c0_118] : memref<30x8x128xf32, #tpu.memory_space<vmem>>, vector<1x8x24xf32>
    %275 = vector.shape_cast %274 : vector<1x8x24xf32> to vector<8x24xf32>
    %c15 = arith.constant 15 : index
    %c0_119 = arith.constant 0 : index
    %c0_120 = arith.constant 0 : index
    %276 = vector.load %arg3[%c15, %c0_119, %c0_120] : memref<30x8x128xf32, #tpu.memory_space<vmem>>, vector<1x8x24xf32>
    %277 = vector.shape_cast %276 : vector<1x8x24xf32> to vector<8x24xf32>
    %cst_121 = arith.constant dense<0.000000e+00> : vector<8xf32>
    %278 = vector.multi_reduction <add>, %273, %cst_121 [1] : vector<8x24xf32> to vector<8xf32>
    %279 = vector.shape_cast %278 : vector<8xf32> to vector<8x1xf32>
    %cst_122 = arith.constant 2.400000e+01 : f32
    %280 = vector.broadcast %cst_122 : f32 to vector<8x1xf32>
    %281 = arith.divf %279, %280 : vector<8x1xf32>
    %282 = vector.broadcast %281 : vector<8x1xf32> to vector<8x24xf32>
    %283 = arith.subf %273, %282 : vector<8x24xf32>
    %284 = arith.mulf %283, %283 : vector<8x24xf32>
    %cst_123 = arith.constant dense<0.000000e+00> : vector<8xf32>
    %285 = vector.multi_reduction <add>, %284, %cst_123 [1] : vector<8x24xf32> to vector<8xf32>
    %286 = vector.shape_cast %285 : vector<8xf32> to vector<8x1xf32>
    %cst_124 = arith.constant 2.400000e+01 : f32
    %287 = vector.broadcast %cst_124 : f32 to vector<8x1xf32>
    %288 = arith.divf %286, %287 : vector<8x1xf32>
    %cst_125 = arith.constant 9.99999974E-6 : f32
    %289 = vector.broadcast %cst_125 : f32 to vector<8x1xf32>
    %290 = arith.addf %288, %289 : vector<8x1xf32>
    %291 = math.rsqrt %290 : vector<8x1xf32>
    %292 = vector.broadcast %291 : vector<8x1xf32> to vector<8x24xf32>
    %293 = arith.mulf %283, %292 : vector<8x24xf32>
    %294 = arith.mulf %293, %275 : vector<8x24xf32>
    %295 = arith.addf %294, %277 : vector<8x24xf32>
    %296 = arith.truncf %295 : vector<8x24xf32> to vector<8x24xbf16>
    %c2_126 = arith.constant 2 : index
    %c0_127 = arith.constant 0 : index
    %c768_128 = arith.constant 768 : index
    %297 = vector.load %arg1[%c2_126, %c0_127, %c768_128] : memref<4x24x896xbf16, #tpu.memory_space<vmem>>, vector<1x24x128xbf16>
    %298 = vector.shape_cast %297 : vector<1x24x128xbf16> to vector<24x128xbf16>
    %cst_129 = arith.constant dense<0.000000e+00> : vector<8x128xf32>
    %299 = tpu.matmul %296, %298, %cst_129 {dimension_numbers = #tpu.dot_dimension_numbers<[1], [0], [0], [1], [0, 0, 1, 1], [], []>} : vector<8x24xbf16>, vector<24x128xbf16>, vector<8x128xf32> -> vector<8x128xf32>
    %c19 = arith.constant 19 : index
    %c0_130 = arith.constant 0 : index
    %c0_131 = arith.constant 0 : index
    %300 = vector.load %arg3[%c19, %c0_130, %c0_131] : memref<30x8x128xf32, #tpu.memory_space<vmem>>, vector<1x8x128xf32>
    %301 = vector.shape_cast %300 : vector<1x8x128xf32> to vector<8x128xf32>
    %302 = arith.addf %299, %301 : vector<8x128xf32>
    %cst_132 = arith.constant 0.000000e+00 : f32
    %303 = vector.broadcast %cst_132 : f32 to vector<8x128xf32>
    %304 = arith.maximumf %302, %303 : vector<8x128xf32>
    %305 = arith.truncf %304 : vector<8x128xf32> to vector<8x128xbf16>
    %c2_133 = arith.constant 2 : index
    %c384_134 = arith.constant 384 : index
    %c0_135 = arith.constant 0 : index
    %306 = vector.load %arg2[%c2_133, %c384_134, %c0_135] : memref<4x512x24xbf16, #tpu.memory_space<vmem>>, vector<1x128x24xbf16>
    %307 = vector.shape_cast %306 : vector<1x128x24xbf16> to vector<128x24xbf16>
    %cst_136 = arith.constant dense<0.000000e+00> : vector<8x24xf32>
    %308 = tpu.matmul %305, %307, %cst_136 {dimension_numbers = #tpu.dot_dimension_numbers<[1], [0], [0], [1], [0, 0, 1, 1], [], []>} : vector<8x128xbf16>, vector<128x24xbf16>, vector<8x24xf32> -> vector<8x24xf32>
    %c20 = arith.constant 20 : index
    %c0_137 = arith.constant 0 : index
    %c0_138 = arith.constant 0 : index
    %309 = vector.load %arg3[%c20, %c0_137, %c0_138] : memref<30x8x128xf32, #tpu.memory_space<vmem>>, vector<1x8x24xf32>
    %310 = vector.shape_cast %309 : vector<1x8x24xf32> to vector<8x24xf32>
    %311 = arith.addf %308, %310 : vector<8x24xf32>
    %312 = arith.addf %295, %311 : vector<8x24xf32>
    %c16 = arith.constant 16 : index
    %c0_139 = arith.constant 0 : index
    %c0_140 = arith.constant 0 : index
    %313 = vector.load %arg3[%c16, %c0_139, %c0_140] : memref<30x8x128xf32, #tpu.memory_space<vmem>>, vector<1x8x24xf32>
    %314 = vector.shape_cast %313 : vector<1x8x24xf32> to vector<8x24xf32>
    %c17 = arith.constant 17 : index
    %c0_141 = arith.constant 0 : index
    %c0_142 = arith.constant 0 : index
    %315 = vector.load %arg3[%c17, %c0_141, %c0_142] : memref<30x8x128xf32, #tpu.memory_space<vmem>>, vector<1x8x24xf32>
    %316 = vector.shape_cast %315 : vector<1x8x24xf32> to vector<8x24xf32>
    %cst_143 = arith.constant dense<0.000000e+00> : vector<8xf32>
    %317 = vector.multi_reduction <add>, %312, %cst_143 [1] : vector<8x24xf32> to vector<8xf32>
    %318 = vector.shape_cast %317 : vector<8xf32> to vector<8x1xf32>
    %cst_144 = arith.constant 2.400000e+01 : f32
    %319 = vector.broadcast %cst_144 : f32 to vector<8x1xf32>
    %320 = arith.divf %318, %319 : vector<8x1xf32>
    %321 = vector.broadcast %320 : vector<8x1xf32> to vector<8x24xf32>
    %322 = arith.subf %312, %321 : vector<8x24xf32>
    %323 = arith.mulf %322, %322 : vector<8x24xf32>
    %cst_145 = arith.constant dense<0.000000e+00> : vector<8xf32>
    %324 = vector.multi_reduction <add>, %323, %cst_145 [1] : vector<8x24xf32> to vector<8xf32>
    %325 = vector.shape_cast %324 : vector<8xf32> to vector<8x1xf32>
    %cst_146 = arith.constant 2.400000e+01 : f32
    %326 = vector.broadcast %cst_146 : f32 to vector<8x1xf32>
    %327 = arith.divf %325, %326 : vector<8x1xf32>
    %cst_147 = arith.constant 9.99999974E-6 : f32
    %328 = vector.broadcast %cst_147 : f32 to vector<8x1xf32>
    %329 = arith.addf %327, %328 : vector<8x1xf32>
    %330 = math.rsqrt %329 : vector<8x1xf32>
    %331 = vector.broadcast %330 : vector<8x1xf32> to vector<8x24xf32>
    %332 = arith.mulf %322, %331 : vector<8x24xf32>
    %333 = arith.mulf %332, %314 : vector<8x24xf32>
    %334 = arith.addf %333, %316 : vector<8x24xf32>
    %335 = arith.truncf %334 : vector<8x24xf32> to vector<8x24xbf16>
    %336 = tpu.transpose %334, [1, 0] : vector<8x24xf32> -> vector<24x8xf32>
    %337 = arith.truncf %336 : vector<24x8xf32> to vector<24x8xbf16>
    %c3_148 = arith.constant 3 : index
    %c0_149 = arith.constant 0 : index
    %c0_150 = arith.constant 0 : index
    %338 = vector.load %arg1[%c3_148, %c0_149, %c0_150] : memref<4x24x896xbf16, #tpu.memory_space<vmem>>, vector<1x24x768xbf16>
    %339 = vector.shape_cast %338 : vector<1x24x768xbf16> to vector<24x768xbf16>
    %cst_151 = arith.constant dense<0.000000e+00> : vector<8x768xf32>
    %340 = tpu.matmul %335, %339, %cst_151 {dimension_numbers = #tpu.dot_dimension_numbers<[1], [0], [0], [1], [0, 0, 1, 1], [], []>} : vector<8x24xbf16>, vector<24x768xbf16>, vector<8x768xf32> -> vector<8x768xf32>
    %341 = vector.extract_strided_slice %340 {offsets = [0, 384], sizes = [8, 384], strides = [1, 1]} : vector<8x768xf32> to vector<8x384xf32>
    %342 = arith.truncf %341 : vector<8x384xf32> to vector<8x384xbf16>
    %343 = vector.extract_strided_slice %340 {offsets = [0, 0], sizes = [8, 24], strides = [1, 1]} : vector<8x768xf32> to vector<8x24xf32>
    %344 = arith.truncf %343 : vector<8x24xf32> to vector<8x24xbf16>
    %cst_152 = arith.constant dense<0.000000e+00> : vector<8x8xf32>
    %345 = tpu.matmul %344, %337, %cst_152 {dimension_numbers = #tpu.dot_dimension_numbers<[1], [0], [0], [1], [0, 0, 1, 1], [], []>} : vector<8x24xbf16>, vector<24x8xbf16>, vector<8x8xf32> -> vector<8x8xf32>
    %346 = vector.extract_strided_slice %340 {offsets = [0, 128], sizes = [8, 24], strides = [1, 1]} : vector<8x768xf32> to vector<8x24xf32>
    %347 = arith.truncf %346 : vector<8x24xf32> to vector<8x24xbf16>
    %cst_153 = arith.constant dense<0.000000e+00> : vector<8x8xf32>
    %348 = tpu.matmul %347, %337, %cst_153 {dimension_numbers = #tpu.dot_dimension_numbers<[1], [0], [0], [1], [0, 0, 1, 1], [], []>} : vector<8x24xbf16>, vector<24x8xbf16>, vector<8x8xf32> -> vector<8x8xf32>
    %349 = vector.extract_strided_slice %340 {offsets = [0, 256], sizes = [8, 24], strides = [1, 1]} : vector<8x768xf32> to vector<8x24xf32>
    %350 = arith.truncf %349 : vector<8x24xf32> to vector<8x24xbf16>
    %cst_154 = arith.constant dense<0.000000e+00> : vector<8x8xf32>
    %351 = tpu.matmul %350, %337, %cst_154 {dimension_numbers = #tpu.dot_dimension_numbers<[1], [0], [0], [1], [0, 0, 1, 1], [], []>} : vector<8x24xbf16>, vector<24x8xbf16>, vector<8x8xf32> -> vector<8x8xf32>
    %352 = tpu.concatenate %345, %348, %351 in 0 : vector<8x8xf32>, vector<8x8xf32>, vector<8x8xf32> -> vector<24x8xf32>
    %353 = arith.addf %352, %1 : vector<24x8xf32>
    %cst_155 = arith.constant dense<0xFF800000> : vector<24xf32>
    %354 = vector.multi_reduction <maximumf>, %353, %cst_155 [1] : vector<24x8xf32> to vector<24xf32>
    %355 = vector.shape_cast %354 : vector<24xf32> to vector<24x1xf32>
    %356 = vector.broadcast %355 : vector<24x1xf32> to vector<24x8xf32>
    %357 = arith.subf %353, %356 : vector<24x8xf32>
    %358 = math.exp %357 : vector<24x8xf32>
    %cst_156 = arith.constant dense<0.000000e+00> : vector<24xf32>
    %359 = vector.multi_reduction <add>, %358, %cst_156 [1] : vector<24x8xf32> to vector<24xf32>
    %360 = vector.shape_cast %359 : vector<24xf32> to vector<24x1xf32>
    %361 = tpu.reciprocal %360 {approx = true} : vector<24x1xf32> -> vector<24x1xf32>
    %362 = vector.broadcast %361 : vector<24x1xf32> to vector<24x8xf32>
    %363 = arith.mulf %358, %362 : vector<24x8xf32>
    %364 = vector.extract_strided_slice %363 {offsets = [0, 0], sizes = [8, 8], strides = [1, 1]} : vector<24x8xf32> to vector<8x8xf32>
    %365 = arith.truncf %364 : vector<8x8xf32> to vector<8x8xbf16>
    %366 = vector.extract_strided_slice %342 {offsets = [0, 0], sizes = [8, 128], strides = [1, 1]} : vector<8x384xbf16> to vector<8x128xbf16>
    %cst_157 = arith.constant dense<0.000000e+00> : vector<8x128xf32>
    %367 = tpu.matmul %365, %366, %cst_157 {dimension_numbers = #tpu.dot_dimension_numbers<[1], [0], [0], [1], [0, 0, 1, 1], [], []>} : vector<8x8xbf16>, vector<8x128xbf16>, vector<8x128xf32> -> vector<8x128xf32>
    %368 = vector.extract_strided_slice %363 {offsets = [8, 0], sizes = [8, 8], strides = [1, 1]} : vector<24x8xf32> to vector<8x8xf32>
    %369 = arith.truncf %368 : vector<8x8xf32> to vector<8x8xbf16>
    %370 = vector.extract_strided_slice %342 {offsets = [0, 128], sizes = [8, 128], strides = [1, 1]} : vector<8x384xbf16> to vector<8x128xbf16>
    %cst_158 = arith.constant dense<0.000000e+00> : vector<8x128xf32>
    %371 = tpu.matmul %369, %370, %cst_158 {dimension_numbers = #tpu.dot_dimension_numbers<[1], [0], [0], [1], [0, 0, 1, 1], [], []>} : vector<8x8xbf16>, vector<8x128xbf16>, vector<8x128xf32> -> vector<8x128xf32>
    %372 = vector.extract_strided_slice %363 {offsets = [16, 0], sizes = [8, 8], strides = [1, 1]} : vector<24x8xf32> to vector<8x8xf32>
    %373 = arith.truncf %372 : vector<8x8xf32> to vector<8x8xbf16>
    %374 = vector.extract_strided_slice %342 {offsets = [0, 256], sizes = [8, 128], strides = [1, 1]} : vector<8x384xbf16> to vector<8x128xbf16>
    %cst_159 = arith.constant dense<0.000000e+00> : vector<8x128xf32>
    %375 = tpu.matmul %373, %374, %cst_159 {dimension_numbers = #tpu.dot_dimension_numbers<[1], [0], [0], [1], [0, 0, 1, 1], [], []>} : vector<8x8xbf16>, vector<8x128xbf16>, vector<8x128xf32> -> vector<8x128xf32>
    %376 = tpu.concatenate %367, %371, %375 in 1 : vector<8x128xf32>, vector<8x128xf32>, vector<8x128xf32> -> vector<8x384xf32>
    %377 = arith.truncf %376 : vector<8x384xf32> to vector<8x384xbf16>
    %c3_160 = arith.constant 3 : index
    %c0_161 = arith.constant 0 : index
    %c0_162 = arith.constant 0 : index
    %378 = vector.load %arg2[%c3_160, %c0_161, %c0_162] : memref<4x512x24xbf16, #tpu.memory_space<vmem>>, vector<1x384x24xbf16>
    %379 = vector.shape_cast %378 : vector<1x384x24xbf16> to vector<384x24xbf16>
    %cst_163 = arith.constant dense<0.000000e+00> : vector<8x24xf32>
    %380 = tpu.matmul %377, %379, %cst_163 {dimension_numbers = #tpu.dot_dimension_numbers<[1], [0], [0], [1], [0, 0, 1, 1], [], []>} : vector<8x384xbf16>, vector<384x24xbf16>, vector<8x24xf32> -> vector<8x24xf32>
    %c25 = arith.constant 25 : index
    %c0_164 = arith.constant 0 : index
    %c0_165 = arith.constant 0 : index
    %381 = vector.load %arg3[%c25, %c0_164, %c0_165] : memref<30x8x128xf32, #tpu.memory_space<vmem>>, vector<1x8x24xf32>
    %382 = vector.shape_cast %381 : vector<1x8x24xf32> to vector<8x24xf32>
    %383 = arith.addf %380, %382 : vector<8x24xf32>
    %384 = arith.addf %334, %383 : vector<8x24xf32>
    %c21 = arith.constant 21 : index
    %c0_166 = arith.constant 0 : index
    %c0_167 = arith.constant 0 : index
    %385 = vector.load %arg3[%c21, %c0_166, %c0_167] : memref<30x8x128xf32, #tpu.memory_space<vmem>>, vector<1x8x24xf32>
    %386 = vector.shape_cast %385 : vector<1x8x24xf32> to vector<8x24xf32>
    %c22 = arith.constant 22 : index
    %c0_168 = arith.constant 0 : index
    %c0_169 = arith.constant 0 : index
    %387 = vector.load %arg3[%c22, %c0_168, %c0_169] : memref<30x8x128xf32, #tpu.memory_space<vmem>>, vector<1x8x24xf32>
    %388 = vector.shape_cast %387 : vector<1x8x24xf32> to vector<8x24xf32>
    %cst_170 = arith.constant dense<0.000000e+00> : vector<8xf32>
    %389 = vector.multi_reduction <add>, %384, %cst_170 [1] : vector<8x24xf32> to vector<8xf32>
    %390 = vector.shape_cast %389 : vector<8xf32> to vector<8x1xf32>
    %cst_171 = arith.constant 2.400000e+01 : f32
    %391 = vector.broadcast %cst_171 : f32 to vector<8x1xf32>
    %392 = arith.divf %390, %391 : vector<8x1xf32>
    %393 = vector.broadcast %392 : vector<8x1xf32> to vector<8x24xf32>
    %394 = arith.subf %384, %393 : vector<8x24xf32>
    %395 = arith.mulf %394, %394 : vector<8x24xf32>
    %cst_172 = arith.constant dense<0.000000e+00> : vector<8xf32>
    %396 = vector.multi_reduction <add>, %395, %cst_172 [1] : vector<8x24xf32> to vector<8xf32>
    %397 = vector.shape_cast %396 : vector<8xf32> to vector<8x1xf32>
    %cst_173 = arith.constant 2.400000e+01 : f32
    %398 = vector.broadcast %cst_173 : f32 to vector<8x1xf32>
    %399 = arith.divf %397, %398 : vector<8x1xf32>
    %cst_174 = arith.constant 9.99999974E-6 : f32
    %400 = vector.broadcast %cst_174 : f32 to vector<8x1xf32>
    %401 = arith.addf %399, %400 : vector<8x1xf32>
    %402 = math.rsqrt %401 : vector<8x1xf32>
    %403 = vector.broadcast %402 : vector<8x1xf32> to vector<8x24xf32>
    %404 = arith.mulf %394, %403 : vector<8x24xf32>
    %405 = arith.mulf %404, %386 : vector<8x24xf32>
    %406 = arith.addf %405, %388 : vector<8x24xf32>
    %407 = arith.truncf %406 : vector<8x24xf32> to vector<8x24xbf16>
    %c3_175 = arith.constant 3 : index
    %c0_176 = arith.constant 0 : index
    %c768_177 = arith.constant 768 : index
    %408 = vector.load %arg1[%c3_175, %c0_176, %c768_177] : memref<4x24x896xbf16, #tpu.memory_space<vmem>>, vector<1x24x128xbf16>
    %409 = vector.shape_cast %408 : vector<1x24x128xbf16> to vector<24x128xbf16>
    %cst_178 = arith.constant dense<0.000000e+00> : vector<8x128xf32>
    %410 = tpu.matmul %407, %409, %cst_178 {dimension_numbers = #tpu.dot_dimension_numbers<[1], [0], [0], [1], [0, 0, 1, 1], [], []>} : vector<8x24xbf16>, vector<24x128xbf16>, vector<8x128xf32> -> vector<8x128xf32>
    %c26 = arith.constant 26 : index
    %c0_179 = arith.constant 0 : index
    %c0_180 = arith.constant 0 : index
    %411 = vector.load %arg3[%c26, %c0_179, %c0_180] : memref<30x8x128xf32, #tpu.memory_space<vmem>>, vector<1x8x128xf32>
    %412 = vector.shape_cast %411 : vector<1x8x128xf32> to vector<8x128xf32>
    %413 = arith.addf %410, %412 : vector<8x128xf32>
    %cst_181 = arith.constant 0.000000e+00 : f32
    %414 = vector.broadcast %cst_181 : f32 to vector<8x128xf32>
    %415 = arith.maximumf %413, %414 : vector<8x128xf32>
    %416 = arith.truncf %415 : vector<8x128xf32> to vector<8x128xbf16>
    %c3_182 = arith.constant 3 : index
    %c384_183 = arith.constant 384 : index
    %c0_184 = arith.constant 0 : index
    %417 = vector.load %arg2[%c3_182, %c384_183, %c0_184] : memref<4x512x24xbf16, #tpu.memory_space<vmem>>, vector<1x128x24xbf16>
    %418 = vector.shape_cast %417 : vector<1x128x24xbf16> to vector<128x24xbf16>
    %cst_185 = arith.constant dense<0.000000e+00> : vector<8x24xf32>
    %419 = tpu.matmul %416, %418, %cst_185 {dimension_numbers = #tpu.dot_dimension_numbers<[1], [0], [0], [1], [0, 0, 1, 1], [], []>} : vector<8x128xbf16>, vector<128x24xbf16>, vector<8x24xf32> -> vector<8x24xf32>
    %c27 = arith.constant 27 : index
    %c0_186 = arith.constant 0 : index
    %c0_187 = arith.constant 0 : index
    %420 = vector.load %arg3[%c27, %c0_186, %c0_187] : memref<30x8x128xf32, #tpu.memory_space<vmem>>, vector<1x8x24xf32>
    %421 = vector.shape_cast %420 : vector<1x8x24xf32> to vector<8x24xf32>
    %422 = arith.addf %419, %421 : vector<8x24xf32>
    %423 = arith.addf %406, %422 : vector<8x24xf32>
    %c23 = arith.constant 23 : index
    %c0_188 = arith.constant 0 : index
    %c0_189 = arith.constant 0 : index
    %424 = vector.load %arg3[%c23, %c0_188, %c0_189] : memref<30x8x128xf32, #tpu.memory_space<vmem>>, vector<1x8x24xf32>
    %425 = vector.shape_cast %424 : vector<1x8x24xf32> to vector<8x24xf32>
    %c24 = arith.constant 24 : index
    %c0_190 = arith.constant 0 : index
    %c0_191 = arith.constant 0 : index
    %426 = vector.load %arg3[%c24, %c0_190, %c0_191] : memref<30x8x128xf32, #tpu.memory_space<vmem>>, vector<1x8x24xf32>
    %427 = vector.shape_cast %426 : vector<1x8x24xf32> to vector<8x24xf32>
    %cst_192 = arith.constant dense<0.000000e+00> : vector<8xf32>
    %428 = vector.multi_reduction <add>, %423, %cst_192 [1] : vector<8x24xf32> to vector<8xf32>
    %429 = vector.shape_cast %428 : vector<8xf32> to vector<8x1xf32>
    %cst_193 = arith.constant 2.400000e+01 : f32
    %430 = vector.broadcast %cst_193 : f32 to vector<8x1xf32>
    %431 = arith.divf %429, %430 : vector<8x1xf32>
    %432 = vector.broadcast %431 : vector<8x1xf32> to vector<8x24xf32>
    %433 = arith.subf %423, %432 : vector<8x24xf32>
    %434 = arith.mulf %433, %433 : vector<8x24xf32>
    %cst_194 = arith.constant dense<0.000000e+00> : vector<8xf32>
    %435 = vector.multi_reduction <add>, %434, %cst_194 [1] : vector<8x24xf32> to vector<8xf32>
    %436 = vector.shape_cast %435 : vector<8xf32> to vector<8x1xf32>
    %cst_195 = arith.constant 2.400000e+01 : f32
    %437 = vector.broadcast %cst_195 : f32 to vector<8x1xf32>
    %438 = arith.divf %436, %437 : vector<8x1xf32>
    %cst_196 = arith.constant 9.99999974E-6 : f32
    %439 = vector.broadcast %cst_196 : f32 to vector<8x1xf32>
    %440 = arith.addf %438, %439 : vector<8x1xf32>
    %441 = math.rsqrt %440 : vector<8x1xf32>
    %442 = vector.broadcast %441 : vector<8x1xf32> to vector<8x24xf32>
    %443 = arith.mulf %433, %442 : vector<8x24xf32>
    %444 = arith.mulf %443, %425 : vector<8x24xf32>
    %445 = arith.addf %444, %427 : vector<8x24xf32>
    %c28 = arith.constant 28 : index
    %c0_197 = arith.constant 0 : index
    %c0_198 = arith.constant 0 : index
    %446 = vector.load %arg3[%c28, %c0_197, %c0_198] : memref<30x8x128xf32, #tpu.memory_space<vmem>>, vector<1x8x24xf32>
    %447 = vector.shape_cast %446 : vector<1x8x24xf32> to vector<8x24xf32>
    %c29 = arith.constant 29 : index
    %c0_199 = arith.constant 0 : index
    %c0_200 = arith.constant 0 : index
    %448 = vector.load %arg3[%c29, %c0_199, %c0_200] : memref<30x8x128xf32, #tpu.memory_space<vmem>>, vector<1x8x24xf32>
    %449 = vector.shape_cast %448 : vector<1x8x24xf32> to vector<8x24xf32>
    %cst_201 = arith.constant dense<0.000000e+00> : vector<8xf32>
    %450 = vector.multi_reduction <add>, %445, %cst_201 [1] : vector<8x24xf32> to vector<8xf32>
    %451 = vector.shape_cast %450 : vector<8xf32> to vector<8x1xf32>
    %cst_202 = arith.constant 2.400000e+01 : f32
    %452 = vector.broadcast %cst_202 : f32 to vector<8x1xf32>
    %453 = arith.divf %451, %452 : vector<8x1xf32>
    %454 = vector.broadcast %453 : vector<8x1xf32> to vector<8x24xf32>
    %455 = arith.subf %445, %454 : vector<8x24xf32>
    %456 = arith.mulf %455, %455 : vector<8x24xf32>
    %cst_203 = arith.constant dense<0.000000e+00> : vector<8xf32>
    %457 = vector.multi_reduction <add>, %456, %cst_203 [1] : vector<8x24xf32> to vector<8xf32>
    %458 = vector.shape_cast %457 : vector<8xf32> to vector<8x1xf32>
    %cst_204 = arith.constant 2.400000e+01 : f32
    %459 = vector.broadcast %cst_204 : f32 to vector<8x1xf32>
    %460 = arith.divf %458, %459 : vector<8x1xf32>
    %cst_205 = arith.constant 9.99999974E-6 : f32
    %461 = vector.broadcast %cst_205 : f32 to vector<8x1xf32>
    %462 = arith.addf %460, %461 : vector<8x1xf32>
    %463 = math.rsqrt %462 : vector<8x1xf32>
    %464 = vector.broadcast %463 : vector<8x1xf32> to vector<8x24xf32>
    %465 = arith.mulf %455, %464 : vector<8x24xf32>
    %466 = arith.mulf %465, %447 : vector<8x24xf32>
    %467 = arith.addf %466, %449 : vector<8x24xf32>
    %468 = arith.truncf %467 : vector<8x24xf32> to vector<8x24xbf16>
    %c0_206 = arith.constant 0 : index
    %c0_207 = arith.constant 0 : index
    %469 = vector.load %arg4[%c0_206, %c0_207] : memref<24x128xbf16, #tpu.memory_space<vmem>>, vector<24x128xbf16>
    %cst_208 = arith.constant dense<0.000000e+00> : vector<8x128xf32>
    %470 = tpu.matmul %468, %469, %cst_208 {dimension_numbers = #tpu.dot_dimension_numbers<[1], [0], [0], [1], [0, 0, 1, 1], [], []>} : vector<8x24xbf16>, vector<24x128xbf16>, vector<8x128xf32> -> vector<8x128xf32>
    %c0_209 = arith.constant 0 : index
    %c0_210 = arith.constant 0 : index
    %471 = vector.load %arg5[%c0_209, %c0_210] : memref<8x128xf32, #tpu.memory_space<vmem>>, vector<8x128xf32>
    %472 = arith.addf %470, %471 : vector<8x128xf32>
    %c0_211 = arith.constant 0 : index
    %c0_212 = arith.constant 0 : index
    %473 = vector.load %arg8[%c0_211, %c0_212] : memref<8x128xf32, #tpu.memory_space<vmem>>, vector<8x128xf32>
    tpu.vector_store %arg8[%c0_211, %c0_212], %472 {strides = array<i32>} : memref<8x128xf32, #tpu.memory_space<vmem>>, vector<8x128xf32>,
    %cst_213 = arith.constant dense<0xFF800000> : vector<8xf32>
    %474 = vector.multi_reduction <maximumf>, %472, %cst_213 [1] : vector<8x128xf32> to vector<8xf32>
    %475 = vector.shape_cast %474 : vector<8xf32> to vector<8x1xf32>
    %476 = vector.broadcast %475 : vector<8x1xf32> to vector<8x128xf32>
    %477 = arith.subf %472, %476 : vector<8x128xf32>
    %478 = math.exp %477 : vector<8x128xf32>
    %cst_214 = arith.constant dense<0.000000e+00> : vector<8xf32>
    %479 = vector.multi_reduction <add>, %478, %cst_214 [1] : vector<8x128xf32> to vector<8xf32>
    %480 = vector.shape_cast %479 : vector<8xf32> to vector<8x1xf32>
    %481 = math.log %480 : vector<8x1xf32>
    %482 = arith.addf %481, %475 : vector<8x1xf32>
    %483 = tpu.iota {dimensions = array<i32: 1>} : vector<8x128xi32>
    %c0_215 = arith.constant 0 : index
    %c0_216 = arith.constant 0 : index
    %484 = vector.load %arg7[%c0_215, %c0_216] : memref<8x1xi32, #tpu.memory_space<vmem>>, vector<8x1xi32>
    %485 = vector.broadcast %484 : vector<8x1xi32> to vector<8x128xi32>
    %486 = arith.cmpi eq, %483, %485 : vector<8x128xi32>
    %cst_217 = arith.constant 0.000000e+00 : f32
    %487 = vector.broadcast %cst_217 : f32 to vector<8x128xf32>
    %488 = arith.select %486, %472, %487 : vector<8x128xi1>, vector<8x128xf32>
    %cst_218 = arith.constant dense<0.000000e+00> : vector<8xf32>
    %489 = vector.multi_reduction <add>, %488, %cst_218 [1] : vector<8x128xf32> to vector<8xf32>
    %490 = vector.shape_cast %489 : vector<8xf32> to vector<8x1xf32>
    %491 = arith.subf %482, %490 : vector<8x1xf32>
    %492 = tpu.iota {dimensions = array<i32: 0>} : vector<8x1xi32>
    %c6_i32 = arith.constant 6 : i32
    %493 = vector.broadcast %c6_i32 : i32 to vector<8x1xi32>
    %494 = arith.cmpi slt, %492, %493 : vector<8x1xi32>
    %cst_219 = arith.constant 0.000000e+00 : f32
    %495 = vector.broadcast %cst_219 : f32 to vector<8x1xf32>
    %496 = arith.select %494, %491, %495 : vector<8x1xi1>, vector<8x1xf32>
    %497 = vector.shape_cast %496 : vector<8x1xf32> to vector<1x8x1xf32>
    %cst_220 = arith.constant dense<0.000000e+00> : vector<1xf32>
    %498 = vector.multi_reduction <add>, %497, %cst_220 [1, 2] : vector<1x8x1xf32> to vector<1xf32>
    %499 = vector.shape_cast %498 : vector<1xf32> to vector<1x1x1xf32>
    %500 = vector.extract %499[0, 0, 0] : f32 from vector<1x1x1xf32>
    %cst_221 = arith.constant 6.000000e+00 : f32
    %501 = arith.divf %500, %cst_221 : f32
    %c0_222 = arith.constant 0 : index
    %c0_223 = arith.constant 0 : index
    %502 = memref.load %arg9[%c0_222, %c0_223] : memref<1x1xf32, #tpu.memory_space<smem>>
    memref.store %501, %arg9[%c0_222, %c0_223] : memref<1x1xf32, #tpu.memory_space<smem>>
    return
  }
}

</mosaic_0001>

<bundles_post_ra>
// kernel: gpt_forward.1
= control target key start
LH: loop header
LB: loop body
LE: loop exit
PB: predicated region body
PF: predicated region fallthrough
CT: control target
= control target key end

     0   :  { %15 = vsyncpa [#allocation3], 0  ;;  %vm131_vm0 = vcmask 1043456   ;;  %v5746_v3 = vmov 0   ;;  %vm127_vm1 = vcmask 195584   ;;  %v5747_v21 = vmov 0.0   ;;  %s6842_s0 = inlined_call_operand.vmem [shape: f32[8,24], index: 0, kind: input, shape index: {}]   ;;  %s6843_s1 = inlined_call_operand.vmem [shape: bf16[4,24,896], index: 1, kind: input, shape index: {}]   ;;  %s6844_s2 = inlined_call_operand.vmem [shape: bf16[4,512,24], index: 2, kind: input, shape index: {}]   ;;  %s6845_s3 = inlined_call_operand.vmem [shape: f32[30,8,128], index: 3, kind: input, shape index: {}]   ;;  %s6846_s4 = inlined_call_operand.vmem [shape: bf16[24,128], index: 4, kind: input, shape index: {}]   ;;  %s6847_s5 = inlined_call_operand.vmem [shape: f32[8,128], index: 5, kind: input, shape index: {}]   ;;  %s6848_s6 = inlined_call_operand.vmem [shape: f32[24,8], index: 6, kind: input, shape index: {}]   ;;  %s6849_s7 = inlined_call_operand.vmem [shape: s32[8,1], index: 7, kind: input, shape index: {}]   ;;  %s6850_s8 = inlined_call_operand.hbm [shape: f32[8,128], index: 8, kind: output, shape index: {0}]   ;;  %s6851_s9 = inlined_call_operand.hbm [shape: f32[1,1], index: 9, kind: output, shape index: {1}]  }
   0x1   :  { %v5438_v0 = vld [vmem:[%s6843_s1 + $0x4] ss:$28 sps:$4 sm:$0xff]   ;;  %v79_v2 = vld [vmem:[%s6843_s1 + $0x38] sm:$0xff]  ;;  %182 = vmatprep.mubr.bf16.mxu1 %v5746_v3  ;;  %264 = vmatprep.mubr.bf16.mxu0 %v5746_v3  ;;  %v5445_v7 = vld [vmem:[%s6843_s1 + $0xc] ss:$28 sps:$4 sm:$0xff]   ;;  %vm5748_vm2 = vmmov 0  }
   0x2   :  { %v5440_v1 = vld [vmem:[%s6843_s1] ss:$28 sps:$4 sm:$0xff]   ;;  %150 = vmatprep.subr.bf16.mxu1 %v5438_v0  ;;  %v4338_v5 = vcombine.high %v79_v2, %v79_v2  ;;  %v4337_v6 = vcombine.low %v79_v2, %v79_v2  ;;  %v5448_v11 = vld [vmem:[%s6843_s1 + $0x14] ss:$28 sps:$4 sm:$0xff]   ;;  %v5443_v13 = vld [vmem:[%s6843_s1 + $0x8] ss:$28 sps:$4 sm:$0xff]  }
   0x3   :  { %v34_v4 = vld [vmem:[%s6842_s0] sm:$0xff]  ;;  %151 = vmatpush1.bf16.msra.mxu1 %v5440_v1  ;;  %v5450_v12 = vld [vmem:[%s6843_s1 + $0x10] ss:$28 sps:$4 sm:$0xff]   ;;  %232 = vmatprep.subr.bf16.mxu0 %v5448_v11 }
   0x4   :  { %39 = vxpose.xlu0.b32.start.end [1/1] (short) (narrow) %v34_v4, 24  ;;  %v80_v8 = vld [vmem:[%s6843_s1 + $0x40] sm:$0xff]  ;;  %4343 = vmatprep.subr.msk.bf16.mxu1 %vm131_vm0, %v4338_v5  ;;  %v133_v9 = vsel %vm131_vm0, %v4337_v6, 0  ;;  %v81_v14 = vld [vmem:[%s6843_s1 + $0x48] sm:$0xff]  ;;  %v38_v15 = vpack.c.bf16 %v34_v4, %v34_v4 }
   0x5   :  { %v4339_v10 = vcombine.low %v80_v8, %v80_v8  ;;  %v4342_v17 = vcombine.high %v81_v14, %v81_v14  ;;  %v4341_v18 = vcombine.low %v81_v14, %v81_v14  ;;  %233 = vmatpush1.bf16.msra.mxu0 %v5450_v12  ;;  %v4340_v19 = vcombine.high %v80_v8, %v80_v8 }
   0x7   :  { %v139_v16 = vsel %vm131_vm0, %v4339_v10, 0  ;;  %153 = vmatpush1.bf16.msra.mxu1 %v133_v9  ;;  %4347 = vmatprep.subr.msk.bf16.mxu0 %vm131_vm0, %v4342_v17  ;;  %v145_v20 = vsel %vm131_vm0, %v4341_v18, 0 }
   0x8   :  { %191 = vmatprep.subr.bf16.mxu1 %v5445_v7 }
   0x9   :  { %235 = vmatpush1.bf16.msra.mxu0 %v145_v20 }
   0xa   :  { %4344 = vmatmul.mubr.msk.bf16.vlgmr.msra.gmra.mrb[0].mxu1 %vm127_vm1, %v38_v15  ;;  %5070 = vmatprep.subr.bf16.mxu0 %v5747_v21 }
   0xb   :  { %192 = vmatpush1.bf16.msra.mxu1 %v5443_v13  ;;  %223 = vmatprep.mubr.bf16.mxu1 %v5746_v3 }
   0xc   :  { %4345 = vmatprep.subr.msk.bf16.mxu1 %vm131_vm0, %v4340_v19  ;;  %4348 = vmatmul.mubr.msk.bf16.vlgmr.msra.gmra.mrb[0].mxu0 %vm127_vm1, %v38_v15 }
   0xd   :  { %5074 = vmatprep.mubr.msk.bf16.mxu0 %vm5748_vm2, %v5747_v21 }
   0xf   :  { %194 = vmatpush1.bf16.msra.mxu1 %v139_v16 }
  0x10   :  { %5062 = vmatprep.subr.bf16.mxu1 %v5747_v21 }
  0x12   :  { %4346 = vmatmul.mubr.msk.bf16.vlgmr.msra.gmra.mrb[4].mxu1 %vm127_vm1, %v38_v15 }
  0x13   :  { %5066 = vmatprep.mubr.msk.bf16.mxu1 %vm5748_vm2, %v5747_v21 }
  0x14   :  { %16 = vsyncpa [#allocation4], 0  ;;  %v5873_v47 = vld [vmem:[%s6848_s6] sm:$0xff]  ;;  %v5878_v48 = vld [vmem:[%s6848_s6 + $0x8] sm:$0xff]  ;;  %vm414_vm3 = vcmask 64512   ;;  %vm4288_vm6 = vcmask 7168  }
  0x15   :  { %v5887_v61 = vld [vmem:[%s6848_s6 + $0x10] sm:$0xff]  ;;  %v5453_v20 = vld [vmem:[%s6844_s2 + $0x40] sm:$0xff]  }
  0x84   :  { %v55_v22 = vpop.trf.xlu0 }
  0x88   :  { %v56_v23 = vpop.trf.xlu0 }
  0x89   :  { %v71_v24 = vpack.c.bf16 %v56_v23, %v55_v22 }
  0x8b   :  { %5063 = vmatpush3.bf16.msra.mxu1 %v71_v24  ;;  %5071 = vmatpush3.bf16.msra.mxu0 %v71_v24 }
  0x8c   :  { %v57_v25 = vpop.trf.xlu0  ;;  %5064 = vmatprep.subr.bf16.mxu1 %v5747_v21  ;;  %5072 = vmatprep.subr.bf16.mxu0 %v5747_v21 }
  0x8d   :  { %v72_v26 = vpack.c.bf16 %v57_v25, %v57_v25 }
  0x8f   :  { %v281_v27 = vsel %vm131_vm0, %v72_v26, 0 }
  0x90   :  { %5065 = vmatpush3.bf16.msra.mxu1 %v281_v27  ;;  %5073 = vmatpush3.bf16.msra.mxu0 %v281_v27 }
  0x91   :  { %5078 = vmatprep.subr.bf16.mxu1 %v5747_v21  ;;  %5086 = vmatprep.subr.bf16.mxu0 %v5747_v21 }
  0xdd   :  { %v184_v28 = vpop.f32.mrb[0].mxu1 }
  0xde   :  { %v276_v29 = vpack.c.bf16 %v184_v28, %v184_v28  ;;  %v186_v30 = vpop.f32.mrb[1].mxu1 }
  0xdf   :  { %v323_v31 = vpack.c.bf16 %v186_v30, %v186_v30  ;;  %v188_v32 = vpop.f32.mrb[2].mxu1  ;;  %v266_v34 = vpop.f32.mrb[0].mxu0 }
  0xe0   :  { %v189_v33 = vpop.f32.mrb[3].mxu1  ;;  %5067 = vmatmul.mubr.msk.bf16.vlgmr.msra.gmra.mrb[8].mxu1 %vm127_vm1, %v276_v29  ;;  %v274_v35 = vpack.c.bf16 %v266_v34, %v266_v34  ;;  %v5859_v36 = vpop.f32.mrb[1].mxu0  ;;  %v5454_v32 = vld [vmem:[%s6844_s2] sm:$0xff]   ;;  %v5455_v34 = vld [vmem:[%s6844_s2 + $0x48] sm:$0xff]  }
  0xe1   :  { %5079 = vmatpush3.bf16.msra.mxu1 %v71_v24  ;;  %5075 = vmatmul.mubr.msk.bf16.vlgmr.msra.gmra.mrb[4].mxu0 %vm127_vm1, %v323_v31  ;;  %v270_v37 = vpop.f32.mrb[2].mxu0  ;;  %v275_v26 = vpack.c.bf16 %v5859_v36, %v5859_v36 }
  0xe2   :  { %5080 = vmatprep.subr.bf16.mxu1 %v5747_v21  ;;  %5082 = vmatprep.mubr.msk.bf16.mxu1 %vm5748_vm2, %v5747_v21  ;;  %v271_v39 = vpop.f32.mrb[3].mxu0  ;;  %v500_v42 = vsel %vm131_vm0, %v274_v35, 0  ;;  %v5456_v37 = vld [vmem:[%s6844_s2 + $0x80] sm:$0xff]  }
  0xe3   :  { %5088 = vmatprep.mubr.msk.bf16.mxu0 %vm5748_vm2, %v5747_v21  ;;  %v547_v30 = vsel %vm131_vm0, %v275_v26, 0 }
  0xe5   :  { %5081 = vmatpush3.bf16.msra.mxu1 %v281_v27  ;;  %v225_v38 = vpop.f32.mrb[4].mxu1 }
  0xe6   :  { %v367_v40 = vpack.c.bf16 %v225_v38, %v225_v38  ;;  %v227_v41 = vpop.f32.mrb[5].mxu1  ;;  %5092 = vmatprep.subr.bf16.mxu1 %v5747_v21  ;;  %v5457_v38 = vld [vmem:[%s6844_s2 + $0x8] sm:$0xff]  }
  0xe7   :  { %v273_v43 = vpack.c.bf16 %v227_v41, %v227_v41  ;;  %v229_v44 = vpop.f32.mrb[6].mxu1  ;;  %v5459_v41 = vld [vmem:[%s6844_s2 + $0x88] sm:$0xff]  }
  0xe8   :  { %v230_v45 = vpop.f32.mrb[7].mxu1  ;;  %5083 = vmatmul.mubr.msk.bf16.vlgmr.msra.gmra.mrb[12].mxu1 %vm127_vm1, %v367_v40  ;;  %v5458_v40 = vld [vmem:[%s6844_s2 + $0x50] sm:$0xff]  }
  0xe9   :  { %v453_v46 = vsel %vm131_vm0, %v273_v43, 0  ;;  %5093 = vmatpush3.bf16.msra.mxu1 %v500_v42  ;;  %5094 = vmatprep.mubr.msk.bf16.mxu1 %vm5748_vm2, %v5747_v21  ;;  %v5460_v42 = vld [vmem:[%s6844_s2 + $0x10] sm:$0xff]   ;;  %v5461_v43 = vld [vmem:[%s6844_s2 + $0x58] sm:$0xff]  }
  0xea   :  { %5087 = vmatpush3.bf16.msra.mxu0 %v453_v46  ;;  %4842 = vmatprep.subr.bf16.mxu1 %v5453_v20  ;;  %v5462_v44 = vld [vmem:[%s6844_s2 + $0x90] sm:$0xff]   ;;  %v5463_v45 = vld [vmem:[%s6844_s2 + $0x18] sm:$0xff]   ;;  %v5464_v46 = vld [vmem:[%s6844_s2 + $0x60] sm:$0xff]  }
  0xeb   :  { %5098 = vmatprep.subr.bf16.mxu0 %v5747_v21 }
 0x1b3   :  { %v317_v49 = vpop.f32.mrb[8].mxu1 }
 0x1b4   :  { %v411_v50 = vadd.f32 %v317_v49, %v5873_v47  ;;  %v5068_v51 = vpop.f32.mrb[9].mxu1  ;;  %v361_v52 = vpop.f32.mrb[4].mxu0  ;;  %v5465_v49 = vld [vmem:[%s6844_s2 + $0x98] sm:$0xff]  }
 0x1b5   :  { %v412_v53 = vadd.f32 %v361_v52, %v5878_v48  ;;  %v320_v54 = vpop.f32.mrb[10].mxu1  ;;  %v5076_v55 = vpop.f32.mrb[5].mxu0  ;;  %v5467_v51 = vld [vmem:[%s6844_s2 + $0x68] sm:$0xff]   ;;  %v5468_v52 = vld [vmem:[%s6844_s2 + $0xa0] sm:$0xff]  }
 0x1b6   :  { %v5069_v56 = vpop.f32.mrb[11].mxu1  ;;  %v364_v57 = vpop.f32.mrb[6].mxu0  ;;  %v415_v58 = vsel %vm414_vm3, %v411_v50, -inf  ;;  %v5470_v54 = vld [vmem:[%s6844_s2 + $0x70] sm:$0xff]   ;;  %v5471_v55 = vld [vmem:[%s6844_s2 + $0xa8] sm:$0xff]  }
 0x1b7   :  { %v5077_v59 = vpop.f32.mrb[7].mxu0  ;;  %416 = vmax.xlane.f32.xlu0 %v415_v58  ;;  %v418_v60 = vsel %vm414_vm3, %v412_v53, -inf  ;;  %v5472_v56 = vld [vmem:[%s6844_s2 + $0x30] sm:$0xff]   ;;  %v5473_v57 = vld [vmem:[%s6844_s2 + $0x78] sm:$0xff]  }
 0x1b8   :  { %419 = vmax.xlane.f32.xlu1 %v418_v60  ;;  %v5474_v58 = vld [vmem:[%s6844_s2 + $0xb0] sm:$0xff]   ;;  %v5475_v59 = vld [vmem:[%s6844_s2 + $0x38] sm:$0xff]  }
 0x1b9   :  { %v5476_v60 = vld [vmem:[%s6844_s2 + $0xb8] sm:$0xff]  }
 0x1bb   :  { %v405_v62 = vpop.f32.mrb[12].mxu1 }
 0x1bc   :  { %v413_v63 = vadd.f32 %v405_v62, %v5887_v61  ;;  %v5084_v0 = vpop.f32.mrb[13].mxu1 }
 0x1bd   :  { %v408_v1 = vpop.f32.mrb[14].mxu1 }
 0x1be   :  { %v5085_v2 = vpop.f32.mrb[15].mxu1  ;;  %v421_v4 = vsel %vm414_vm3, %v413_v63, -inf }
 0x1bf   :  { %422 = vmax.xlane.f32.xlu1 %v421_v4 }
 0x244   :  { %v417_v5 = vpop.xlane.xlu0 %416 }
 0x245   :  { %v424_v6 = vsub.f32 %v411_v50, %v417_v5  ;;  %v420_v7 = vpop.xlane.xlu1 %419  ;;  %v5466_v50 = vld [vmem:[%s6844_s2 + $0x20] sm:$0xff]  }
 0x246   :  { %v425_v8 = vsub.f32 %v412_v53, %v420_v7  ;;  %v5469_v53 = vld [vmem:[%s6844_s2 + $0x28] sm:$0xff]  }
 0x247   :  { %v427_v9 = vmul.f32 1.442695, %v424_v6 }
 0x248   :  { %v429_v10 = vmul.f32 1.442695, %v425_v8 }
 0x249   :  { %5636 = vpow2.f32 %v427_v9 }
 0x24a   :  { %5638 = vpow2.f32 %v429_v10 }
 0x24c   :  { %v423_v11 = vpop.xlane.xlu1 %422 }
 0x24d   :  { %v426_v12 = vsub.f32 %v413_v63, %v423_v11 }
 0x24f   :  { %v431_v13 = vmul.f32 1.442695, %v426_v12 }
 0x251   :  { %5640 = vpow2.f32 %v431_v13 }
 0x253   :  { %v5637_v14 = vpop.eup %5636 }
 0x254   :  { %v433_v15 = vsel %vm414_vm3, %v5637_v14, 0.0  ;;  %v5639_v16 = vpop.eup %5638 }
 0x255   :  { %434 = vadd.xlane.f32.xlu1 %v433_v15  ;;  %v436_v17 = vsel %vm414_vm3, %v5639_v16, 0.0 }
 0x259   :  { %437 = vadd.xlane.f32.xlu1 %v436_v17 }
 0x25b   :  { %v5641_v18 = vpop.eup %5640 }
 0x25c   :  { %v439_v19 = vsel %vm414_vm3, %v5641_v18, 0.0 }
 0x25d   :  { %440 = vadd.xlane.f32.xlu1 %v439_v19 }
 0x2e2   :  { %v435_v22 = vpop.xlane.xlu1 %434 }
 0x2e3   :  { %5642 = vrcp.f32 %v435_v22 }
 0x2e6   :  { %v438_v23 = vpop.xlane.xlu1 %437 }
 0x2e7   :  { %5644 = vrcp.f32 %v438_v23 }
 0x2ea   :  { %v441_v24 = vpop.xlane.xlu1 %440 }
 0x2eb   :  { %5646 = vrcp.f32 %v441_v24 }
 0x2ed   :  { %v5643_v25 = vpop.eup %5642 }
 0x2ee   :  { %v445_v27 = vmul.f32 %v5643_v25, %v5637_v14 }
 0x2f0   :  { %v448_v28 = vpack.c.bf16 %v445_v27, %v445_v27  ;;  %v5706_v27 = vld [vmem:[%s6842_s0] sm:$0xff] }
 0x2f1   :  { %v5645_v29 = vpop.eup %5644 }
 0x2f2   :  { %v446_v31 = vmul.f32 %v5645_v29, %v5639_v16  ;;  %5089 = vmatmul.mubr.msk.bf16.vlgmr.msra.gmra.mrb[8].mxu0 %vm414_vm3, %v448_v28  ;;  %v4355_v16 = vld [vmem:[%s6845_s3 + $0x20] sm:$0xff] }
 0x2f3   :  { %5099 = vmatpush3.bf16.msra.mxu0 %v547_v30  ;;  %5100 = vmatprep.mubr.msk.bf16.mxu0 %vm5748_vm2, %v5747_v21 }
 0x2f4   :  { %v495_v33 = vpack.c.bf16 %v446_v31, %v446_v31  ;;  %5104 = vmatprep.subr.bf16.mxu0 %v5747_v21 }
 0x2f5   :  { %v5647_v35 = vpop.eup %5646 }
 0x2f6   :  { %v447_v36 = vmul.f32 %v5647_v35, %v5641_v18  ;;  %5095 = vmatmul.mubr.msk.bf16.vlgmr.msra.gmra.mrb[16].mxu1 %vm414_vm3, %v495_v33  ;;  %v5477_v35 = vld [vmem:[%s6843_s1 + $0x18] ss:$28 sps:$4 sm:$0xff]  }
 0x2f7   :  { %4843 = vmatpush3.bf16.msra.mxu1 %v5454_v32 }
 0x2f8   :  { %v542_v39 = vpack.c.bf16 %v447_v36, %v447_v36  ;;  %4844 = vmatprep.subr.bf16.mxu1 %v5455_v34  ;;  %v5478_v36 = vld [vmem:[%s6843_s1 + $0x50] ss:$0 sps:$4 sm:$0xff]  }
 0x2fa   :  { %5101 = vmatmul.mubr.msk.bf16.vlgmr.msra.gmra.mrb[12].mxu0 %vm414_vm3, %v542_v39  ;;  %v5480_v39 = vld [vmem:[%s6844_s2 + $0xc8] sm:$0xff]  }
 0x2fb   :  { %5105 = vmatpush3.bf16.msra.mxu0 %v5456_v37  ;;  %4845 = vmatpush3.bf16.msra.mxu1 %v5457_v38  ;;  %v905_v37 = vsel %vm131_vm0, %v5478_v36, 0  ;;  %v5479_v38 = vld [vmem:[%s6844_s2 + $0xc0] sm:$0xff]  }
 0x2fc   :  { %5106 = vmatprep.subr.bf16.mxu0 %v5747_v21  ;;  %4846 = vmatprep.subr.bf16.mxu1 %v5458_v40  ;;  %v5481_v40 = vld [vmem:[%s6844_s2 + $0xd0] sm:$0xff]  }
 0x2fd   :  { %5120 = vmatprep.mubr.msk.bf16.mxu0 %vm5748_vm2, %v5747_v21 }
 0x2ff   :  { %5107 = vmatpush3.bf16.msra.mxu0 %v5459_v41  ;;  %4847 = vmatpush3.bf16.msra.mxu1 %v5460_v42  ;;  %v5482_v41 = vld [vmem:[%s6844_s2 + $0xd8] sm:$0xff]   ;;  %v5483_v42 = vld [vmem:[%s6844_s2 + $0xe0] sm:$0xff]  }
 0x300   :  { %5108 = vmatprep.subr.bf16.mxu0 %v5747_v21  ;;  %4848 = vmatprep.subr.bf16.mxu1 %v5461_v43  ;;  %v5484_v43 = vld [vmem:[%s6844_s2 + $0xe8] sm:$0xff]  }
 0x303   :  { %5109 = vmatpush3.bf16.msra.mxu0 %v5462_v44  ;;  %4849 = vmatpush3.bf16.msra.mxu1 %v5463_v45 }
 0x304   :  { %5110 = vmatprep.subr.bf16.mxu0 %v5747_v21  ;;  %4850 = vmatprep.subr.bf16.mxu1 %v5464_v46 }
 0x307   :  { %5111 = vmatpush3.bf16.msra.mxu0 %v5465_v49  ;;  %4851 = vmatpush3.bf16.msra.mxu1 %v5466_v50  ;;  %v867_v50 = vld [vmem:[%s6845_s3] sm:$0xff] }
 0x308   :  { %5112 = vmatprep.subr.bf16.mxu0 %v5747_v21  ;;  %4852 = vmatprep.subr.bf16.mxu1 %v5467_v51 }
 0x30b   :  { %5113 = vmatpush3.bf16.msra.mxu0 %v5468_v52  ;;  %4853 = vmatpush3.bf16.msra.mxu1 %v5469_v53  ;;  %v4380_v52 = vld [vmem:[%s6845_s3 + $0x8] sm:$0xff] }
 0x30c   :  { %5114 = vmatprep.subr.bf16.mxu0 %v5747_v21  ;;  %4854 = vmatprep.subr.bf16.mxu1 %v5470_v54 }
 0x30f   :  { %5115 = vmatpush3.bf16.msra.mxu0 %v5471_v55  ;;  %4855 = vmatpush3.bf16.msra.mxu1 %v5472_v56  ;;  %v5485_v56 = vld [vmem:[%s6844_s2 + $0xf0] sm:$0xff]  }
 0x310   :  { %5116 = vmatprep.subr.bf16.mxu0 %v5747_v21  ;;  %4856 = vmatprep.subr.bf16.mxu1 %v5473_v57  ;;  %v5486_v57 = vld [vmem:[%s6844_s2 + $0xf8] sm:$0xff]  }
 0x313   :  { %5117 = vmatpush3.bf16.msra.mxu0 %v5474_v58  ;;  %4857 = vmatpush3.bf16.msra.mxu1 %v5475_v59  ;;  %v4381_v58 = vld [vmem:[%s6845_s3 + $0x28] sm:$0xff] }
 0x314   :  { %5118 = vmatprep.subr.bf16.mxu0 %v5747_v21  ;;  %5124 = vmatprep.subr.bf16.mxu1 %v5747_v21 }
 0x317   :  { %5119 = vmatpush3.bf16.msra.mxu0 %v5476_v60 }
 0x318   :  { %5132 = vmatprep.subr.bf16.mxu0 %v5747_v21 }
 0x3c5   :  { %v489_v62 = vpop.f32.mrb[8].mxu0 }
 0x3c6   :  { %v5090_v63 = vpop.f32.mrb[9].mxu0  ;;  %v589_v6 = vpack.c.bf16 %v489_v62, %v489_v62 }
 0x3c7   :  { %v492_v0 = vpop.f32.mrb[10].mxu0 }
 0x3c8   :  { %v5091_v1 = vpop.f32.mrb[11].mxu0 }
 0x3c9   :  { %v536_v2 = vpop.f32.mrb[16].mxu1 }
 0x3ca   :  { %v590_v4 = vpack.c.bf16 %v536_v2, %v536_v2  ;;  %v5096_v5 = vpop.f32.mrb[17].mxu1 }
 0x3cb   :  { %v539_v7 = vpop.f32.mrb[18].mxu1 }
 0x3cc   :  { %v5097_v8 = vpop.f32.mrb[19].mxu1  ;;  %818 = vmatprep.mubr.bf16.mxu1 %v590_v4  ;;  %v4385_v4 = vld [vmem:[%s6845_s3 + $0x30] sm:$0xff] }
 0x3cd   :  { %v583_v9 = vpop.f32.mrb[12].mxu0  ;;  %819 = vmatmul.mubr.bf16.vlgmr.msra.gmra.mrb[20].mxu1 %v589_v6 }
 0x3ce   :  { %v591_v10 = vpack.c.bf16 %v583_v9, %v583_v9  ;;  %v5102_v11 = vpop.f32.mrb[13].mxu0  ;;  %5128 = vmatprep.mubr.msk.bf16.mxu1 %vm5748_vm2, %v5747_v21  ;;  %5125 = vmatpush3.bf16.msra.mxu1 %v5477_v35  ;;  %v5492_v35 = vld [vmem:[%s6843_s1 + $0x5c] ss:$28 sps:$4 sm:$0xff]  }
 0x3cf   :  { %v586_v12 = vpop.f32.mrb[14].mxu0  ;;  %5126 = vmatprep.subr.bf16.mxu1 %v5747_v21 }
 0x3d0   :  { %v5103_v13 = vpop.f32.mrb[15].mxu0  ;;  %5121 = vmatmul.mubr.bf16.vlgmr.msra.gmra.mrb[16].mxu0 %v591_v10 }
 0x3d1   :  { %5148 = vmatprep.mubr.msk.bf16.mxu0 %vm5748_vm2, %v5747_v21  ;;  %5133 = vmatpush3.bf16.msra.mxu0 %v5479_v38 }
 0x3d2   :  { %5127 = vmatpush3.bf16.msra.mxu1 %v905_v37  ;;  %5134 = vmatprep.subr.bf16.mxu0 %v5747_v21 }
 0x3d5   :  { %5135 = vmatpush3.bf16.msra.mxu0 %v5480_v39 }
 0x3d6   :  { %5136 = vmatprep.subr.bf16.mxu0 %v5747_v21 }
 0x3d9   :  { %5137 = vmatpush3.bf16.msra.mxu0 %v5481_v40  ;;  %v5499_v40 = vld [vmem:[%s6843_s1 + $0x68] ss:$28 sps:$4 sm:$0xff]  }
 0x3da   :  { %5138 = vmatprep.subr.bf16.mxu0 %v5747_v21 }
 0x3dd   :  { %5139 = vmatpush3.bf16.msra.mxu0 %v5482_v41  ;;  %v4404_v41 = vld [vmem:[%s6843_s1 + $0x9c] sm:$0xff] }
 0x3de   :  { %5140 = vmatprep.subr.bf16.mxu0 %v5747_v21 }
 0x3e1   :  { %5141 = vmatpush3.bf16.msra.mxu0 %v5483_v42  ;;  %v5497_v42 = vld [vmem:[%s6843_s1 + $0x64] ss:$28 sps:$4 sm:$0xff]  }
 0x3e2   :  { %5142 = vmatprep.subr.bf16.mxu0 %v5747_v21 }
 0x3e5   :  { %5143 = vmatpush3.bf16.msra.mxu0 %v5484_v43  ;;  %v4416_v43 = vcombine.high %v4404_v41, %v4404_v41 }
 0x3e6   :  { %5144 = vmatprep.subr.bf16.mxu0 %v5747_v21 }
 0x3e9   :  { %5145 = vmatpush3.bf16.msra.mxu0 %v5485_v56 }
 0x3ea   :  { %5146 = vmatprep.subr.bf16.mxu0 %v5747_v21 }
 0x3ed   :  { %5147 = vmatpush3.bf16.msra.mxu0 %v5486_v57 }
 0x3ee   :  { %5160 = vmatprep.subr.bf16.mxu0 %v5747_v21 }
 0x4a0   :  { %v4858_v14 = vpop.f32.mrb[20].mxu1 }
 0x4a1   :  { %v4859_v15 = vpop.f32.mrb[21].mxu1 }
 0x4a2   :  { %v4860_v17 = vadd.f32 %v4859_v15, %v4858_v14  ;;  %v4861_v18 = vpop.f32.mrb[22].mxu1 }
 0x4a3   :  { %v4862_v19 = vpop.f32.mrb[23].mxu1  ;;  %v860_v20 = vpop.f32.mrb[16].mxu0  ;;  %v5489_v18 = vld [vmem:[%s6843_s1 + $0x58] ss:$28 sps:$4 sm:$0xff]  }
 0x4a4   :  { %v821_v22 = vadd.f32 %v4860_v17, %v4355_v16  ;;  %v5122_v23 = vpop.f32.mrb[17].mxu0  ;;  %v5487_v17 = vld [vmem:[%s6843_s1 + $0x54] ss:$28 sps:$4 sm:$0xff]   ;;  %1186 = vmatprep.subr.bf16.mxu1 %v5489_v18 }
 0x4a5   :  { %v863_v24 = vpop.f32.mrb[18].mxu0  ;;  %v4402_v19 = vld [vmem:[%s6843_s1 + $0x8c] sm:$0xff] }
 0x4a6   :  { %v861_v25 = vadd.f32 %v860_v20, %v821_v22  ;;  %v5123_v26 = vpop.f32.mrb[19].mxu0  ;;  %v4412_v20 = vcombine.high %v4402_v19, %v4402_v19  ;;  %v4411_v22 = vcombine.low %v4402_v19, %v4402_v19  ;;  %v5494_v24 = vld [vmem:[%s6843_s1 + $0x60] ss:$28 sps:$4 sm:$0xff]  }
 0x4a8   :  { %v866_v28 = vadd.f32 %v5706_v27, %v861_v25  ;;  %v1169_v23 = vsel %vm131_vm0, %v4411_v22, 0 }
 0x4aa   :  { %v870_v29 = vsel %vm127_vm1, %v866_v28, 0.0 }
 0x4ab   :  { %871 = vadd.xlane.f32.xlu1 %v870_v29  ;;  %v4394_v29 = vld [vmem:[%s6845_s3 + $0x10] sm:$0xff] }
 0x538   :  { %v872_v30 = vpop.xlane.xlu1 %871 }
 0x539   :  { %v874_v31 = vmul.f32 0.041666668, %v872_v30 }
 0x53b   :  { %v875_v32 = vsub.f32 %v866_v28, %v874_v31  ;;  %v4395_v31 = vld [vmem:[%s6845_s3 + $0x18] sm:$0xff] }
 0x53d   :  { %v876_v33 = vmul.f32 %v875_v32, %v875_v32 }
 0x53f   :  { %v877_v34 = vsel %vm127_vm1, %v876_v33, 0.0  ;;  %v4403_v33 = vld [vmem:[%s6843_s1 + $0x94] sm:$0xff] }
 0x540   :  { %878 = vadd.xlane.f32.xlu1 %v877_v34  ;;  %v4414_v37 = vcombine.high %v4403_v33, %v4403_v33  ;;  %v4413_v38 = vcombine.low %v4403_v33, %v4403_v33 }
 0x542   :  { %v1175_v39 = vsel %vm131_vm0, %v4413_v38, 0 }
 0x5cd   :  { %v879_v44 = vpop.xlane.xlu1 %878 }
 0x5ce   :  { %v880_v45 = vmul.f32 0.041666668, %v879_v44  ;;  %v4415_v44 = vcombine.low %v4404_v41, %v4404_v41 }
 0x5d0   :  { %v881_v46 = vadd.f32 1e-05, %v880_v45  ;;  %v1181_v45 = vsel %vm131_vm0, %v4415_v44, 0 }
 0x5d2   :  { %5648 = vrsqrt.f32 %v881_v46 }
 0x5dc   :  { %v5649_v49 = vpop.eup %5648 }
 0x5dd   :  { %v883_v51 = vmul.f32 %v5649_v49, %v875_v32 }
 0x5df   :  { %v884_v53 = vmul.f32 %v883_v51, %v867_v50 }
 0x5e1   :  { %v885_v54 = vadd.f32 %v4380_v52, %v884_v53 }
 0x5e3   :  { %v886_v55 = vpack.c.bf16 %v885_v54, %v885_v54 }
 0x5e5   :  { %5129 = vmatmul.mubr.msk.bf16.vlgmr.msra.gmra.mrb[24].mxu1 %vm127_vm1, %v886_v55 }
 0x5e6   :  { %1218 = vmatprep.mubr.bf16.mxu1 %v5746_v3  ;;  %1187 = vmatpush1.bf16.msra.mxu1 %v5487_v17 }
 0x5e7   :  { %4417 = vmatprep.subr.msk.bf16.mxu1 %vm131_vm0, %v4412_v20 }
 0x5ea   :  { %1189 = vmatpush1.bf16.msra.mxu1 %v1169_v23 }
 0x5eb   :  { %1227 = vmatprep.subr.bf16.mxu1 %v5494_v24 }
 0x6b8   :  { %v941_v59 = vpop.f32.mrb[24].mxu1 }
 0x6b9   :  { %v942_v60 = vadd.f32 %v4381_v58, %v941_v59  ;;  %v5130_v62 = vpop.f32.mrb[25].mxu1 }
 0x6ba   :  { %v944_v63 = vpop.f32.mrb[26].mxu1 }
 0x6bb   :  { %v947_v0 = vmax.f32 %v942_v60, 0.0  ;;  %v5131_v1 = vpop.f32.mrb[27].mxu1 }
 0x6bd   :  { %v948_v2 = vpack.c.bf16 %v947_v0, %v947_v0 }
 0x6bf   :  { %5149 = vmatmul.mubr.bf16.vlgmr.msra.gmra.mrb[20].mxu0 %v948_v2 }
 0x6c0   :  { %5164 = vmatprep.mubr.msk.bf16.mxu0 %vm5748_vm2, %v5747_v21 }
 0x792   :  { %v1049_v5 = vpop.f32.mrb[20].mxu0 }
 0x793   :  { %v1050_v6 = vadd.f32 %v4385_v4, %v1049_v5  ;;  %v5150_v7 = vpop.f32.mrb[21].mxu0 }
 0x794   :  { %v1052_v8 = vpop.f32.mrb[22].mxu0 }
 0x795   :  { %v5151_v9 = vpop.f32.mrb[23].mxu0  ;;  %v1055_v10 = vadd.f32 %v1050_v6, %v885_v54 }
 0x797   :  { %v1060_v11 = vsel %vm127_vm1, %v1055_v10, 0.0 }
 0x798   :  { %1061 = vadd.xlane.f32.xlu1 %v1060_v11 }
 0x825   :  { %v1062_v12 = vpop.xlane.xlu1 %1061 }
 0x826   :  { %v1063_v13 = vmul.f32 0.041666668, %v1062_v12 }
 0x828   :  { %v1064_v14 = vsub.f32 %v1055_v10, %v1063_v13 }
 0x82a   :  { %v1065_v15 = vmul.f32 %v1064_v14, %v1064_v14 }
 0x82c   :  { %v1066_v16 = vsel %vm127_vm1, %v1065_v15, 0.0 }
 0x82d   :  { %1067 = vadd.xlane.f32.xlu1 %v1066_v16 }
 0x8ba   :  { %v1068_v25 = vpop.xlane.xlu1 %1067 }
 0x8bb   :  { %v1069_v26 = vmul.f32 0.041666668, %v1068_v25 }
 0x8bd   :  { %v1070_v27 = vadd.f32 1e-05, %v1069_v26 }
 0x8bf   :  { %5650 = vrsqrt.f32 %v1070_v27 }
 0x8c9   :  { %v5651_v28 = vpop.eup %5650 }
 0x8ca   :  { %v1072_v30 = vmul.f32 %v5651_v28, %v1064_v14 }
 0x8cc   :  { %v1073_v32 = vmul.f32 %v4394_v29, %v1072_v30 }
 0x8ce   :  { %v6079_v34 = vadd.f32 %v4395_v31, %v1073_v32 }
 0x8d0   :  { %1076 = vxpose.xlu1.b32.start.end [1/1] (short) (narrow) %v6079_v34, 24  ;;  %v1075_v36 = vpack.c.bf16 %v6079_v34, %v6079_v34 }
 0x8d2   :  { %4418 = vmatmul.mubr.msk.bf16.vlgmr.msra.gmra.mrb[28].mxu1 %vm127_vm1, %v1075_v36 }
 0x8d3   :  { %1228 = vmatpush1.bf16.msra.mxu1 %v5492_v35  ;;  %1259 = vmatprep.mubr.bf16.mxu1 %v5746_v3 }
 0x8d4   :  { %4419 = vmatprep.subr.msk.bf16.mxu1 %vm131_vm0, %v4414_v37 }
 0x8d7   :  { %1230 = vmatpush1.bf16.msra.mxu1 %v1175_v39 }
 0x8d8   :  { %1268 = vmatprep.subr.bf16.mxu1 %v5499_v40 }
 0x8da   :  { %4420 = vmatmul.mubr.msk.bf16.vlgmr.msra.gmra.mrb[32].mxu1 %vm127_vm1, %v1075_v36 }
 0x8db   :  { %1269 = vmatpush1.bf16.msra.mxu1 %v5497_v42  ;;  %1300 = vmatprep.mubr.bf16.mxu1 %v5746_v3 }
 0x8dc   :  { %4421 = vmatprep.subr.msk.bf16.mxu1 %vm131_vm0, %v4416_v43  ;;  %v5502_v43 = vld [vmem:[%s6844_s2 + $0x140] sm:$0xff]  }
 0x8df   :  { %1271 = vmatpush1.bf16.msra.mxu1 %v1181_v45 }
 0x8e0   :  { %5152 = vmatprep.subr.bf16.mxu1 %v5747_v21 }
 0x8e2   :  { %4422 = vmatmul.mubr.msk.bf16.vlgmr.msra.gmra.mrb[36].mxu1 %vm127_vm1, %v1075_v36 }
 0x8e3   :  { %5156 = vmatprep.mubr.msk.bf16.mxu1 %vm5748_vm2, %v5747_v21 }
 0x950   :  { %v1092_v46 = vpop.trf.xlu1 }
 0x954   :  { %v1093_v49 = vpop.trf.xlu1 }
 0x955   :  { %v1108_v50 = vpack.c.bf16 %v1093_v49, %v1092_v46 }
 0x957   :  { %5153 = vmatpush3.bf16.msra.mxu1 %v1108_v50  ;;  %5161 = vmatpush3.bf16.msra.mxu0 %v1108_v50 }
 0x958   :  { %v1094_v51 = vpop.trf.xlu1  ;;  %5154 = vmatprep.subr.bf16.mxu1 %v5747_v21  ;;  %5162 = vmatprep.subr.bf16.mxu0 %v5747_v21 }
 0x959   :  { %v1109_v52 = vpack.c.bf16 %v1094_v51, %v1094_v51 }
 0x95b   :  { %v1317_v53 = vsel %vm131_vm0, %v1109_v52, 0 }
 0x95c   :  { %5155 = vmatpush3.bf16.msra.mxu1 %v1317_v53  ;;  %5163 = vmatpush3.bf16.msra.mxu0 %v1317_v53 }
 0x95d   :  { %5168 = vmatprep.subr.bf16.mxu1 %v5747_v21  ;;  %5176 = vmatprep.subr.bf16.mxu0 %v5747_v21 }
 0x9a5   :  { %v1220_v54 = vpop.f32.mrb[28].mxu1 }
 0x9a6   :  { %v1312_v55 = vpack.c.bf16 %v1220_v54, %v1220_v54  ;;  %v1222_v56 = vpop.f32.mrb[29].mxu1 }
 0x9a7   :  { %v1359_v57 = vpack.c.bf16 %v1222_v56, %v1222_v56  ;;  %v1224_v58 = vpop.f32.mrb[30].mxu1  ;;  %v5503_v56 = vld [vmem:[%s6844_s2 + $0x100] sm:$0xff]  }
 0x9a8   :  { %v1225_v59 = vpop.f32.mrb[31].mxu1  ;;  %5157 = vmatmul.mubr.msk.bf16.vlgmr.msra.gmra.mrb[40].mxu1 %vm127_vm1, %v1312_v55  ;;  %v5504_v58 = vld [vmem:[%s6844_s2 + $0x148] sm:$0xff]  }
 0x9a9   :  { %5169 = vmatpush3.bf16.msra.mxu1 %v1108_v50  ;;  %5165 = vmatmul.mubr.msk.bf16.vlgmr.msra.gmra.mrb[24].mxu0 %vm127_vm1, %v1359_v57 }
 0x9aa   :  { %5170 = vmatprep.subr.bf16.mxu1 %v5747_v21  ;;  %5172 = vmatprep.mubr.msk.bf16.mxu1 %vm5748_vm2, %v5747_v21 }
 0x9ab   :  { %5178 = vmatprep.mubr.msk.bf16.mxu0 %vm5748_vm2, %v5747_v21 }
 0x9ad   :  { %5171 = vmatpush3.bf16.msra.mxu1 %v1317_v53  ;;  %v1261_v60 = vpop.f32.mrb[32].mxu1 }
 0x9ae   :  { %v1403_v62 = vpack.c.bf16 %v1261_v60, %v1261_v60  ;;  %v1263_v63 = vpop.f32.mrb[33].mxu1  ;;  %5182 = vmatprep.subr.bf16.mxu1 %v5747_v21 }
 0x9af   :  { %v1309_v0 = vpack.c.bf16 %v1263_v63, %v1263_v63  ;;  %v1265_v1 = vpop.f32.mrb[34].mxu1  ;;  %v5506_v63 = vld [vmem:[%s6844_s2 + $0x108] sm:$0xff]  }
 0x9b0   :  { %v1266_v2 = vpop.f32.mrb[35].mxu1  ;;  %5173 = vmatmul.mubr.msk.bf16.vlgmr.msra.gmra.mrb[44].mxu1 %vm127_vm1, %v1403_v62  ;;  %v5505_v62 = vld [vmem:[%s6844_s2 + $0x180] sm:$0xff]   ;;  %v5507_v1 = vld [vmem:[%s6844_s2 + $0x150] sm:$0xff]  }
 0x9b1   :  { %v1488_v4 = vsel %vm131_vm0, %v1309_v0, 0  ;;  %5184 = vmatprep.mubr.msk.bf16.mxu1 %vm5748_vm2, %v5747_v21  ;;  %v5508_v2 = vld [vmem:[%s6844_s2 + $0x188] sm:$0xff]  }
 0x9b2   :  { %5177 = vmatpush3.bf16.msra.mxu0 %v1488_v4  ;;  %v5509_v4 = vld [vmem:[%s6844_s2 + $0x110] sm:$0xff]  }
 0x9b3   :  { %5188 = vmatprep.subr.bf16.mxu0 %v5747_v21 }
 0x9b5   :  { %v1302_v5 = vpop.f32.mrb[36].mxu1 }
 0x9b6   :  { %v1310_v6 = vpack.c.bf16 %v1302_v5, %v1302_v5  ;;  %v1304_v7 = vpop.f32.mrb[37].mxu1  ;;  %v5510_v5 = vld [vmem:[%s6844_s2 + $0x158] sm:$0xff]  }
 0x9b7   :  { %v1306_v8 = vpop.f32.mrb[38].mxu1  ;;  %v1311_v50 = vpack.c.bf16 %v1304_v7, %v1304_v7  ;;  %v5512_v7 = vld [vmem:[%s6844_s2 + $0x118] sm:$0xff]  }
 0x9b8   :  { %v1535_v9 = vsel %vm131_vm0, %v1310_v6, 0  ;;  %v1307_v10 = vpop.f32.mrb[39].mxu1  ;;  %v5511_v6 = vld [vmem:[%s6844_s2 + $0x190] sm:$0xff]   ;;  %v5513_v8 = vld [vmem:[%s6844_s2 + $0x160] sm:$0xff]  }
 0x9b9   :  { %5183 = vmatpush3.bf16.msra.mxu1 %v1535_v9  ;;  %v1582_v54 = vsel %vm131_vm0, %v1311_v50, 0  ;;  %v5514_v9 = vld [vmem:[%s6844_s2 + $0x198] sm:$0xff]   ;;  %v5515_v10 = vld [vmem:[%s6844_s2 + $0x120] sm:$0xff]  }
 0x9ba   :  { %4900 = vmatprep.subr.bf16.mxu1 %v5502_v43 }
 0xa7b   :  { %v1353_v11 = vpop.f32.mrb[40].mxu1 }
 0xa7c   :  { %v1447_v12 = vadd.f32 %v1353_v11, %v5873_v47  ;;  %v5158_v13 = vpop.f32.mrb[41].mxu1  ;;  %v1397_v14 = vpop.f32.mrb[24].mxu0  ;;  %v5516_v11 = vld [vmem:[%s6844_s2 + $0x168] sm:$0xff]  }
 0xa7d   :  { %v1356_v15 = vpop.f32.mrb[42].mxu1  ;;  %v5166_v16 = vpop.f32.mrb[25].mxu0  ;;  %v1448_v17 = vadd.f32 %v1397_v14, %v5878_v48  ;;  %v5518_v13 = vld [vmem:[%s6844_s2 + $0x128] sm:$0xff]   ;;  %v5519_v14 = vld [vmem:[%s6844_s2 + $0x170] sm:$0xff]  }
 0xa7e   :  { %v5159_v18 = vpop.f32.mrb[43].mxu1  ;;  %v1400_v19 = vpop.f32.mrb[26].mxu0  ;;  %v1450_v20 = vsel %vm414_vm3, %v1447_v12, -inf  ;;  %v5520_v15 = vld [vmem:[%s6844_s2 + $0x1a8] sm:$0xff]   ;;  %v5521_v16 = vld [vmem:[%s6844_s2 + $0x130] sm:$0xff]  }
 0xa7f   :  { %v5167_v22 = vpop.f32.mrb[27].mxu0  ;;  %1451 = vmax.xlane.f32.xlu0 %v1450_v20  ;;  %v1453_v23 = vsel %vm414_vm3, %v1448_v17, -inf  ;;  %v5523_v18 = vld [vmem:[%s6844_s2 + $0x1b0] sm:$0xff]   ;;  %v5524_v19 = vld [vmem:[%s6844_s2 + $0x138] sm:$0xff]  }
 0xa80   :  { %v5525_v20 = vld [vmem:[%s6844_s2 + $0x1b8] sm:$0xff]  }
 0xa83   :  { %1454 = vmax.xlane.f32.xlu0 %v1453_v23  ;;  %v1441_v24 = vpop.f32.mrb[44].mxu1 }
 0xa84   :  { %v1449_v25 = vadd.f32 %v1441_v24, %v5887_v61  ;;  %v5174_v26 = vpop.f32.mrb[45].mxu1 }
 0xa85   :  { %v1444_v47 = vpop.f32.mrb[46].mxu1 }
 0xa86   :  { %v5175_v27 = vpop.f32.mrb[47].mxu1  ;;  %v1456_v28 = vsel %vm414_vm3, %v1449_v25, -inf }
 0xa87   :  { %1457 = vmax.xlane.f32.xlu0 %v1456_v28 }
 0xb0c   :  { %v1452_v29 = vpop.xlane.xlu0 %1451 }
 0xb0d   :  { %v1459_v48 = vsub.f32 %v1447_v12, %v1452_v29  ;;  %v5517_v12 = vld [vmem:[%s6844_s2 + $0x1a0] sm:$0xff]  }
 0xb0f   :  { %v1462_v30 = vmul.f32 1.442695, %v1459_v48 }
 0xb10   :  { %v1455_v31 = vpop.xlane.xlu0 %1454 }
 0xb11   :  { %5652 = vpow2.f32 %v1462_v30  ;;  %v1460_v32 = vsub.f32 %v1448_v17, %v1455_v31  ;;  %v5522_v17 = vld [vmem:[%s6844_s2 + $0x178] sm:$0xff]  }
 0xb13   :  { %v1464_v33 = vmul.f32 1.442695, %v1460_v32 }
 0xb14   :  { %v1458_v35 = vpop.xlane.xlu0 %1457 }
 0xb15   :  { %5654 = vpow2.f32 %v1464_v33  ;;  %v1461_v36 = vsub.f32 %v1449_v25, %v1458_v35 }
 0xb17   :  { %v1466_v37 = vmul.f32 1.442695, %v1461_v36 }
 0xb19   :  { %5656 = vpow2.f32 %v1466_v37 }
 0xb1b   :  { %v5653_v38 = vpop.eup %5652 }
 0xb1c   :  { %v1468_v61 = vsel %vm414_vm3, %v5653_v38, 0.0 }
 0xb1d   :  { %1469 = vadd.xlane.f32.xlu0 %v1468_v61 }
 0xb1f   :  { %v5655_v39 = vpop.eup %5654 }
 0xb20   :  { %v1471_v40 = vsel %vm414_vm3, %v5655_v39, 0.0 }
 0xb21   :  { %1472 = vadd.xlane.f32.xlu0 %v1471_v40 }
 0xb23   :  { %v5657_v41 = vpop.eup %5656 }
 0xb24   :  { %v1474_v42 = vsel %vm414_vm3, %v5657_v41, 0.0 }
 0xb25   :  { %1475 = vadd.xlane.f32.xlu0 %v1474_v42 }
 0xbaa   :  { %v1470_v44 = vpop.xlane.xlu0 %1469 }
 0xbab   :  { %5658 = vrcp.f32 %v1470_v44 }
 0xbae   :  { %v1473_v45 = vpop.xlane.xlu0 %1472 }
 0xbaf   :  { %5660 = vrcp.f32 %v1473_v45 }
 0xbb2   :  { %v1476_v46 = vpop.xlane.xlu0 %1475 }
 0xbb3   :  { %5662 = vrcp.f32 %v1476_v46 }
 0xbb5   :  { %v5659_v49 = vpop.eup %5658 }
 0xbb6   :  { %v1480_v51 = vmul.f32 %v5659_v49, %v5653_v38  ;;  %v4477_v38 = vld [vmem:[%s6845_s3 + $0x58] sm:$0xff] }
 0xbb8   :  { %v1483_v52 = vpack.c.bf16 %v1480_v51, %v1480_v51 }
 0xbb9   :  { %v5661_v53 = vpop.eup %5660 }
 0xbba   :  { %v1481_v55 = vmul.f32 %v5661_v53, %v5655_v39  ;;  %5179 = vmatmul.mubr.msk.bf16.vlgmr.msra.gmra.mrb[28].mxu0 %vm414_vm3, %v1483_v52 }
 0xbbb   :  { %5189 = vmatpush3.bf16.msra.mxu0 %v1582_v54  ;;  %5190 = vmatprep.mubr.msk.bf16.mxu0 %vm5748_vm2, %v5747_v21 }
 0xbbc   :  { %v1530_v57 = vpack.c.bf16 %v1481_v55, %v1481_v55  ;;  %5194 = vmatprep.subr.bf16.mxu0 %v5747_v21 }
 0xbbd   :  { %v5663_v59 = vpop.eup %5662 }
 0xbbe   :  { %v1482_v60 = vmul.f32 %v5663_v59, %v5657_v41  ;;  %5185 = vmatmul.mubr.msk.bf16.vlgmr.msra.gmra.mrb[48].mxu1 %vm414_vm3, %v1530_v57  ;;  %v5527_v57 = vld [vmem:[%s6843_s1 + $0xa4] ss:$0 sps:$4 sm:$0xff]   ;;  %v5529_v59 = vld [vmem:[%s6844_s2 + $0x1c8] sm:$0xff]  }
 0xbbf   :  { %4901 = vmatpush3.bf16.msra.mxu1 %v5503_v56  ;;  %v5526_v56 = vld [vmem:[%s6843_s1 + $0x6c] ss:$28 sps:$4 sm:$0xff]  }
 0xbc0   :  { %v1577_v0 = vpack.c.bf16 %v1482_v60, %v1482_v60  ;;  %4902 = vmatprep.subr.bf16.mxu1 %v5504_v58  ;;  %v5528_v58 = vld [vmem:[%s6844_s2 + $0x1c0] sm:$0xff]   ;;  %v5530_v60 = vld [vmem:[%s6844_s2 + $0x1d0] sm:$0xff]  }
 0xbc2   :  { %5191 = vmatmul.mubr.msk.bf16.vlgmr.msra.gmra.mrb[32].mxu0 %vm414_vm3, %v1577_v0  ;;  %v5533_v0 = vld [vmem:[%s6844_s2 + $0x1e8] sm:$0xff]  }
 0xbc3   :  { %5195 = vmatpush3.bf16.msra.mxu0 %v5505_v62  ;;  %4903 = vmatpush3.bf16.msra.mxu1 %v5506_v63  ;;  %v5531_v62 = vld [vmem:[%s6844_s2 + $0x1d8] sm:$0xff]   ;;  %v5532_v63 = vld [vmem:[%s6844_s2 + $0x1e0] sm:$0xff]  }
 0xbc4   :  { %5196 = vmatprep.subr.bf16.mxu0 %v5747_v21  ;;  %4904 = vmatprep.subr.bf16.mxu1 %v5507_v1 }
 0xbc5   :  { %5210 = vmatprep.mubr.msk.bf16.mxu0 %vm5748_vm2, %v5747_v21 }
 0xbc7   :  { %5197 = vmatpush3.bf16.msra.mxu0 %v5508_v2  ;;  %4905 = vmatpush3.bf16.msra.mxu1 %v5509_v4 }
 0xbc8   :  { %5198 = vmatprep.subr.bf16.mxu0 %v5747_v21  ;;  %4906 = vmatprep.subr.bf16.mxu1 %v5510_v5 }
 0xbcb   :  { %5199 = vmatpush3.bf16.msra.mxu0 %v5511_v6  ;;  %4907 = vmatpush3.bf16.msra.mxu1 %v5512_v7  ;;  %v4502_v6 = vld [vmem:[%s6845_s3 + $0x38] sm:$0xff] }
 0xbcc   :  { %5200 = vmatprep.subr.bf16.mxu0 %v5747_v21  ;;  %4908 = vmatprep.subr.bf16.mxu1 %v5513_v8  ;;  %v4503_v8 = vld [vmem:[%s6845_s3 + $0x40] sm:$0xff] }
 0xbcf   :  { %5201 = vmatpush3.bf16.msra.mxu0 %v5514_v9  ;;  %4909 = vmatpush3.bf16.msra.mxu1 %v5515_v10 }
 0xbd0   :  { %5202 = vmatprep.subr.bf16.mxu0 %v5747_v21  ;;  %4910 = vmatprep.subr.bf16.mxu1 %v5516_v11 }
 0xbd3   :  { %5203 = vmatpush3.bf16.msra.mxu0 %v5517_v12  ;;  %4911 = vmatpush3.bf16.msra.mxu1 %v5518_v13  ;;  %v5534_v12 = vld [vmem:[%s6844_s2 + $0x1f0] sm:$0xff]   ;;  %v5535_v13 = vld [vmem:[%s6844_s2 + $0x1f8] sm:$0xff]  }
 0xbd4   :  { %5204 = vmatprep.subr.bf16.mxu0 %v5747_v21  ;;  %4912 = vmatprep.subr.bf16.mxu1 %v5519_v14  ;;  %v4507_v14 = vld [vmem:[%s6845_s3 + $0x60] sm:$0xff] }
 0xbd7   :  { %5205 = vmatpush3.bf16.msra.mxu0 %v5520_v15  ;;  %4913 = vmatpush3.bf16.msra.mxu1 %v5521_v16 }
 0xbd8   :  { %5206 = vmatprep.subr.bf16.mxu0 %v5747_v21  ;;  %4914 = vmatprep.subr.bf16.mxu1 %v5522_v17 }
 0xbdb   :  { %5207 = vmatpush3.bf16.msra.mxu0 %v5523_v18  ;;  %4915 = vmatpush3.bf16.msra.mxu1 %v5524_v19 }
 0xbdc   :  { %5208 = vmatprep.subr.bf16.mxu0 %v5747_v21  ;;  %5214 = vmatprep.subr.bf16.mxu1 %v5747_v21 }
 0xbdf   :  { %5209 = vmatpush3.bf16.msra.mxu0 %v5525_v20 }
 0xbe0   :  { %5222 = vmatprep.subr.bf16.mxu0 %v5747_v21 }
 0xc8d   :  { %v1524_v22 = vpop.f32.mrb[28].mxu0 }
 0xc8e   :  { %v5180_v23 = vpop.f32.mrb[29].mxu0  ;;  %v1624_v28 = vpack.c.bf16 %v1524_v22, %v1524_v22 }
 0xc8f   :  { %v1527_v24 = vpop.f32.mrb[30].mxu0  ;;  %v4527_v23 = vld [vmem:[%s6845_s3 + $0x68] sm:$0xff] }
 0xc90   :  { %v5181_v25 = vpop.f32.mrb[31].mxu0 }
 0xc91   :  { %v1571_v26 = vpop.f32.mrb[48].mxu1 }
 0xc92   :  { %v1625_v47 = vpack.c.bf16 %v1571_v26, %v1571_v26  ;;  %v5186_v27 = vpop.f32.mrb[49].mxu1 }
 0xc93   :  { %v1574_v29 = vpop.f32.mrb[50].mxu1 }
 0xc94   :  { %v5187_v48 = vpop.f32.mrb[51].mxu1  ;;  %1854 = vmatprep.mubr.bf16.mxu1 %v1625_v47 }
 0xc95   :  { %v1618_v30 = vpop.f32.mrb[32].mxu0  ;;  %1855 = vmatmul.mubr.bf16.vlgmr.msra.gmra.mrb[52].mxu1 %v1624_v28 }
 0xc96   :  { %v1626_v31 = vpack.c.bf16 %v1618_v30, %v1618_v30  ;;  %v5192_v32 = vpop.f32.mrb[33].mxu0  ;;  %5218 = vmatprep.mubr.msk.bf16.mxu1 %vm5748_vm2, %v5747_v21  ;;  %5215 = vmatpush3.bf16.msra.mxu1 %v5526_v56 }
 0xc97   :  { %v1621_v33 = vpop.f32.mrb[34].mxu0  ;;  %5216 = vmatprep.subr.bf16.mxu1 %v5747_v21 }
 0xc98   :  { %v5193_v35 = vpop.f32.mrb[35].mxu0  ;;  %5211 = vmatmul.mubr.bf16.vlgmr.msra.gmra.mrb[36].mxu0 %v1626_v31 }
 0xc99   :  { %5238 = vmatprep.mubr.msk.bf16.mxu0 %vm5748_vm2, %v5747_v21  ;;  %5223 = vmatpush3.bf16.msra.mxu0 %v5528_v58  ;;  %v5536_v35 = vld [vmem:[%s6843_s1 + $0xa8] ss:$28 sps:$4 sm:$0xff]   ;;  %v4546_v58 = vld [vmem:[%s6843_s1 + $0xf0] sm:$0xff] }
 0xc9a   :  { %5224 = vmatprep.subr.bf16.mxu0 %v5747_v21 }
 0xc9d   :  { %5225 = vmatpush3.bf16.msra.mxu0 %v5529_v59  ;;  %v5546_v59 = vld [vmem:[%s6843_s1 + $0xb8] ss:$28 sps:$4 sm:$0xff]  }
 0xc9e   :  { %5226 = vmatprep.subr.bf16.mxu0 %v5747_v21 }
 0xca1   :  { %5227 = vmatpush3.bf16.msra.mxu0 %v5530_v60  ;;  %v4558_v60 = vcombine.high %v4546_v58, %v4546_v58 }
 0xca2   :  { %5228 = vmatprep.subr.bf16.mxu0 %v5747_v21 }
 0xca5   :  { %5229 = vmatpush3.bf16.msra.mxu0 %v5531_v62  ;;  %v4557_v62 = vcombine.low %v4546_v58, %v4546_v58 }
 0xca6   :  { %5230 = vmatprep.subr.bf16.mxu0 %v5747_v21 }
 0xca9   :  { %5231 = vmatpush3.bf16.msra.mxu0 %v5532_v63  ;;  %v2217_v63 = vsel %vm131_vm0, %v4557_v62, 0 }
 0xcaa   :  { %5232 = vmatprep.subr.bf16.mxu0 %v5747_v21 }
 0xcad   :  { %5233 = vmatpush3.bf16.msra.mxu0 %v5533_v0 }
 0xcae   :  { %5234 = vmatprep.subr.bf16.mxu0 %v5747_v21 }
 0xcb1   :  { %5235 = vmatpush3.bf16.msra.mxu0 %v5534_v12 }
 0xcb2   :  { %5236 = vmatprep.subr.bf16.mxu0 %v5747_v21 }
 0xcb5   :  { %5237 = vmatpush3.bf16.msra.mxu0 %v5535_v13 }
 0xcb6   :  { %5250 = vmatprep.subr.bf16.mxu0 %v5747_v21 }
 0xd68   :  { %v4916_v36 = vpop.f32.mrb[52].mxu1 }
 0xd69   :  { %v4917_v37 = vpop.f32.mrb[53].mxu1 }
 0xd6a   :  { %v4918_v61 = vadd.f32 %v4917_v37, %v4916_v36  ;;  %v4919_v39 = vpop.f32.mrb[54].mxu1  ;;  %v5538_v36 = vld [vmem:[%s6843_s1 + $0xac] ss:$28 sps:$4 sm:$0xff]   ;;  %v4544_v37 = vld [vmem:[%s6843_s1 + $0xe0] sm:$0xff] }
 0xd6b   :  { %v4920_v40 = vpop.f32.mrb[55].mxu1  ;;  %v1896_v41 = vpop.f32.mrb[36].mxu0 }
 0xd6c   :  { %v1857_v42 = vadd.f32 %v4918_v61, %v4477_v38  ;;  %v5212_v43 = vpop.f32.mrb[37].mxu0  ;;  %v4554_v38 = vcombine.high %v4544_v37, %v4544_v37  ;;  %v4553_v61 = vcombine.low %v4544_v37, %v4544_v37  ;;  %v5543_v40 = vld [vmem:[%s6843_s1 + $0xb4] ss:$28 sps:$4 sm:$0xff]  }
 0xd6d   :  { %v1899_v44 = vpop.f32.mrb[38].mxu0 }
 0xd6e   :  { %v1897_v45 = vadd.f32 %v1896_v41, %v1857_v42  ;;  %v5213_v46 = vpop.f32.mrb[39].mxu0  ;;  %v2205_v39 = vsel %vm131_vm0, %v4553_v61, 0 }
 0xd70   :  { %v1902_v49 = vadd.f32 %v1897_v45, %v6079_v34  ;;  %v1941_v34 = vsel %vm131_vm0, %v5527_v57, 0  ;;  %v4536_v45 = vld [vmem:[%s6845_s3 + $0x48] sm:$0xff] }
 0xd71   :  { %5217 = vmatpush3.bf16.msra.mxu1 %v1941_v34  ;;  %v5548_v34 = vld [vmem:[%s6843_s1 + $0xbc] ss:$28 sps:$4 sm:$0xff]  }
 0xd72   :  { %v1907_v50 = vsel %vm127_vm1, %v1902_v49, 0.0  ;;  %2222 = vmatprep.subr.bf16.mxu1 %v5538_v36 }
 0xd73   :  { %1908 = vadd.xlane.f32.xlu0 %v1907_v50 }
 0xe00   :  { %v1909_v51 = vpop.xlane.xlu0 %1908 }
 0xe01   :  { %v1910_v52 = vmul.f32 0.041666668, %v1909_v51  ;;  %v4545_v51 = vld [vmem:[%s6843_s1 + $0xe8] sm:$0xff] }
 0xe02   :  { %v4555_v56 = vcombine.low %v4545_v51, %v4545_v51 }
 0xe03   :  { %v1911_v53 = vsub.f32 %v1902_v49, %v1910_v52  ;;  %v4537_v49 = vld [vmem:[%s6845_s3 + $0x50] sm:$0xff] }
 0xe04   :  { %v2211_v57 = vsel %vm131_vm0, %v4555_v56, 0 }
 0xe05   :  { %v1912_v54 = vmul.f32 %v1911_v53, %v1911_v53 }
 0xe07   :  { %v1913_v55 = vsel %vm127_vm1, %v1912_v54, 0.0 }
 0xe08   :  { %1914 = vadd.xlane.f32.xlu0 %v1913_v55  ;;  %v4556_v55 = vcombine.high %v4545_v51, %v4545_v51 }
 0xe95   :  { %v1915_v1 = vpop.xlane.xlu0 %1914 }
 0xe96   :  { %v1916_v2 = vmul.f32 0.041666668, %v1915_v1 }
 0xe98   :  { %v1917_v4 = vadd.f32 1e-05, %v1916_v2 }
 0xe9a   :  { %5664 = vrsqrt.f32 %v1917_v4 }
 0xea4   :  { %v5665_v5 = vpop.eup %5664 }
 0xea5   :  { %v1919_v7 = vmul.f32 %v5665_v5, %v1911_v53  ;;  %v5541_v53 = vld [vmem:[%s6843_s1 + $0xb0] ss:$28 sps:$4 sm:$0xff]  }
 0xea7   :  { %v1920_v9 = vmul.f32 %v4502_v6, %v1919_v7 }
 0xea9   :  { %v1921_v10 = vadd.f32 %v4503_v8, %v1920_v9 }
 0xeab   :  { %v1922_v11 = vpack.c.bf16 %v1921_v10, %v1921_v10 }
 0xead   :  { %5219 = vmatmul.mubr.msk.bf16.vlgmr.msra.gmra.mrb[56].mxu1 %vm127_vm1, %v1922_v11 }
 0xeae   :  { %2254 = vmatprep.mubr.bf16.mxu1 %v5746_v3  ;;  %2223 = vmatpush1.bf16.msra.mxu1 %v5536_v35 }
 0xeaf   :  { %4559 = vmatprep.subr.msk.bf16.mxu1 %vm131_vm0, %v4554_v38 }
 0xeb2   :  { %2225 = vmatpush1.bf16.msra.mxu1 %v2205_v39 }
 0xeb3   :  { %2263 = vmatprep.subr.bf16.mxu1 %v5543_v40  ;;  %v6385_v40 = vld [vmem:[%s6848_s6 + $0x10] sm:$0xff] }
 0xf80   :  { %v1977_v15 = vpop.f32.mrb[56].mxu1 }
 0xf81   :  { %v1978_v16 = vadd.f32 %v4507_v14, %v1977_v15  ;;  %v5220_v17 = vpop.f32.mrb[57].mxu1 }
 0xf82   :  { %v1980_v18 = vpop.f32.mrb[58].mxu1 }
 0xf83   :  { %v1983_v19 = vmax.f32 %v1978_v16, 0.0  ;;  %v5221_v20 = vpop.f32.mrb[59].mxu1 }
 0xf85   :  { %v1984_v22 = vpack.c.bf16 %v1983_v19, %v1983_v19 }
 0xf87   :  { %5239 = vmatmul.mubr.bf16.vlgmr.msra.gmra.mrb[40].mxu0 %v1984_v22 }
 0xf88   :  { %5254 = vmatprep.mubr.msk.bf16.mxu0 %vm5748_vm2, %v5747_v21 }
0x105a   :  { %v2085_v24 = vpop.f32.mrb[40].mxu0 }
0x105b   :  { %v2086_v25 = vadd.f32 %v4527_v23, %v2085_v24  ;;  %v5240_v26 = vpop.f32.mrb[41].mxu0 }
0x105c   :  { %v2088_v47 = vpop.f32.mrb[42].mxu0 }
0x105d   :  { %v5241_v27 = vpop.f32.mrb[43].mxu0  ;;  %v2091_v28 = vadd.f32 %v2086_v25, %v1921_v10 }
0x105e   :  { %v6371_v27 = vld [vmem:[%s6848_s6] sm:$0xff] }
0x105f   :  { %v2096_v29 = vsel %vm127_vm1, %v2091_v28, 0.0 }
0x1060   :  { %2097 = vadd.xlane.f32.xlu1 %v2096_v29 }
0x10ed   :  { %v2098_v48 = vpop.xlane.xlu1 %2097 }
0x10ee   :  { %v2099_v30 = vmul.f32 0.041666668, %v2098_v48 }
0x10f0   :  { %v2100_v31 = vsub.f32 %v2091_v28, %v2099_v30  ;;  %v6377_v30 = vld [vmem:[%s6848_s6 + $0x8] sm:$0xff] }
0x10f2   :  { %v2101_v32 = vmul.f32 %v2100_v31, %v2100_v31 }
0x10f4   :  { %v2102_v33 = vsel %vm127_vm1, %v2101_v32, 0.0 }
0x10f5   :  { %2103 = vadd.xlane.f32.xlu0 %v2102_v33 }
0x1182   :  { %v2104_v41 = vpop.xlane.xlu0 %2103 }
0x1183   :  { %v2105_v42 = vmul.f32 0.041666668, %v2104_v41 }
0x1185   :  { %v2106_v43 = vadd.f32 1e-05, %v2105_v42 }
0x1187   :  { %5666 = vrsqrt.f32 %v2106_v43 }
0x1191   :  { %v5667_v44 = vpop.eup %5666 }
0x1192   :  { %v2108_v46 = vmul.f32 %v5667_v44, %v2100_v31 }
0x1194   :  { %v2109_v50 = vmul.f32 %v4536_v45, %v2108_v46 }
0x1196   :  { %v6317_v52 = vadd.f32 %v4537_v49, %v2109_v50 }
0x1198   :  { %2112 = vxpose.xlu0.b32.start.end [1/1] (short) (narrow) %v6317_v52, 24  ;;  %v2111_v54 = vpack.c.bf16 %v6317_v52, %v6317_v52 }
0x119a   :  { %4560 = vmatmul.mubr.msk.bf16.vlgmr.msra.gmra.mrb[60].mxu1 %vm127_vm1, %v2111_v54 }
0x119b   :  { %2264 = vmatpush1.bf16.msra.mxu1 %v5541_v53  ;;  %2295 = vmatprep.mubr.bf16.mxu1 %v5746_v3 }
0x119c   :  { %4561 = vmatprep.subr.msk.bf16.mxu1 %vm131_vm0, %v4556_v55 }
0x119f   :  { %2266 = vmatpush1.bf16.msra.mxu1 %v2211_v57 }
0x11a0   :  { %2304 = vmatprep.subr.bf16.mxu1 %v5548_v34 }
0x11a2   :  { %4562 = vmatmul.mubr.msk.bf16.vlgmr.msra.gmra.mrb[64].mxu1 %vm127_vm1, %v2111_v54 }
0x11a3   :  { %2305 = vmatpush1.bf16.msra.mxu1 %v5546_v59  ;;  %2336 = vmatprep.mubr.bf16.mxu1 %v5746_v3 }
0x11a4   :  { %4563 = vmatprep.subr.msk.bf16.mxu1 %vm131_vm0, %v4558_v60 }
0x11a7   :  { %2307 = vmatpush1.bf16.msra.mxu1 %v2217_v63 }
0x11a8   :  { %5242 = vmatprep.subr.bf16.mxu1 %v5747_v21 }
0x11aa   :  { %4564 = vmatmul.mubr.msk.bf16.vlgmr.msra.gmra.mrb[68].mxu1 %vm127_vm1, %v2111_v54 }
0x11ab   :  { %5246 = vmatprep.mubr.msk.bf16.mxu1 %vm5748_vm2, %v5747_v21 }
0x11c1   :  { %5437 = vset.pattern.permute.xlu0 %v5746_v3 }
0x1218   :  { %v2128_v0 = vpop.trf.xlu0 }
0x121c   :  { %v2129_v1 = vpop.trf.xlu0 }
0x121d   :  { %v2144_v2 = vpack.c.bf16 %v2129_v1, %v2128_v0  ;;  %v5551_v0 = vld [vmem:[%s6844_s2 + $0x240] sm:$0xff]  }
0x121f   :  { %5243 = vmatpush3.bf16.msra.mxu1 %v2144_v2  ;;  %5251 = vmatpush3.bf16.msra.mxu0 %v2144_v2 }
0x1220   :  { %v2130_v4 = vpop.trf.xlu0  ;;  %5244 = vmatprep.subr.bf16.mxu1 %v5747_v21  ;;  %5252 = vmatprep.subr.bf16.mxu0 %v5747_v21 }
0x1221   :  { %v2145_v5 = vpack.c.bf16 %v2130_v4, %v2130_v4 }
0x1223   :  { %v2353_v6 = vsel %vm131_vm0, %v2145_v5, 0 }
0x1224   :  { %5245 = vmatpush3.bf16.msra.mxu1 %v2353_v6  ;;  %5253 = vmatpush3.bf16.msra.mxu0 %v2353_v6 }
0x1225   :  { %5258 = vmatprep.subr.bf16.mxu1 %v5747_v21  ;;  %5266 = vmatprep.subr.bf16.mxu0 %v5747_v21 }
0x126d   :  { %v2256_v7 = vpop.f32.mrb[60].mxu1 }
0x126e   :  { %v2348_v8 = vpack.c.bf16 %v2256_v7, %v2256_v7  ;;  %v2258_v9 = vpop.f32.mrb[61].mxu1 }
0x126f   :  { %v2395_v10 = vpack.c.bf16 %v2258_v9, %v2258_v9  ;;  %v2260_v11 = vpop.f32.mrb[62].mxu1 }
0x1270   :  { %v2261_v12 = vpop.f32.mrb[63].mxu1  ;;  %5247 = vmatmul.mubr.msk.bf16.vlgmr.msra.gmra.mrb[72].mxu1 %vm127_vm1, %v2348_v8 }
0x1271   :  { %5259 = vmatpush3.bf16.msra.mxu1 %v2144_v2  ;;  %5255 = vmatmul.mubr.msk.bf16.vlgmr.msra.gmra.mrb[44].mxu0 %vm127_vm1, %v2395_v10  ;;  %v5552_v12 = vld [vmem:[%s6844_s2 + $0x200] sm:$0xff]  }
0x1272   :  { %5260 = vmatprep.subr.bf16.mxu1 %v5747_v21  ;;  %5262 = vmatprep.mubr.msk.bf16.mxu1 %vm5748_vm2, %v5747_v21 }
0x1273   :  { %5268 = vmatprep.mubr.msk.bf16.mxu0 %vm5748_vm2, %v5747_v21 }
0x1275   :  { %5261 = vmatpush3.bf16.msra.mxu1 %v2353_v6  ;;  %v2297_v13 = vpop.f32.mrb[64].mxu1 }
0x1276   :  { %v2439_v14 = vpack.c.bf16 %v2297_v13, %v2297_v13  ;;  %v2299_v15 = vpop.f32.mrb[65].mxu1  ;;  %5272 = vmatprep.subr.bf16.mxu1 %v5747_v21 }
0x1277   :  { %v2345_v16 = vpack.c.bf16 %v2299_v15, %v2299_v15  ;;  %v2301_v17 = vpop.f32.mrb[66].mxu1 }
0x1278   :  { %v2302_v18 = vpop.f32.mrb[67].mxu1  ;;  %5263 = vmatmul.mubr.msk.bf16.vlgmr.msra.gmra.mrb[76].mxu1 %vm127_vm1, %v2439_v14  ;;  %v5553_v14 = vld [vmem:[%s6844_s2 + $0x248] sm:$0xff]   ;;  %v5554_v17 = vld [vmem:[%s6844_s2 + $0x280] sm:$0xff]  }
0x1279   :  { %v2524_v19 = vsel %vm131_vm0, %v2345_v16, 0  ;;  %5274 = vmatprep.mubr.msk.bf16.mxu1 %vm5748_vm2, %v5747_v21  ;;  %v5555_v18 = vld [vmem:[%s6844_s2 + $0x208] sm:$0xff]  }
0x127a   :  { %5267 = vmatpush3.bf16.msra.mxu0 %v2524_v19 }
0x127b   :  { %5278 = vmatprep.subr.bf16.mxu0 %v5747_v21 }
0x127d   :  { %v2338_v20 = vpop.f32.mrb[68].mxu1 }
0x127e   :  { %v2346_v22 = vpack.c.bf16 %v2338_v20, %v2338_v20  ;;  %v6365_v23 = vpop.f32.mrb[69].mxu1  ;;  %v5556_v20 = vld [vmem:[%s6844_s2 + $0x250] sm:$0xff]  }
0x127f   :  { %v2342_v24 = vpop.f32.mrb[70].mxu1  ;;  %v2347_v6 = vpack.c.bf16 %v6365_v23, %v6365_v23  ;;  %v5558_v23 = vld [vmem:[%s6844_s2 + $0x210] sm:$0xff]  }
0x1280   :  { %v2571_v25 = vsel %vm131_vm0, %v2346_v22, 0  ;;  %v2343_v26 = vpop.f32.mrb[71].mxu1  ;;  %v5557_v22 = vld [vmem:[%s6844_s2 + $0x288] sm:$0xff]   ;;  %v5559_v24 = vld [vmem:[%s6844_s2 + $0x258] sm:$0xff]  }
0x1281   :  { %5273 = vmatpush3.bf16.msra.mxu1 %v2571_v25  ;;  %v2618_v10 = vsel %vm131_vm0, %v2347_v6, 0  ;;  %v5560_v25 = vld [vmem:[%s6844_s2 + $0x290] sm:$0xff]   ;;  %v5561_v26 = vld [vmem:[%s6844_s2 + $0x218] sm:$0xff]  }
0x1282   :  { %4958 = vmatprep.subr.bf16.mxu1 %v5551_v0 }
0x1343   :  { %v2389_v47 = vpop.f32.mrb[72].mxu1 }
0x1344   :  { %v2483_v28 = vadd.f32 %v6371_v27, %v2389_v47  ;;  %v5248_v29 = vpop.f32.mrb[73].mxu1  ;;  %v2433_v48 = vpop.f32.mrb[44].mxu0  ;;  %v5562_v47 = vld [vmem:[%s6844_s2 + $0x260] sm:$0xff]  }
0x1345   :  { %v2484_v31 = vadd.f32 %v6377_v30, %v2433_v48  ;;  %v2392_v32 = vpop.f32.mrb[74].mxu1  ;;  %v5256_v33 = vpop.f32.mrb[45].mxu0  ;;  %v5564_v29 = vld [vmem:[%s6844_s2 + $0x220] sm:$0xff]   ;;  %v5565_v48 = vld [vmem:[%s6844_s2 + $0x268] sm:$0xff]  }
0x1346   :  { %v5249_v35 = vpop.f32.mrb[75].mxu1  ;;  %v2436_v36 = vpop.f32.mrb[46].mxu0  ;;  %v2486_v37 = vsel %vm414_vm3, %v2483_v28, -inf  ;;  %v5567_v32 = vld [vmem:[%s6844_s2 + $0x228] sm:$0xff]   ;;  %v5568_v33 = vld [vmem:[%s6844_s2 + $0x270] sm:$0xff]  }
0x1347   :  { %v5257_v38 = vpop.f32.mrb[47].mxu0  ;;  %2487 = vmax.xlane.f32.xlu1 %v2486_v37  ;;  %v2489_v61 = vsel %vm414_vm3, %v2484_v31, -inf  ;;  %v5569_v35 = vld [vmem:[%s6844_s2 + $0x2a8] sm:$0xff]   ;;  %v5570_v36 = vld [vmem:[%s6844_s2 + $0x230] sm:$0xff]   ;;  %v5571_v37 = vld [vmem:[%s6844_s2 + $0x278] sm:$0xff]  }
0x1348   :  { %2490 = vmax.xlane.f32.xlu0 %v2489_v61  ;;  %v5572_v38 = vld [vmem:[%s6844_s2 + $0x2b0] sm:$0xff]   ;;  %v5573_v61 = vld [vmem:[%s6844_s2 + $0x238] sm:$0xff]  }
0x134b   :  { %v2477_v39 = vpop.f32.mrb[76].mxu1 }
0x134c   :  { %v2485_v41 = vadd.f32 %v6385_v40, %v2477_v39  ;;  %v5264_v42 = vpop.f32.mrb[77].mxu1  ;;  %v5574_v39 = vld [vmem:[%s6844_s2 + $0x2b8] sm:$0xff]  }
0x134d   :  { %v2480_v43 = vpop.f32.mrb[78].mxu1 }
0x134e   :  { %v5265_v44 = vpop.f32.mrb[79].mxu1  ;;  %v2492_v45 = vsel %vm414_vm3, %v2485_v41, -inf }
0x134f   :  { %2493 = vmax.xlane.f32.xlu1 %v2492_v45 }
0x13d4   :  { %v2488_v46 = vpop.xlane.xlu1 %2487 }
0x13d5   :  { %v2495_v49 = vsub.f32 %v2483_v28, %v2488_v46  ;;  %v2491_v50 = vpop.xlane.xlu0 %2490  ;;  %v5563_v28 = vld [vmem:[%s6844_s2 + $0x298] sm:$0xff]  }
0x13d6   :  { %v2496_v51 = vsub.f32 %v2484_v31, %v2491_v50  ;;  %v5566_v31 = vld [vmem:[%s6844_s2 + $0x2a0] sm:$0xff]  }
0x13d7   :  { %v2498_v53 = vmul.f32 1.442695, %v2495_v49 }
0x13d8   :  { %v2500_v54 = vmul.f32 1.442695, %v2496_v51 }
0x13d9   :  { %5668 = vpow2.f32 %v2498_v53 }
0x13da   :  { %5670 = vpow2.f32 %v2500_v54 }
0x13dc   :  { %v2494_v55 = vpop.xlane.xlu1 %2493 }
0x13dd   :  { %v2497_v56 = vsub.f32 %v2485_v41, %v2494_v55 }
0x13df   :  { %v2502_v57 = vmul.f32 1.442695, %v2497_v56 }
0x13e1   :  { %5672 = vpow2.f32 %v2502_v57 }
0x13e3   :  { %v5669_v34 = vpop.eup %5668 }
0x13e4   :  { %v2504_v58 = vsel %vm414_vm3, %v5669_v34, 0.0  ;;  %v5671_v59 = vpop.eup %5670 }
0x13e5   :  { %2505 = vadd.xlane.f32.xlu1 %v2504_v58  ;;  %v2507_v60 = vsel %vm414_vm3, %v5671_v59, 0.0 }
0x13e9   :  { %2508 = vadd.xlane.f32.xlu1 %v2507_v60  ;;  %v4619_v60 = vld [vmem:[%s6845_s3 + $0x90] sm:$0xff] }
0x13eb   :  { %v5673_v62 = vpop.eup %5672 }
0x13ec   :  { %v2510_v63 = vsel %vm414_vm3, %v5673_v62, 0.0 }
0x13ed   :  { %2511 = vadd.xlane.f32.xlu1 %v2510_v63 }
0x1472   :  { %v2506_v1 = vpop.xlane.xlu1 %2505 }
0x1473   :  { %5674 = vrcp.f32 %v2506_v1 }
0x1476   :  { %v2509_v2 = vpop.xlane.xlu1 %2508 }
0x1477   :  { %5676 = vrcp.f32 %v2509_v2 }
0x147a   :  { %v2512_v4 = vpop.xlane.xlu1 %2511 }
0x147b   :  { %5678 = vrcp.f32 %v2512_v4 }
0x147d   :  { %v5675_v5 = vpop.eup %5674 }
0x147e   :  { %v2516_v7 = vmul.f32 %v5675_v5, %v5669_v34 }
0x1480   :  { %v2519_v8 = vpack.c.bf16 %v2516_v7, %v2516_v7 }
0x1481   :  { %v5677_v9 = vpop.eup %5676 }
0x1482   :  { %v2517_v11 = vmul.f32 %v5677_v9, %v5671_v59  ;;  %5269 = vmatmul.mubr.msk.bf16.vlgmr.msra.gmra.mrb[48].mxu0 %vm414_vm3, %v2519_v8 }
0x1483   :  { %5279 = vmatpush3.bf16.msra.mxu0 %v2618_v10  ;;  %5280 = vmatprep.mubr.msk.bf16.mxu0 %vm5748_vm2, %v5747_v21 }
0x1484   :  { %v2566_v13 = vpack.c.bf16 %v2517_v11, %v2517_v11  ;;  %5284 = vmatprep.subr.bf16.mxu0 %v5747_v21 }
0x1485   :  { %v5679_v15 = vpop.eup %5678 }
0x1486   :  { %v2518_v16 = vmul.f32 %v5679_v15, %v5673_v62  ;;  %5275 = vmatmul.mubr.msk.bf16.vlgmr.msra.gmra.mrb[80].mxu1 %vm414_vm3, %v2566_v13  ;;  %v5575_v15 = vld [vmem:[%s6843_s1 + $0xc0] ss:$28 sps:$4 sm:$0xff]  }
0x1487   :  { %4959 = vmatpush3.bf16.msra.mxu1 %v5552_v12 }
0x1488   :  { %v2613_v19 = vpack.c.bf16 %v2518_v16, %v2518_v16  ;;  %4960 = vmatprep.subr.bf16.mxu1 %v5553_v14  ;;  %v5576_v16 = vld [vmem:[%s6843_s1 + $0xf8] ss:$0 sps:$4 sm:$0xff]  }
0x148a   :  { %5281 = vmatmul.mubr.msk.bf16.vlgmr.msra.gmra.mrb[52].mxu0 %vm414_vm3, %v2613_v19  ;;  %v5579_v19 = vld [vmem:[%s6844_s2 + $0x2d0] sm:$0xff]  }
0x148b   :  { %5285 = vmatpush3.bf16.msra.mxu0 %v5554_v17  ;;  %4961 = vmatpush3.bf16.msra.mxu1 %v5555_v18  ;;  %v5577_v17 = vld [vmem:[%s6844_s2 + $0x2c0] sm:$0xff]   ;;  %v5578_v18 = vld [vmem:[%s6844_s2 + $0x2c8] sm:$0xff]  }
0x148c   :  { %5286 = vmatprep.subr.bf16.mxu0 %v5747_v21  ;;  %4962 = vmatprep.subr.bf16.mxu1 %v5556_v20  ;;  %v5580_v20 = vld [vmem:[%s6844_s2 + $0x2d8] sm:$0xff]  }
0x148d   :  { %5300 = vmatprep.mubr.msk.bf16.mxu0 %vm5748_vm2, %v5747_v21 }
0x148f   :  { %5287 = vmatpush3.bf16.msra.mxu0 %v5557_v22  ;;  %4963 = vmatpush3.bf16.msra.mxu1 %v5558_v23  ;;  %v5581_v22 = vld [vmem:[%s6844_s2 + $0x2e0] sm:$0xff]   ;;  %v5582_v23 = vld [vmem:[%s6844_s2 + $0x2e8] sm:$0xff]  }
0x1490   :  { %5288 = vmatprep.subr.bf16.mxu0 %v5747_v21  ;;  %4964 = vmatprep.subr.bf16.mxu1 %v5559_v24 }
0x1493   :  { %5289 = vmatpush3.bf16.msra.mxu0 %v5560_v25  ;;  %4965 = vmatpush3.bf16.msra.mxu1 %v5561_v26 }
0x1494   :  { %5290 = vmatprep.subr.bf16.mxu0 %v5747_v21  ;;  %4966 = vmatprep.subr.bf16.mxu1 %v5562_v47 }
0x1497   :  { %5291 = vmatpush3.bf16.msra.mxu0 %v5563_v28  ;;  %4967 = vmatpush3.bf16.msra.mxu1 %v5564_v29  ;;  %v4644_v28 = vld [vmem:[%s6845_s3 + $0x70] sm:$0xff] }
0x1498   :  { %5292 = vmatprep.subr.bf16.mxu0 %v5747_v21  ;;  %4968 = vmatprep.subr.bf16.mxu1 %v5565_v48  ;;  %v4645_v48 = vld [vmem:[%s6845_s3 + $0x78] sm:$0xff] }
0x149b   :  { %5293 = vmatpush3.bf16.msra.mxu0 %v5566_v31  ;;  %4969 = vmatpush3.bf16.msra.mxu1 %v5567_v32 }
0x149c   :  { %5294 = vmatprep.subr.bf16.mxu0 %v5747_v21  ;;  %4970 = vmatprep.subr.bf16.mxu1 %v5568_v33 }
0x149f   :  { %5295 = vmatpush3.bf16.msra.mxu0 %v5569_v35  ;;  %4971 = vmatpush3.bf16.msra.mxu1 %v5570_v36  ;;  %v5583_v35 = vld [vmem:[%s6844_s2 + $0x2f0] sm:$0xff]   ;;  %v5584_v36 = vld [vmem:[%s6844_s2 + $0x2f8] sm:$0xff]  }
0x14a0   :  { %5296 = vmatprep.subr.bf16.mxu0 %v5747_v21  ;;  %4972 = vmatprep.subr.bf16.mxu1 %v5571_v37  ;;  %v4649_v37 = vld [vmem:[%s6845_s3 + $0x98] sm:$0xff] }
0x14a3   :  { %5297 = vmatpush3.bf16.msra.mxu0 %v5572_v38  ;;  %4973 = vmatpush3.bf16.msra.mxu1 %v5573_v61 }
0x14a4   :  { %5298 = vmatprep.subr.bf16.mxu0 %v5747_v21  ;;  %5304 = vmatprep.subr.bf16.mxu1 %v5747_v21 }
0x14a7   :  { %5299 = vmatpush3.bf16.msra.mxu0 %v5574_v39 }
0x14a8   :  { %5312 = vmatprep.subr.bf16.mxu0 %v5747_v21 }
0x1555   :  { %v2560_v41 = vpop.f32.mrb[48].mxu0 }
0x1556   :  { %v5270_v42 = vpop.f32.mrb[49].mxu0  ;;  %v2660_v50 = vpack.c.bf16 %v2560_v41, %v2560_v41 }
0x1557   :  { %v2563_v43 = vpop.f32.mrb[50].mxu0 }
0x1558   :  { %v5271_v44 = vpop.f32.mrb[51].mxu0 }
0x1559   :  { %v2607_v45 = vpop.f32.mrb[80].mxu1 }
0x155a   :  { %v2661_v46 = vpack.c.bf16 %v2607_v45, %v2607_v45  ;;  %v5276_v49 = vpop.f32.mrb[81].mxu1  ;;  %v4669_v45 = vld [vmem:[%s6845_s3 + $0xa0] sm:$0xff] }
0x155b   :  { %v2610_v51 = vpop.f32.mrb[82].mxu1 }
0x155c   :  { %v5277_v53 = vpop.f32.mrb[83].mxu1  ;;  %2890 = vmatprep.mubr.bf16.mxu1 %v2661_v46 }
0x155d   :  { %v2654_v54 = vpop.f32.mrb[52].mxu0  ;;  %2891 = vmatmul.mubr.bf16.vlgmr.msra.gmra.mrb[84].mxu1 %v2660_v50 }
0x155e   :  { %v2662_v55 = vpack.c.bf16 %v2654_v54, %v2654_v54  ;;  %v5282_v56 = vpop.f32.mrb[53].mxu0  ;;  %5308 = vmatprep.mubr.msk.bf16.mxu1 %vm5748_vm2, %v5747_v21  ;;  %5305 = vmatpush3.bf16.msra.mxu1 %v5575_v15  ;;  %v5590_v15 = vld [vmem:[%s6843_s1 + $0x104] ss:$28 sps:$4 sm:$0xff]  }
0x155f   :  { %v2657_v57 = vpop.f32.mrb[54].mxu0  ;;  %5306 = vmatprep.subr.bf16.mxu1 %v5747_v21 }
0x1560   :  { %v5283_v34 = vpop.f32.mrb[55].mxu0  ;;  %5301 = vmatmul.mubr.bf16.vlgmr.msra.gmra.mrb[56].mxu0 %v2662_v55 }
0x1561   :  { %5328 = vmatprep.mubr.msk.bf16.mxu0 %vm5748_vm2, %v5747_v21  ;;  %5313 = vmatpush3.bf16.msra.mxu0 %v5577_v17 }
0x1562   :  { %5314 = vmatprep.subr.bf16.mxu0 %v5747_v21 }
0x1565   :  { %5315 = vmatpush3.bf16.msra.mxu0 %v5578_v18 }
0x1566   :  { %5316 = vmatprep.subr.bf16.mxu0 %v5747_v21 }
0x1569   :  { %5317 = vmatpush3.bf16.msra.mxu0 %v5579_v19  ;;  %v5597_v19 = vld [vmem:[%s6843_s1 + $0x110] ss:$28 sps:$4 sm:$0xff]  }
0x156a   :  { %5318 = vmatprep.subr.bf16.mxu0 %v5747_v21 }
0x156d   :  { %5319 = vmatpush3.bf16.msra.mxu0 %v5580_v20  ;;  %v4688_v20 = vld [vmem:[%s6843_s1 + $0x144] sm:$0xff] }
0x156e   :  { %5320 = vmatprep.subr.bf16.mxu0 %v5747_v21 }
0x1571   :  { %5321 = vmatpush3.bf16.msra.mxu0 %v5581_v22  ;;  %v5595_v22 = vld [vmem:[%s6843_s1 + $0x10c] ss:$28 sps:$4 sm:$0xff]  }
0x1572   :  { %5322 = vmatprep.subr.bf16.mxu0 %v5747_v21 }
0x1575   :  { %5323 = vmatpush3.bf16.msra.mxu0 %v5582_v23  ;;  %v4700_v23 = vcombine.high %v4688_v20, %v4688_v20 }
0x1576   :  { %5324 = vmatprep.subr.bf16.mxu0 %v5747_v21 }
0x1579   :  { %5325 = vmatpush3.bf16.msra.mxu0 %v5583_v35 }
0x157a   :  { %5326 = vmatprep.subr.bf16.mxu0 %v5747_v21 }
0x157d   :  { %5327 = vmatpush3.bf16.msra.mxu0 %v5584_v36 }
0x157e   :  { %5340 = vmatprep.subr.bf16.mxu0 %v5747_v21 }
0x1630   :  { %v4974_v58 = vpop.f32.mrb[84].mxu1 }
0x1631   :  { %v4975_v59 = vpop.f32.mrb[85].mxu1 }
0x1632   :  { %v4976_v62 = vadd.f32 %v4975_v59, %v4974_v58  ;;  %v4977_v63 = vpop.f32.mrb[86].mxu1 }
0x1633   :  { %v4978_v0 = vpop.f32.mrb[87].mxu1  ;;  %v2932_v1 = vpop.f32.mrb[56].mxu0  ;;  %v4686_v63 = vld [vmem:[%s6843_s1 + $0x134] sm:$0xff] }
0x1634   :  { %v2893_v2 = vadd.f32 %v4976_v62, %v4619_v60  ;;  %v5302_v4 = vpop.f32.mrb[57].mxu0  ;;  %v5585_v60 = vld [vmem:[%s6843_s1 + $0xfc] ss:$28 sps:$4 sm:$0xff]   ;;  %v4696_v0 = vcombine.high %v4686_v63, %v4686_v63 }
0x1635   :  { %v2935_v5 = vpop.f32.mrb[58].mxu0  ;;  %v5587_v62 = vld [vmem:[%s6843_s1 + $0x100] ss:$28 sps:$4 sm:$0xff]   ;;  %v5592_v4 = vld [vmem:[%s6843_s1 + $0x108] ss:$28 sps:$4 sm:$0xff]  }
0x1636   :  { %v2933_v6 = vadd.f32 %v2932_v1, %v2893_v2  ;;  %v5303_v7 = vpop.f32.mrb[59].mxu0  ;;  %v4695_v1 = vcombine.low %v4686_v63, %v4686_v63 }
0x1638   :  { %v2938_v8 = vadd.f32 %v2933_v6, %v6317_v52  ;;  %v2977_v52 = vsel %vm131_vm0, %v5576_v16, 0  ;;  %v3241_v2 = vsel %vm131_vm0, %v4695_v1, 0 }
0x1639   :  { %5307 = vmatpush3.bf16.msra.mxu1 %v2977_v52 }
0x163a   :  { %v2943_v9 = vsel %vm127_vm1, %v2938_v8, 0.0  ;;  %3258 = vmatprep.subr.bf16.mxu1 %v5587_v62 }
0x163b   :  { %2944 = vadd.xlane.f32.xlu1 %v2943_v9  ;;  %v4678_v9 = vld [vmem:[%s6845_s3 + $0x80] sm:$0xff] }
0x16c8   :  { %v2945_v10 = vpop.xlane.xlu1 %2944 }
0x16c9   :  { %v2946_v11 = vmul.f32 0.041666668, %v2945_v10 }
0x16cb   :  { %v2947_v12 = vsub.f32 %v2938_v8, %v2946_v11  ;;  %v4679_v11 = vld [vmem:[%s6845_s3 + $0x88] sm:$0xff] }
0x16cd   :  { %v2948_v13 = vmul.f32 %v2947_v12, %v2947_v12 }
0x16cf   :  { %v2949_v14 = vsel %vm127_vm1, %v2948_v13, 0.0  ;;  %v4687_v13 = vld [vmem:[%s6843_s1 + $0x13c] sm:$0xff] }
0x16d0   :  { %2950 = vadd.xlane.f32.xlu1 %v2949_v14  ;;  %v4698_v52 = vcombine.high %v4687_v13, %v4687_v13  ;;  %v4697_v17 = vcombine.low %v4687_v13, %v4687_v13 }
0x16d2   :  { %v3247_v18 = vsel %vm131_vm0, %v4697_v17, 0 }
0x175d   :  { %v2951_v24 = vpop.xlane.xlu1 %2950 }
0x175e   :  { %v2952_v25 = vmul.f32 0.041666668, %v2951_v24  ;;  %v4699_v24 = vcombine.low %v4688_v20, %v4688_v20 }
0x1760   :  { %v2953_v26 = vadd.f32 1e-05, %v2952_v25  ;;  %v3253_v25 = vsel %vm131_vm0, %v4699_v24, 0 }
0x1762   :  { %5680 = vrsqrt.f32 %v2953_v26 }
0x176c   :  { %v5681_v47 = vpop.eup %5680 }
0x176d   :  { %v2955_v29 = vmul.f32 %v5681_v47, %v2947_v12 }
0x176f   :  { %v2956_v31 = vmul.f32 %v4644_v28, %v2955_v29 }
0x1771   :  { %v2957_v32 = vadd.f32 %v4645_v48, %v2956_v31 }
0x1773   :  { %v2958_v33 = vpack.c.bf16 %v2957_v32, %v2957_v32 }
0x1775   :  { %5309 = vmatmul.mubr.msk.bf16.vlgmr.msra.gmra.mrb[88].mxu1 %vm127_vm1, %v2958_v33 }
0x1776   :  { %3290 = vmatprep.mubr.bf16.mxu1 %v5746_v3  ;;  %3259 = vmatpush1.bf16.msra.mxu1 %v5585_v60 }
0x1777   :  { %4701 = vmatprep.subr.msk.bf16.mxu1 %vm131_vm0, %v4696_v0 }
0x177a   :  { %3261 = vmatpush1.bf16.msra.mxu1 %v3241_v2 }
0x177b   :  { %3299 = vmatprep.subr.bf16.mxu1 %v5592_v4 }
0x1848   :  { %v3013_v38 = vpop.f32.mrb[88].mxu1 }
0x1849   :  { %v3014_v61 = vadd.f32 %v4649_v37, %v3013_v38  ;;  %v5310_v39 = vpop.f32.mrb[89].mxu1 }
0x184a   :  { %v3016_v41 = vpop.f32.mrb[90].mxu1 }
0x184b   :  { %v3019_v42 = vmax.f32 %v3014_v61, 0.0  ;;  %v5311_v43 = vpop.f32.mrb[91].mxu1 }
0x184d   :  { %v3020_v44 = vpack.c.bf16 %v3019_v42, %v3019_v42 }
0x184f   :  { %5329 = vmatmul.mubr.bf16.vlgmr.msra.gmra.mrb[60].mxu0 %v3020_v44 }
0x1850   :  { %5344 = vmatprep.mubr.msk.bf16.mxu0 %vm5748_vm2, %v5747_v21 }
0x1922   :  { %v3121_v46 = vpop.f32.mrb[60].mxu0 }
0x1923   :  { %v3122_v49 = vadd.f32 %v4669_v45, %v3121_v46  ;;  %v5330_v50 = vpop.f32.mrb[61].mxu0 }
0x1924   :  { %v3124_v51 = vpop.f32.mrb[62].mxu0 }
0x1925   :  { %v5331_v53 = vpop.f32.mrb[63].mxu0  ;;  %v3127_v54 = vadd.f32 %v3122_v49, %v2957_v32 }
0x1927   :  { %v3132_v55 = vsel %vm127_vm1, %v3127_v54, 0.0 }
0x1928   :  { %3133 = vadd.xlane.f32.xlu1 %v3132_v55 }
0x19b5   :  { %v3134_v56 = vpop.xlane.xlu1 %3133 }
0x19b6   :  { %v3135_v57 = vmul.f32 0.041666668, %v3134_v56 }
0x19b8   :  { %v3136_v34 = vsub.f32 %v3127_v54, %v3135_v57 }
0x19ba   :  { %v3137_v58 = vmul.f32 %v3136_v34, %v3136_v34 }
0x19bc   :  { %v3138_v59 = vsel %vm127_vm1, %v3137_v58, 0.0 }
0x19bd   :  { %3139 = vadd.xlane.f32.xlu1 %v3138_v59 }
0x1a4a   :  { %v3140_v5 = vpop.xlane.xlu1 %3139 }
0x1a4b   :  { %v3141_v6 = vmul.f32 0.041666668, %v3140_v5 }
0x1a4d   :  { %v3142_v7 = vadd.f32 1e-05, %v3141_v6 }
0x1a4f   :  { %5682 = vrsqrt.f32 %v3142_v7 }
0x1a59   :  { %v5683_v8 = vpop.eup %5682 }
0x1a5a   :  { %v3144_v10 = vmul.f32 %v5683_v8, %v3136_v34 }
0x1a5c   :  { %v3145_v12 = vmul.f32 %v4678_v9, %v3144_v10 }
0x1a5e   :  { %v6575_v14 = vadd.f32 %v4679_v11, %v3145_v12 }
0x1a60   :  { %3148 = vxpose.xlu1.b32.start.end [1/1] (short) (narrow) %v6575_v14, 24  ;;  %v3147_v16 = vpack.c.bf16 %v6575_v14, %v6575_v14 }
0x1a62   :  { %4702 = vmatmul.mubr.msk.bf16.vlgmr.msra.gmra.mrb[92].mxu1 %vm127_vm1, %v3147_v16 }
0x1a63   :  { %3300 = vmatpush1.bf16.msra.mxu1 %v5590_v15  ;;  %3331 = vmatprep.mubr.bf16.mxu1 %v5746_v3 }
0x1a64   :  { %4703 = vmatprep.subr.msk.bf16.mxu1 %vm131_vm0, %v4698_v52 }
0x1a67   :  { %3302 = vmatpush1.bf16.msra.mxu1 %v3247_v18 }
0x1a68   :  { %3340 = vmatprep.subr.bf16.mxu1 %v5597_v19 }
0x1a6a   :  { %4704 = vmatmul.mubr.msk.bf16.vlgmr.msra.gmra.mrb[96].mxu1 %vm127_vm1, %v3147_v16 }
0x1a6b   :  { %3341 = vmatpush1.bf16.msra.mxu1 %v5595_v22  ;;  %3372 = vmatprep.mubr.bf16.mxu1 %v5746_v3  ;;  %v5600_v22 = vld [vmem:[%s6844_s2 + $0x340] sm:$0xff]  }
0x1a6c   :  { %4705 = vmatprep.subr.msk.bf16.mxu1 %vm131_vm0, %v4700_v23 }
0x1a6f   :  { %3343 = vmatpush1.bf16.msra.mxu1 %v3253_v25 }
0x1a70   :  { %5332 = vmatprep.subr.bf16.mxu1 %v5747_v21 }
0x1a72   :  { %4706 = vmatmul.mubr.msk.bf16.vlgmr.msra.gmra.mrb[100].mxu1 %vm127_vm1, %v3147_v16 }
0x1a73   :  { %5336 = vmatprep.mubr.msk.bf16.mxu1 %vm5748_vm2, %v5747_v21 }
0x1ae0   :  { %v3164_v26 = vpop.trf.xlu1 }
0x1ae4   :  { %v3165_v47 = vpop.trf.xlu1 }
0x1ae5   :  { %v3180_v28 = vpack.c.bf16 %v3165_v47, %v3164_v26 }
0x1ae7   :  { %5333 = vmatpush3.bf16.msra.mxu1 %v3180_v28  ;;  %5341 = vmatpush3.bf16.msra.mxu0 %v3180_v28 }
0x1ae8   :  { %v3166_v29 = vpop.trf.xlu1  ;;  %5334 = vmatprep.subr.bf16.mxu1 %v5747_v21  ;;  %5342 = vmatprep.subr.bf16.mxu0 %v5747_v21 }
0x1ae9   :  { %v3181_v3 = vpack.c.bf16 %v3166_v29, %v3166_v29 }
0x1aeb   :  { %v3389_v48 = vsel %vm131_vm0, %v3181_v3, 0 }
0x1aec   :  { %5335 = vmatpush3.bf16.msra.mxu1 %v3389_v48  ;;  %5343 = vmatpush3.bf16.msra.mxu0 %v3389_v48 }
0x1aed   :  { %5348 = vmatprep.subr.bf16.mxu1 %v5747_v21  ;;  %5356 = vmatprep.subr.bf16.mxu0 %v5747_v21 }
0x1b35   :  { %v3292_v31 = vpop.f32.mrb[92].mxu1 }
0x1b36   :  { %v3384_v32 = vpack.c.bf16 %v3292_v31, %v3292_v31  ;;  %v3294_v33 = vpop.f32.mrb[93].mxu1 }
0x1b37   :  { %v3431_v35 = vpack.c.bf16 %v3294_v33, %v3294_v33  ;;  %v3296_v36 = vpop.f32.mrb[94].mxu1 }
0x1b38   :  { %v3297_v37 = vpop.f32.mrb[95].mxu1  ;;  %5337 = vmatmul.mubr.msk.bf16.vlgmr.msra.gmra.mrb[104].mxu1 %vm127_vm1, %v3384_v32  ;;  %v5601_v32 = vld [vmem:[%s6844_s2 + $0x300] sm:$0xff]  }
0x1b39   :  { %5349 = vmatpush3.bf16.msra.mxu1 %v3180_v28  ;;  %5345 = vmatmul.mubr.msk.bf16.vlgmr.msra.gmra.mrb[64].mxu0 %vm127_vm1, %v3431_v35  ;;  %v5602_v35 = vld [vmem:[%s6844_s2 + $0x348] sm:$0xff]  }
0x1b3a   :  { %5350 = vmatprep.subr.bf16.mxu1 %v5747_v21  ;;  %5352 = vmatprep.mubr.msk.bf16.mxu1 %vm5748_vm2, %v5747_v21 }
0x1b3b   :  { %5358 = vmatprep.mubr.msk.bf16.mxu0 %vm5748_vm2, %v5747_v21 }
0x1b3d   :  { %5351 = vmatpush3.bf16.msra.mxu1 %v3389_v48  ;;  %v3333_v38 = vpop.f32.mrb[96].mxu1 }
0x1b3e   :  { %v3475_v61 = vpack.c.bf16 %v3333_v38, %v3333_v38  ;;  %v3335_v39 = vpop.f32.mrb[97].mxu1  ;;  %5362 = vmatprep.subr.bf16.mxu1 %v5747_v21  ;;  %v5603_v38 = vld [vmem:[%s6844_s2 + $0x380] sm:$0xff]  }
0x1b3f   :  { %v3381_v41 = vpack.c.bf16 %v3335_v39, %v3335_v39  ;;  %v3337_v42 = vpop.f32.mrb[98].mxu1 }
0x1b40   :  { %v3338_v43 = vpop.f32.mrb[99].mxu1  ;;  %5353 = vmatmul.mubr.msk.bf16.vlgmr.msra.gmra.mrb[108].mxu1 %vm127_vm1, %v3475_v61  ;;  %v5604_v61 = vld [vmem:[%s6844_s2 + $0x308] sm:$0xff]  }
0x1b41   :  { %v3560_v44 = vsel %vm131_vm0, %v3381_v41, 0  ;;  %5364 = vmatprep.mubr.msk.bf16.mxu1 %vm5748_vm2, %v5747_v21  ;;  %v5605_v41 = vld [vmem:[%s6844_s2 + $0x350] sm:$0xff]   ;;  %v5606_v42 = vld [vmem:[%s6844_s2 + $0x388] sm:$0xff]  }
0x1b42   :  { %5357 = vmatpush3.bf16.msra.mxu0 %v3560_v44  ;;  %v5607_v43 = vld [vmem:[%s6844_s2 + $0x310] sm:$0xff]   ;;  %v5608_v44 = vld [vmem:[%s6844_s2 + $0x358] sm:$0xff]  }
0x1b43   :  { %5368 = vmatprep.subr.bf16.mxu0 %v5747_v21 }
0x1b45   :  { %v3374_v45 = vpop.f32.mrb[100].mxu1 }
0x1b46   :  { %v3382_v46 = vpack.c.bf16 %v3374_v45, %v3374_v45  ;;  %v3376_v49 = vpop.f32.mrb[101].mxu1  ;;  %v5609_v45 = vld [vmem:[%s6844_s2 + $0x390] sm:$0xff]  }
0x1b47   :  { %v3378_v50 = vpop.f32.mrb[102].mxu1  ;;  %v3383_v47 = vpack.c.bf16 %v3376_v49, %v3376_v49  ;;  %v5611_v49 = vld [vmem:[%s6844_s2 + $0x360] sm:$0xff]  }
0x1b48   :  { %v3607_v51 = vsel %vm131_vm0, %v3382_v46, 0  ;;  %v3379_v53 = vpop.f32.mrb[103].mxu1  ;;  %v5610_v46 = vld [vmem:[%s6844_s2 + $0x318] sm:$0xff]  }
0x1b49   :  { %5363 = vmatpush3.bf16.msra.mxu1 %v3607_v51  ;;  %v3654_v48 = vsel %vm131_vm0, %v3383_v47, 0  ;;  %v5612_v50 = vld [vmem:[%s6844_s2 + $0x398] sm:$0xff]   ;;  %v5613_v51 = vld [vmem:[%s6844_s2 + $0x320] sm:$0xff]   ;;  %v5614_v53 = vld [vmem:[%s6844_s2 + $0x368] sm:$0xff]  }
0x1b4a   :  { %5016 = vmatprep.subr.bf16.mxu1 %v5600_v22 }
0x1c0b   :  { %v3425_v54 = vpop.f32.mrb[104].mxu1 }
0x1c0c   :  { %v3519_v55 = vadd.f32 %v6371_v27, %v3425_v54  ;;  %v5338_v56 = vpop.f32.mrb[105].mxu1  ;;  %v3469_v57 = vpop.f32.mrb[64].mxu0  ;;  %v5615_v54 = vld [vmem:[%s6844_s2 + $0x3a0] sm:$0xff]  }
0x1c0d   :  { %v3428_v34 = vpop.f32.mrb[106].mxu1  ;;  %v5346_v58 = vpop.f32.mrb[65].mxu0  ;;  %v3520_v59 = vadd.f32 %v6377_v30, %v3469_v57  ;;  %v5617_v56 = vld [vmem:[%s6844_s2 + $0x370] sm:$0xff]   ;;  %v5618_v57 = vld [vmem:[%s6844_s2 + $0x3a8] sm:$0xff]  }
0x1c0e   :  { %v5339_v60 = vpop.f32.mrb[107].mxu1  ;;  %v3472_v62 = vpop.f32.mrb[66].mxu0  ;;  %v3522_v63 = vsel %vm414_vm3, %v3519_v55, -inf  ;;  %v5619_v34 = vld [vmem:[%s6844_s2 + $0x330] sm:$0xff]   ;;  %v5620_v58 = vld [vmem:[%s6844_s2 + $0x378] sm:$0xff]  }
0x1c0f   :  { %v5347_v0 = vpop.f32.mrb[67].mxu0  ;;  %3523 = vmax.xlane.f32.xlu0 %v3522_v63  ;;  %v3525_v1 = vsel %vm414_vm3, %v3520_v59, -inf  ;;  %v5622_v60 = vld [vmem:[%s6844_s2 + $0x338] sm:$0xff]  }
0x1c10   :  { %v5623_v62 = vld [vmem:[%s6844_s2 + $0x3b8] sm:$0xff]  }
0x1c13   :  { %3526 = vmax.xlane.f32.xlu0 %v3525_v1  ;;  %v3513_v2 = vpop.f32.mrb[108].mxu1 }
0x1c14   :  { %v3521_v4 = vadd.f32 %v6385_v40, %v3513_v2  ;;  %v5354_v5 = vpop.f32.mrb[109].mxu1 }
0x1c15   :  { %v3516_v27 = vpop.f32.mrb[110].mxu1 }
0x1c16   :  { %v5355_v6 = vpop.f32.mrb[111].mxu1  ;;  %v3528_v7 = vsel %vm414_vm3, %v3521_v4, -inf }
0x1c17   :  { %3529 = vmax.xlane.f32.xlu0 %v3528_v7 }
0x1c9c   :  { %v3524_v8 = vpop.xlane.xlu0 %3523 }
0x1c9d   :  { %v3531_v30 = vsub.f32 %v3519_v55, %v3524_v8  ;;  %v5616_v55 = vld [vmem:[%s6844_s2 + $0x328] sm:$0xff]  }
0x1c9f   :  { %v3534_v9 = vmul.f32 1.442695, %v3531_v30 }
0x1ca0   :  { %v3527_v10 = vpop.xlane.xlu0 %3526 }
0x1ca1   :  { %5684 = vpow2.f32 %v3534_v9  ;;  %v3532_v11 = vsub.f32 %v3520_v59, %v3527_v10  ;;  %v5621_v59 = vld [vmem:[%s6844_s2 + $0x3b0] sm:$0xff]  }
0x1ca3   :  { %v3536_v12 = vmul.f32 1.442695, %v3532_v11 }
0x1ca4   :  { %v3530_v13 = vpop.xlane.xlu0 %3529 }
0x1ca5   :  { %5686 = vpow2.f32 %v3536_v12  ;;  %v3533_v15 = vsub.f32 %v3521_v4, %v3530_v13 }
0x1ca7   :  { %v3538_v16 = vmul.f32 1.442695, %v3533_v15 }
0x1ca9   :  { %5688 = vpow2.f32 %v3538_v16  ;;  %v4761_v16 = vld [vmem:[%s6845_s3 + $0xc8] sm:$0xff] }
0x1cab   :  { %v5685_v52 = vpop.eup %5684 }
0x1cac   :  { %v3540_v40 = vsel %vm414_vm3, %v5685_v52, 0.0 }
0x1cad   :  { %3541 = vadd.xlane.f32.xlu0 %v3540_v40 }
0x1caf   :  { %v5687_v17 = vpop.eup %5686 }
0x1cb0   :  { %v3543_v18 = vsel %vm414_vm3, %v5687_v17, 0.0 }
0x1cb1   :  { %3544 = vadd.xlane.f32.xlu0 %v3543_v18 }
0x1cb3   :  { %v5689_v19 = vpop.eup %5688 }
0x1cb4   :  { %v3546_v20 = vsel %vm414_vm3, %v5689_v19, 0.0 }
0x1cb5   :  { %3547 = vadd.xlane.f32.xlu0 %v3546_v20 }
0x1d3a   :  { %v3542_v23 = vpop.xlane.xlu0 %3541 }
0x1d3b   :  { %5690 = vrcp.f32 %v3542_v23 }
0x1d3e   :  { %v3545_v24 = vpop.xlane.xlu0 %3544 }
0x1d3f   :  { %5692 = vrcp.f32 %v3545_v24 }
0x1d42   :  { %v3548_v25 = vpop.xlane.xlu0 %3547 }
0x1d43   :  { %5694 = vrcp.f32 %v3548_v25 }
0x1d45   :  { %v5691_v26 = vpop.eup %5690 }
0x1d46   :  { %v3552_v28 = vmul.f32 %v5691_v26, %v5685_v52 }
0x1d48   :  { %v3555_v29 = vpack.c.bf16 %v3552_v28, %v3552_v28 }
0x1d49   :  { %v5693_v3 = vpop.eup %5692 }
0x1d4a   :  { %v3553_v31 = vmul.f32 %v5693_v3, %v5687_v17  ;;  %5359 = vmatmul.mubr.msk.bf16.vlgmr.msra.gmra.mrb[68].mxu0 %vm414_vm3, %v3555_v29 }
0x1d4b   :  { %5369 = vmatpush3.bf16.msra.mxu0 %v3654_v48  ;;  %5370 = vmatprep.mubr.msk.bf16.mxu0 %vm5748_vm2, %v5747_v21 }
0x1d4c   :  { %v3602_v33 = vpack.c.bf16 %v3553_v31, %v3553_v31  ;;  %5374 = vmatprep.subr.bf16.mxu0 %v5747_v21  ;;  %v5624_v31 = vld [vmem:[%s6843_s1 + $0x114] ss:$28 sps:$4 sm:$0xff]  }
0x1d4d   :  { %v5695_v36 = vpop.eup %5694 }
0x1d4e   :  { %v3554_v37 = vmul.f32 %v5695_v36, %v5689_v19  ;;  %5365 = vmatmul.mubr.msk.bf16.vlgmr.msra.gmra.mrb[112].mxu1 %vm414_vm3, %v3602_v33  ;;  %v5626_v33 = vld [vmem:[%s6844_s2 + $0x3c0] sm:$0xff]   ;;  %v5628_v36 = vld [vmem:[%s6844_s2 + $0x3d0] sm:$0xff]  }
0x1d4f   :  { %5017 = vmatpush3.bf16.msra.mxu1 %v5601_v32  ;;  %v5625_v32 = vld [vmem:[%s6843_s1 + $0x14c] ss:$0 sps:$4 sm:$0xff]  }
0x1d50   :  { %v3649_v39 = vpack.c.bf16 %v3554_v37, %v3554_v37  ;;  %5018 = vmatprep.subr.bf16.mxu1 %v5602_v35  ;;  %v5627_v35 = vld [vmem:[%s6844_s2 + $0x3c8] sm:$0xff]   ;;  %v5629_v37 = vld [vmem:[%s6844_s2 + $0x3d8] sm:$0xff]  }
0x1d52   :  { %5371 = vmatmul.mubr.msk.bf16.vlgmr.msra.gmra.mrb[72].mxu0 %vm414_vm3, %v3649_v39 }
0x1d53   :  { %5375 = vmatpush3.bf16.msra.mxu0 %v5603_v38  ;;  %5019 = vmatpush3.bf16.msra.mxu1 %v5604_v61  ;;  %v5630_v38 = vld [vmem:[%s6844_s2 + $0x3e0] sm:$0xff]   ;;  %v5631_v61 = vld [vmem:[%s6844_s2 + $0x3e8] sm:$0xff]  }
0x1d54   :  { %5376 = vmatprep.subr.bf16.mxu0 %v5747_v21  ;;  %5020 = vmatprep.subr.bf16.mxu1 %v5605_v41 }
0x1d55   :  { %5390 = vmatprep.mubr.msk.bf16.mxu0 %vm5748_vm2, %v5747_v21 }
0x1d57   :  { %5377 = vmatpush3.bf16.msra.mxu0 %v5606_v42  ;;  %5021 = vmatpush3.bf16.msra.mxu1 %v5607_v43 }
0x1d58   :  { %5378 = vmatprep.subr.bf16.mxu0 %v5747_v21  ;;  %5022 = vmatprep.subr.bf16.mxu1 %v5608_v44  ;;  %v4786_v44 = vld [vmem:[%s6845_s3 + $0xa8] sm:$0xff] }
0x1d5b   :  { %5379 = vmatpush3.bf16.msra.mxu0 %v5609_v45  ;;  %5023 = vmatpush3.bf16.msra.mxu1 %v5610_v46  ;;  %v4787_v46 = vld [vmem:[%s6845_s3 + $0xb0] sm:$0xff] }
0x1d5c   :  { %5380 = vmatprep.subr.bf16.mxu0 %v5747_v21  ;;  %5024 = vmatprep.subr.bf16.mxu1 %v5611_v49 }
0x1d5f   :  { %5381 = vmatpush3.bf16.msra.mxu0 %v5612_v50  ;;  %5025 = vmatpush3.bf16.msra.mxu1 %v5613_v51 }
0x1d60   :  { %5382 = vmatprep.subr.bf16.mxu0 %v5747_v21  ;;  %5026 = vmatprep.subr.bf16.mxu1 %v5614_v53  ;;  %v5632_v53 = vld [vmem:[%s6844_s2 + $0x3f0] sm:$0xff]  }
0x1d63   :  { %5383 = vmatpush3.bf16.msra.mxu0 %v5615_v54  ;;  %5027 = vmatpush3.bf16.msra.mxu1 %v5616_v55  ;;  %v5633_v54 = vld [vmem:[%s6844_s2 + $0x3f8] sm:$0xff]   ;;  %v4791_v55 = vld [vmem:[%s6845_s3 + $0xd0] sm:$0xff] }
0x1d64   :  { %5384 = vmatprep.subr.bf16.mxu0 %v5747_v21  ;;  %5028 = vmatprep.subr.bf16.mxu1 %v5617_v56 }
0x1d67   :  { %5385 = vmatpush3.bf16.msra.mxu0 %v5618_v57  ;;  %5029 = vmatpush3.bf16.msra.mxu1 %v5619_v34 }
0x1d68   :  { %5386 = vmatprep.subr.bf16.mxu0 %v5747_v21  ;;  %5030 = vmatprep.subr.bf16.mxu1 %v5620_v58 }
0x1d6b   :  { %5387 = vmatpush3.bf16.msra.mxu0 %v5621_v59  ;;  %5031 = vmatpush3.bf16.msra.mxu1 %v5622_v60 }
0x1d6c   :  { %5388 = vmatprep.subr.bf16.mxu0 %v5747_v21  ;;  %5394 = vmatprep.subr.bf16.mxu1 %v5747_v21 }
0x1d6f   :  { %5389 = vmatpush3.bf16.msra.mxu0 %v5623_v62 }
0x1d70   :  { %5402 = vmatprep.subr.bf16.mxu0 %v5747_v21 }
0x1e1d   :  { %v3596_v63 = vpop.f32.mrb[68].mxu0 }
0x1e1e   :  { %v5360_v0 = vpop.f32.mrb[69].mxu0  ;;  %v3696_v6 = vpack.c.bf16 %v3596_v63, %v3596_v63  ;;  %v4811_v63 = vld [vmem:[%s6845_s3 + $0xd8] sm:$0xff] }
0x1e1f   :  { %v3599_v1 = vpop.f32.mrb[70].mxu0 }
0x1e20   :  { %v5361_v2 = vpop.f32.mrb[71].mxu0 }
0x1e21   :  { %v3643_v4 = vpop.f32.mrb[112].mxu1 }
0x1e22   :  { %v3697_v5 = vpack.c.bf16 %v3643_v4, %v3643_v4  ;;  %v5366_v27 = vpop.f32.mrb[113].mxu1 }
0x1e23   :  { %v3646_v7 = vpop.f32.mrb[114].mxu1 }
0x1e24   :  { %v5367_v8 = vpop.f32.mrb[115].mxu1  ;;  %3926 = vmatprep.mubr.bf16.mxu1 %v3697_v5 }
0x1e25   :  { %v3690_v30 = vpop.f32.mrb[72].mxu0  ;;  %3927 = vmatmul.mubr.bf16.vlgmr.msra.gmra.mrb[116].mxu1 %v3696_v6 }
0x1e26   :  { %v3698_v9 = vpack.c.bf16 %v3690_v30, %v3690_v30  ;;  %v5372_v10 = vpop.f32.mrb[73].mxu0  ;;  %5398 = vmatprep.mubr.msk.bf16.mxu1 %vm5748_vm2, %v5747_v21  ;;  %5395 = vmatpush3.bf16.msra.mxu1 %v5624_v31 }
0x1e27   :  { %v3693_v11 = vpop.f32.mrb[74].mxu0  ;;  %5396 = vmatprep.subr.bf16.mxu1 %v5747_v21 }
0x1e28   :  { %v5373_v12 = vpop.f32.mrb[75].mxu0  ;;  %5391 = vmatmul.mubr.bf16.vlgmr.msra.gmra.mrb[76].mxu0 %v3698_v9 }
0x1e29   :  { %5418 = vmatprep.mubr.msk.bf16.mxu0 %vm5748_vm2, %v5747_v21  ;;  %5403 = vmatpush3.bf16.msra.mxu0 %v5626_v33  ;;  %v4823_v33 = vld [vmem:[%s6845_s3 + $0xe8] sm:$0xff] }
0x1e2a   :  { %5404 = vmatprep.subr.bf16.mxu0 %v5747_v21 }
0x1e2d   :  { %5405 = vmatpush3.bf16.msra.mxu0 %v5627_v35 }
0x1e2e   :  { %5406 = vmatprep.subr.bf16.mxu0 %v5747_v21 }
0x1e31   :  { %5407 = vmatpush3.bf16.msra.mxu0 %v5628_v36 }
0x1e32   :  { %5408 = vmatprep.subr.bf16.mxu0 %v5747_v21 }
0x1e35   :  { %5409 = vmatpush3.bf16.msra.mxu0 %v5629_v37  ;;  %v4206_v37 = vld [vmem:[%s6847_s5] sm:$0xff] }
0x1e36   :  { %5410 = vmatprep.subr.bf16.mxu0 %v5747_v21 }
0x1e39   :  { %5411 = vmatpush3.bf16.msra.mxu0 %v5630_v38 }
0x1e3a   :  { %5412 = vmatprep.subr.bf16.mxu0 %v5747_v21 }
0x1e3d   :  { %5413 = vmatpush3.bf16.msra.mxu0 %v5631_v61 }
0x1e3e   :  { %5414 = vmatprep.subr.bf16.mxu0 %v5747_v21 }
0x1e41   :  { %5415 = vmatpush3.bf16.msra.mxu0 %v5632_v53 }
0x1e42   :  { %5416 = vmatprep.subr.bf16.mxu0 %v5747_v21 }
0x1e45   :  { %5417 = vmatpush3.bf16.msra.mxu0 %v5633_v54 }
0x1ef8   :  { %v5032_v13 = vpop.f32.mrb[116].mxu1 }
0x1ef9   :  { %v5033_v15 = vpop.f32.mrb[117].mxu1 }
0x1efa   :  { %v5034_v52 = vadd.f32 %v5033_v15, %v5032_v13  ;;  %v5035_v40 = vpop.f32.mrb[118].mxu1 }
0x1efb   :  { %v5036_v17 = vpop.f32.mrb[119].mxu1  ;;  %v3968_v18 = vpop.f32.mrb[76].mxu0  ;;  %v4821_v40 = vld [vmem:[%s6845_s3 + $0xc0] sm:$0xff] }
0x1efc   :  { %v3929_v19 = vadd.f32 %v5034_v52, %v4761_v16  ;;  %v5392_v20 = vpop.f32.mrb[77].mxu0  ;;  %v4820_v16 = vld [vmem:[%s6845_s3 + $0xb8] sm:$0xff] }
0x1efd   :  { %v3971_v22 = vpop.f32.mrb[78].mxu0 }
0x1efe   :  { %v3969_v23 = vadd.f32 %v3968_v18, %v3929_v19  ;;  %v5393_v24 = vpop.f32.mrb[79].mxu0 }
0x1f00   :  { %v3974_v25 = vadd.f32 %v3969_v23, %v6575_v14  ;;  %v4013_v14 = vsel %vm131_vm0, %v5625_v32, 0  ;;  %v4822_v32 = vld [vmem:[%s6845_s3 + $0xe0] sm:$0xff]  ;;  %s5749_s3 = smov [#allocation2]  }
0x1f01   :  { %5397 = vmatpush3.bf16.msra.mxu1 %v4013_v14  ;;  %s4310_s5 = sshll.u32 %s5749_s3, 4  ;;  %s4311_s5 = int_to_ptr.vmem [resolvable:$true] %s4310_s5 }
0x1f02   :  { %v3979_v26 = vsel %vm127_vm1, %v3974_v25, 0.0  ;;  %5422 = vmatprep.subr.bf16.mxu1 %v5747_v21  ;;  %p5715_p1 = scmp.lt.s32.totalorder %s4311_s5, %s4311_s5 }
0x1f03   :  { %3980 = vadd.xlane.f32.xlu0 %v3979_v26  ;;  %v5634_v26 = vld [vmem:[%s6846_s4] sm:$0xff]  }
0x1f90   :  { %v3981_v47 = vpop.xlane.xlu0 %3980 }
0x1f91   :  { %v3982_v28 = vmul.f32 0.041666668, %v3981_v47  ;;  %v5635_v47 = vld [vmem:[%s6846_s4 + $0x8] ss:$0 sps:$4 sm:$0xff]  }
0x1f93   :  { %v3983_v29 = vsub.f32 %v3974_v25, %v3982_v28  ;;  %v4220_v28 = vsel %vm131_vm0, %v5635_v47, 0 }
0x1f95   :  { %v3984_v3 = vmul.f32 %v3983_v29, %v3983_v29 }
0x1f97   :  { %v3985_v48 = vsel %vm127_vm1, %v3984_v3, 0.0 }
0x1f98   :  { %3986 = vadd.xlane.f32.xlu0 %v3985_v48 }
0x2025   :  { %v3987_v39 = vpop.xlane.xlu0 %3986 }
0x2026   :  { %v3988_v41 = vmul.f32 0.041666668, %v3987_v39 }
0x2028   :  { %v3989_v42 = vadd.f32 1e-05, %v3988_v41 }
0x202a   :  { %5696 = vrsqrt.f32 %v3989_v42 }
0x2034   :  { %v5697_v43 = vpop.eup %5696 }
0x2035   :  { %v3991_v45 = vmul.f32 %v5697_v43, %v3983_v29  ;;  %v4275_v43 = vld [vmem:[%s6849_s7] sm:$0xff]  ;;  %s5710_s7 = scalar_lea.vmem %s4311_s5, 128 }
0x2036   :  { %p5711_p0 = scmp.ne.s32.totalorder %s4311_s5, %s5710_s7  ;;  %p5716_p2 = scmp.lt.s32.totalorder %s5710_s7, %s5710_s7 }
0x2037   :  { %v3992_v49 = vmul.f32 %v4786_v44, %v3991_v45 }
0x2038   :  { %p5717_p3 = por %p5716_p2, %p5715_p1 }
0x2039   :  { %v3993_v50 = vadd.f32 %v4787_v46, %v3992_v49  ;;  %v4273_v49 = vlaneseq }
0x203a   :  { %p5718_p4 = pnand %p5717_p3, %p5711_p0 }
0x203b   :  { %v3994_v51 = vpack.c.bf16 %v3993_v50, %v3993_v50 }
0x203d   :  { %5399 = vmatmul.mubr.msk.bf16.vlgmr.msra.gmra.mrb[120].mxu1 %vm127_vm1, %v3994_v51 }
0x203e   :  { %5426 = vmatprep.mubr.msk.bf16.mxu1 %vm5748_vm2, %v5747_v21  ;;  %5423 = vmatpush3.bf16.msra.mxu1 %v5634_v26 }
0x203f   :  { %5424 = vmatprep.subr.bf16.mxu1 %v5747_v21 }
0x2042   :  { %5425 = vmatpush3.bf16.msra.mxu1 %v4220_v28 }
0x2110   :  { %v4049_v56 = vpop.f32.mrb[120].mxu1 }
0x2111   :  { %v4050_v57 = vadd.f32 %v4791_v55, %v4049_v56  ;;  %v5400_v34 = vpop.f32.mrb[121].mxu1 }
0x2112   :  { %v4052_v58 = vpop.f32.mrb[122].mxu1 }
0x2113   :  { %v4055_v59 = vmax.f32 %v4050_v57, 0.0  ;;  %v5401_v60 = vpop.f32.mrb[123].mxu1  ;;  %v4285_v57 = vshrl.u32 %v4273_v49, 7 }
0x2115   :  { %v4056_v62 = vpack.c.bf16 %v4055_v59, %v4055_v59  ;;  %vm4286_vm5 = vcmp.lt.s32.totalorder %v4285_v57, 6 }
0x2117   :  { %5419 = vmatmul.mubr.bf16.vlgmr.msra.gmra.mrb[80].mxu0 %v4056_v62 }
0x21ea   :  { %v4157_v0 = vpop.f32.mrb[80].mxu0 }
0x21eb   :  { %v4158_v1 = vadd.f32 %v4811_v63, %v4157_v0  ;;  %v5420_v2 = vpop.f32.mrb[81].mxu0 }
0x21ec   :  { %v4160_v4 = vpop.f32.mrb[82].mxu0 }
0x21ed   :  { %v5421_v5 = vpop.f32.mrb[83].mxu0  ;;  %v4163_v27 = vadd.f32 %v4158_v1, %v3993_v50  ;;  %v4274_v50 = vand.u32 127, %v4273_v49 }
0x21ef   :  { %v4168_v6 = vsel %vm127_vm1, %v4163_v27, 0.0 }
0x21f0   :  { %4169 = vadd.xlane.f32.xlu1 %v4168_v6 }
0x227d   :  { %v4170_v7 = vpop.xlane.xlu1 %4169 }
0x227e   :  { %v4171_v8 = vmul.f32 0.041666668, %v4170_v7 }
0x2280   :  { %v4172_v30 = vsub.f32 %v4163_v27, %v4171_v8 }
0x2282   :  { %v4173_v9 = vmul.f32 %v4172_v30, %v4172_v30 }
0x2284   :  { %v4174_v10 = vsel %vm127_vm1, %v4173_v9, 0.0 }
0x2285   :  { %4175 = vadd.xlane.f32.xlu0 %v4174_v10 }
0x2312   :  { %v4176_v11 = vpop.xlane.xlu0 %4175 }
0x2313   :  { %v4177_v12 = vmul.f32 0.041666668, %v4176_v11 }
0x2315   :  { %v4178_v13 = vadd.f32 1e-05, %v4177_v12 }
0x2317   :  { %5698 = vrsqrt.f32 %v4178_v13 }
0x2321   :  { %v5699_v15 = vpop.eup %5698 }
0x2322   :  { %v4180_v52 = vmul.f32 %v5699_v15, %v4172_v30 }
0x2324   :  { %v4181_v17 = vmul.f32 %v4820_v16, %v4180_v52 }
0x2326   :  { %v4182_v18 = vadd.f32 %v4821_v40, %v4181_v17 }
0x2328   :  { %v4187_v19 = vsel %vm127_vm1, %v4182_v18, 0.0 }
0x2329   :  { %4188 = vadd.xlane.f32.xlu0 %v4187_v19 }
0x23b6   :  { %v4189_v20 = vpop.xlane.xlu0 %4188 }
0x23b7   :  { %v4190_v22 = vmul.f32 0.041666668, %v4189_v20 }
0x23b9   :  { %v4191_v23 = vsub.f32 %v4182_v18, %v4190_v22 }
0x23bb   :  { %v4192_v24 = vmul.f32 %v4191_v23, %v4191_v23 }
0x23bd   :  { %v4193_v25 = vsel %vm127_vm1, %v4192_v24, 0.0 }
0x23be   :  { %4194 = vadd.xlane.f32.xlu0 %v4193_v25 }
0x244b   :  { %v4195_v29 = vpop.xlane.xlu0 %4194 }
0x244c   :  { %v4196_v3 = vmul.f32 0.041666668, %v4195_v29 }
0x244e   :  { %v4197_v48 = vadd.f32 1e-05, %v4196_v3 }
0x2450   :  { %5700 = vrsqrt.f32 %v4197_v48 }
0x245a   :  { %v5701_v31 = vpop.eup %5700 }
0x245b   :  { %v4199_v14 = vmul.f32 %v5701_v31, %v4191_v23 }
0x245d   :  { %v4200_v35 = vmul.f32 %v4822_v32, %v4199_v14 }
0x245f   :  { %v4201_v36 = vadd.f32 %v4823_v33, %v4200_v35 }
0x2461   :  { %v4202_v21 = vpack.c.bf16 %v4201_v36, %v4201_v36 }
0x2463   :  { %5427 = vmatmul.mubr.msk.bf16.vlgmr.msra.gmra.mrb[124].mxu1 %vm127_vm1, %v4202_v21 }
0x2536   :  { %v4256_v38 = vpop.f32.mrb[124].mxu1 }
0x2537   :  { %v4257_v61 = vadd.f32 %v4256_v38, %v4206_v37  ;;  %v5428_v39 = vpop.f32.mrb[125].mxu1 }
0x2538   :  { %v4259_v41 = vpop.f32.mrb[126].mxu1 }
0x2539   :  { %4262 = vst [vmem:[#allocation2] sm:$0xff] %v4257_v61  ;;  %4263 = vmax.xlane.f32.xlu0 %v4257_v61  ;;  %v5429_v42 = vpop.f32.mrb[127].mxu1 }
0x254f   :  { %4277 = vperm.xlu0 %5437, %v4275_v43  }
0x25c6   :  { %v4264_v44 = vpop.xlane.xlu0 %4263 }
0x25c7   :  { %v4265_v45 = vsub.f32 %v4257_v61, %v4264_v44 }
0x25c9   :  { %v4266_v46 = vmul.f32 1.442695, %v4265_v45 }
0x25cb   :  { %5702 = vpow2.f32 %v4266_v46 }
0x25ce   :  { %v4278_v51 = vpop.permute.xlu0 %4277 }
0x25cf   :  { %vm4279_vm4 = vcmp.eq.s32.totalorder %v4274_v50, %v4278_v51 }
0x25d0   :  { %v4280_v54 = vsel %vm4279_vm4, %v4257_v61, 0.0 }
0x25d5   :  { %v5703_v53 = vpop.eup %5702 }
0x25d6   :  { %4268 = vadd.xlane.f32.xlu1 %v5703_v53 }
0x25da   :  { %4281 = vadd.xlane.f32.xlu1 %v4280_v54 }
0x2663   :  { %v4269_v55 = vpop.xlane.xlu1 %4268 }
0x2664   :  { %5704 = vlog2.f32 %v4269_v55 }
0x2667   :  { %v4282_v59 = vpop.xlane.xlu1 %4281 }
0x266e   :  { %v5705_v56 = vpop.eup %5704 }
0x266f   :  { %v4271_v34 = vmul.f32 0.6931472, %v5705_v56 }
0x2671   :  { %v4272_v58 = vadd.f32 %v4271_v34, %v4264_v44 }
0x2673   :  { %v4283_v60 = vsub.f32 %v4272_v58, %v4282_v59 }
0x2675   :  { %v4287_v62 = vsel %vm4286_vm5, %v4283_v60, 0.0 }
0x2676   :  { %v4289_v63 = vsel %vm4288_vm6, %v4287_v62, 0.0 }
0x2677   :  { %4290 = vadd.xlane.f32.xlu1 %v4289_v63 }
0x2678   :  { %5721 = shalt.err (!%p5718_p4)
}
0x2679   :  { %s5722_s11 = scalar_lea.hbm %s6850_s8, 128 }
0x267a   :  { %p5723_p5 = scmp.ne.s32.totalorder %s6850_s8, %s5722_s11  ;;  %p5726_p6 = scmp.lt.u32.totalorder %s5722_s11, %s6850_s8 }
0x267c   :  { %p5728_p7 = pnand %p5726_p6, %p5723_p5 }
0x267e   :  { %5731 = shalt.err (!%p5728_p7)
}
0x267f   :  { %4313 = dma.vmem_to_hbm [thread:$0]  %s4311_s5, 128, %s6850_s8, [#allocation3]  }
0x2680   :  { %s5732_s21 = scalar_lea.hbm %s6851_s9, 16 }
0x2681   :  { %p5733_p8 = scmp.ne.s32.totalorder %s6851_s9, %s5732_s21  ;;  %p5736_p9 = scmp.lt.u32.totalorder %s5732_s21, %s6851_s9 }
0x2683   :  { %p5738_p10 = pnand %p5736_p9, %p5733_p8 }
0x2704   :  { %v4291_v0 = vpop.xlane.xlu1 %4290 }
0x2705   :  { %v4292_v1 = vrot.slane %v4291_v0, 4 }
0x2707   :  { %v4293_v2 = vadd.f32 %v4292_v1, %v4291_v0 }
0x2709   :  { %v4294_v4 = vrot.slane %v4293_v2, 2 }
0x270b   :  { %v4295_v5 = vadd.f32 %v4294_v4, %v4293_v2 }
0x270d   :  { %v4296_v27 = vrot.slane %v4295_v5, 1 }
0x270f   :  { %v4297_v6 = vadd.f32 %v4296_v27, %v4295_v5 }
0x2711   :  { %5430 = vpush %v4297_v6 }
0x2742   :  { %s5431_s18 = spop %5430 }
0x2743   :  { %s4301_s2 = smul.f32 0.16666667, %s5431_s18 }
0x2745   :  { %4303 = sst [smem:[#allocation5]] %s4301_s2 }
0x2746   :  { %5741 = shalt.err (!%p5738_p10)
}
0x2747   :  { %s5750_s24 = smov [#allocation5]  }
0x2748   :  { %4321 = dma.smem_to_hbm %s5750_s24, 16, %s6851_s9, [#allocation4]  }
0x2749   :  { %5742 = dma.done.wait [#allocation3], 128  }
0x274a   :  { %5743 = vsyncadd [#allocation3], 4294967168 }
0x274b   :  { %5744 = dma.done.wait [#allocation4], 16  }
0x274c   :  { %5745 = vsyncadd [#allocation4], 4294967280 }
0x274d   :  { %4328 = sfence }
0x274e   :  { %4329 = vsyncpa [#allocation3], 1 }
0x274f   :  { %4330 = vsyncpa [#allocation4], 1 }

</bundles_post_ra>
